<compile_context>
chip_gen: v7x
topology: tpu7x:2x2x1
jax: 0.10.0
libtpu: 0.0.40
codegen_flags: <defaults>
</compile_context>

<pallas_src>
import jax
import jax.numpy as jnp
from jax.experimental import pallas as pl
from jax.experimental.pallas import tpu as pltpu


# ---------------------------------------------------------------------------
# Kernel
# ---------------------------------------------------------------------------
def _aux_head_kernel(x_ref, w1_ref, bnb_ref, w2_ref, w3_ref, b3_ref,
                     out_ref, feat_ref):
    """One batch tile of the aux head, fully resident in VMEM.

    x_ref   : (49, TN, C)   bf16  ReLU input, spatial-major (s = h*7+w)
    w1_ref  : (C, 128)      bf16  1x1 conv weight, BN scale & 1/25 divisor folded in
    bnb_ref : (1, 128)      f32   BN shift (beta - mean * scale)
    w2_ref  : (512, 768)    bf16  2x2 conv, taps along K (tap = kh*2 + kw)
    w3_ref  : (768, NPAD)   f32-> bf16 classifier weight, lane-padded
    b3_ref  : (1, NPAD)     f32   classifier bias, lane-padded
    out_ref : (TN, NPAD)    f32   logits (padded classes stay zero)
    feat_ref: (TN, 512)     f32   VMEM scratch holding the 4 pooled tap slabs
    """
    tn = x_ref.shape[1]
    c_in = x_ref.shape[2]
    cm = w1_ref.shape[1]                      # 128 mid channels

    # ReLU on the streamed tile (bf16 cast in the wrapper commutes with ReLU).
    # Elementwise math stays in f32 (v5e has no bf16 VALU).
    xr = jnp.maximum(x_ref[...].astype(jnp.float32), 0.0).reshape(49 * tn, c_in)

    # --- 1x1 conv FIRST (commutes with the linear pool) -> lane-dense 128 ch ---
    if c_in >= 32:
        # MXU path: one (49*TN, C) @ (C, 128) matmul, f32 accumulation.
        h = jnp.dot(xr.astype(jnp.bfloat16), w1_ref[...],
                    preferred_element_type=jnp.float32)           # (49*TN, 128)
    else:
        # Tiny-C path (demo C=4): K=C would be MXU fill/drain latency and waste
        # 124/128 lanes -- use a C-term broadcast FMA chain on the VPU instead.
        w1f = w1_ref[...].astype(jnp.float32)                     # (C, 128)
        h = xr[:, 0:1] * w1f[0:1, :]
        for c in range(1, c_in):
            h = h + xr[:, c:c + 1] * w1f[c:c + 1, :]              # (49*TN, 128)

    # --- AvgPool2d(5, stride=2) as 25 unit-stride slab adds per tap (VPU) ---
    # 1/25 divisor already folded into w1; BN shift + ReLU applied per tap.
    # Tap t = oh*2 + ow matches the conv2 weight layout built in the wrapper.
    for t in range(4):
        oh, ow = divmod(t, 2)
        acc = None
        for dh in range(5):
            for dw in range(5):
                s = (2 * oh + dh) * 7 + (2 * ow + dw)
                slab = h[s * tn:(s + 1) * tn, :]                  # (TN, 128)
                acc = slab if acc is None else acc + slab
        act = jnp.maximum(acc + bnb_ref[...], 0.0)                # (TN, 128) f32
        feat_ref[:, t * cm:(t + 1) * cm] = act                    # aligned slab store

    # --- 2x2 conv as ONE K=512 matmul over the 4 concatenated tap slabs ---
    a2 = jnp.dot(feat_ref[...].astype(jnp.bfloat16), w2_ref[...],
                 preferred_element_type=jnp.float32)              # (TN, 768)
    f2 = jnp.maximum(a2, 0.0)

    # --- classifier (lane-padded output -> unmasked full-width stores) ---
    logits = jnp.dot(f2.astype(jnp.bfloat16), w3_ref[...],
                     preferred_element_type=jnp.float32) + b3_ref[...]
    out_ref[...] = logits.astype(out_ref.dtype)


# ---------------------------------------------------------------------------
# Wrapper (layout / constant-folding glue only)
# ---------------------------------------------------------------------------
def _round_up(a, b):
    return (a + b - 1) // b * b


def _pick_tn(n, tn_max):
    """Batch tile size: large enough to feed the MXU, small enough that moderate
    batches still give grid_n >= 2 (so v7x's two TensorCores both get work)."""
    tn_max = max(8, _round_up(tn_max, 8))
    if n >= 2 * tn_max:
        return tn_max
    if n >= 16:
        return min(tn_max, _round_up(-(-n // 2), 8))
    return 8


def aux_head_forward(x_nchw, params, *, bn_eps=1e-5, tn_max=128):
    """NCHW PyTorch-style input -> logits (N, num_classes).

    tn_max: cap on the batch tile.  128 saturates the v5e MXU row dim; 256 may be
    used on v6e/v7x for very large batches (mind v7x's 64 MiB VMEM for large C)."""
    N, C, H, W = x_nchw.shape
    assert H == 7 and W == 7, "aux head requires 7x7 spatial input"

    c_mid = params["bn_gamma"].shape[0]                 # 128
    ncls = params["fc_w"].shape[0]
    npad = _round_up(ncls, 128)                         # lane-dense output

    tn = _pick_tn(N, tn_max)
    nb = _round_up(N, tn)                               # padded batch
    grid_n = nb // tn

    # --- input layout: NCHW -> spatial-major (49, Nb, C), streamed as bf16 ---
    x = jnp.transpose(x_nchw, (2, 3, 0, 1)).reshape(49, N, C)
    x = jnp.pad(x, ((0, 0), (0, nb - N), (0, 0))).astype(jnp.bfloat16)

    # --- weight prep (constant folding / reshapes) ---
    scale = params["bn_gamma"] / jnp.sqrt(params["bn_var"] + bn_eps)      # (128,)
    shift = params["bn_beta"] - params["bn_mean"] * scale
    # fold BN scale and the 1/25 avg-pool divisor into the 1x1 conv weight
    w1 = (params["conv1_w"][:, :, 0, 0] * (scale / 25.0)[:, None]).T      # (C, 128)
    w1 = w1.astype(jnp.bfloat16)
    bnb = shift.reshape(1, c_mid).astype(jnp.float32)
    # (768,128,2,2) -> (kh,kw,cin,cout) -> (512, 768), tap = kh*2+kw along K
    w2 = jnp.transpose(params["conv2_w"], (2, 3, 1, 0)).reshape(4 * c_mid, 768)
    w2 = w2.astype(jnp.bfloat16)
    w3 = jnp.pad(params["fc_w"].T, ((0, 0), (0, npad - ncls))).astype(jnp.bfloat16)
    b3 = jnp.pad(params["fc_b"].reshape(1, -1),
                 ((0, 0), (0, npad - ncls))).astype(jnp.float32)

    # --- advisory cost estimate ---
    flops = (2 * nb * (49 * C * c_mid + 4 * c_mid * 768 + 768 * npad)
             + nb * 4 * 25 * c_mid)
    bytes_accessed = (x.size * 2 + w1.size * 2 + bnb.size * 4 + w2.size * 2
                      + w3.size * 2 + b3.size * 4 + nb * npad * 4)
    cost = pl.CostEstimate(flops=int(flops), transcendentals=0,
                           bytes_accessed=int(bytes_accessed))

    out = pl.pallas_call(
        _aux_head_kernel,
        out_shape=jax.ShapeDtypeStruct((nb, npad), jnp.float32),
        grid=(grid_n,),
        in_specs=[
            pl.BlockSpec((49, tn, C), lambda i: (0, i, 0)),   # streamed batch tile
            pl.BlockSpec(w1.shape, lambda i: (0, 0)),         # resident weights
            pl.BlockSpec(bnb.shape, lambda i: (0, 0)),
            pl.BlockSpec(w2.shape, lambda i: (0, 0)),
            pl.BlockSpec(w3.shape, lambda i: (0, 0)),
            pl.BlockSpec(b3.shape, lambda i: (0, 0)),
        ],
        out_specs=pl.BlockSpec((tn, npad), lambda i: (i, 0)),
        scratch_shapes=[pltpu.VMEM((tn, 4 * c_mid), jnp.float32)],
        compiler_params=pltpu.CompilerParams(
            dimension_semantics=("parallel",),
            vmem_limit_bytes=48 * 1024 * 1024),                # fits v7x's 64 MiB
        cost_estimate=cost,
    )(x, w1, bnb, w2, w3, b3)

    return out[:N, :ncls]


# ---------------------------------------------------------------------------
# Synthetic params + pure-JAX reference (PyTorch semantics, BN eval mode)
# ---------------------------------------------------------------------------
def init_params(key, C, num_classes):
    ks = jax.random.split(key, 7)
    return {
        "conv1_w": 0.10 * jax.random.normal(ks[0], (128, C, 1, 1), jnp.float32),
        "bn_gamma": 1.0 + 0.1 * jax.random.normal(ks[1], (128,), jnp.float32),
        "bn_beta": 0.1 * jax.random.normal(ks[2], (128,), jnp.float32),
        "bn_mean": 0.1 * jax.random.normal(ks[3], (128,), jnp.float32),
        "bn_var": 0.5 + jnp.abs(jax.random.normal(ks[4], (128,), jnp.float32)),
        "conv2_w": 0.05 * jax.random.normal(ks[5], (768, 128, 2, 2), jnp.float32),
        "fc_w": 0.05 * jax.random.normal(ks[6], (num_classes, 768), jnp.float32),
        "fc_b": jnp.linspace(-0.1, 0.1, num_classes).astype(jnp.float32),
    }


def reference_forward(x, p, bn_eps=1e-5):
    x = jnp.maximum(x, 0.0)
    pooled = jax.lax.reduce_window(x, 0.0, jax.lax.add,
                                   (1, 1, 5, 5), (1, 1, 2, 2), "VALID") / 25.0
    h = jax.lax.conv_general_dilated(pooled, p["conv1_w"], (1, 1), "VALID")
    scale = p["bn_gamma"] / jnp.sqrt(p["bn_var"] + bn_eps)
    shift = p["bn_beta"] - p["bn_mean"] * scale
    h = h * scale[None, :, None, None] + shift[None, :, None, None]
    h = jnp.maximum(h, 0.0)
    h = jax.lax.conv_general_dilated(h, p["conv2_w"], (1, 1), "VALID")
    h = jnp.maximum(h, 0.0)
    flat = h.reshape(h.shape[0], -1)                       # (N, 768)
    return flat @ p["fc_w"].T + p["fc_b"]


if __name__ == "__main__":
    key = jax.random.PRNGKey(0)
    kx, kp = jax.random.split(key)

    # Small deterministic test (single grid step).
    N, C, num_classes = 2, 4, 10
    x = jax.random.normal(kx, (N, C, 7, 7), jnp.float32)   # PyTorch-style NCHW
    params = init_params(kp, C, num_classes)

    out = jax.block_until_ready(aux_head_forward(x, params))
    ref = reference_forward(x, params)
    assert out.shape == (N, num_classes)
    assert jnp.allclose(out, ref, atol=2e-2, rtol=2e-2), (
        f"mismatch: max abs err {jnp.max(jnp.abs(out - ref))}")

    # Larger batch: exercises batch tiling (grid_n >= 2) and padded-row slicing.
    # Tolerance slightly looser only because the max runs over 20x more logits.
    N2 = 40
    x2 = jax.random.normal(jax.random.PRNGKey(1), (N2, C, 7, 7), jnp.float32)
    out2 = jax.block_until_ready(aux_head_forward(x2, params))
    ref2 = reference_forward(x2, params)
    assert out2.shape == (N2, num_classes)
    assert jnp.allclose(out2, ref2, atol=3e-2, rtol=3e-2), (
        f"mismatch (batched): max abs err {jnp.max(jnp.abs(out2 - ref2))}")

    print("KERNEL_OK")
</pallas_src>

<mosaic_0001>
module attributes {stable_mosaic.version = 11 : i64} {
  func.func @_aux_head_kernel(%arg0: i32, %arg1: memref<49x8x4xbf16, #tpu.memory_space<vmem>>, %arg2: memref<4x128xbf16, #tpu.memory_space<vmem>>, %arg3: memref<1x128xf32, #tpu.memory_space<vmem>>, %arg4: memref<512x768xbf16, #tpu.memory_space<vmem>>, %arg5: memref<768x128xbf16, #tpu.memory_space<vmem>>, %arg6: memref<1x128xf32, #tpu.memory_space<vmem>>, %arg7: memref<8x128xf32, #tpu.memory_space<vmem>>, %arg8: memref<8x512xf32, #tpu.memory_space<vmem>>) attributes {dimension_semantics = [#tpu.dimension_semantics<parallel>], iteration_bounds = array<i64: 1>, scalar_prefetch = 0 : i64, scratch_operands = 1 : i64, tpu.core_type = #tpu.core_type<tc>, window_params = [{transform_indices = @transform_0, window_bounds = array<i64: 49, 8, 4>}, {pipeline_mode = #tpu.pipeline_mode<synchronous>, transform_indices = @transform_1, window_bounds = array<i64: 4, 128>}, {pipeline_mode = #tpu.pipeline_mode<synchronous>, transform_indices = @transform_2, window_bounds = array<i64: 1, 128>}, {pipeline_mode = #tpu.pipeline_mode<synchronous>, transform_indices = @transform_3, window_bounds = array<i64: 512, 768>}, {pipeline_mode = #tpu.pipeline_mode<synchronous>, transform_indices = @transform_4, window_bounds = array<i64: 768, 128>}, {pipeline_mode = #tpu.pipeline_mode<synchronous>, transform_indices = @transform_5, window_bounds = array<i64: 1, 128>}, {transform_indices = @transform_6, window_bounds = array<i64: 8, 128>}]} {
    %c0 = arith.constant 0 : index
    %c0_0 = arith.constant 0 : index
    %c0_1 = arith.constant 0 : index
    %0 = vector.load %arg1[%c0, %c0_0, %c0_1] : memref<49x8x4xbf16, #tpu.memory_space<vmem>>, vector<49x8x4xbf16>
    %1 = arith.extf %0 : vector<49x8x4xbf16> to vector<49x8x4xf32>
    %cst = arith.constant 0.000000e+00 : f32
    %2 = vector.broadcast %cst : f32 to vector<49x8x4xf32>
    %3 = arith.maximumf %1, %2 : vector<49x8x4xf32>
    %4 = vector.shape_cast %3 : vector<49x8x4xf32> to vector<392x4xf32>
    %c0_2 = arith.constant 0 : index
    %c0_3 = arith.constant 0 : index
    %5 = vector.load %arg2[%c0_2, %c0_3] : memref<4x128xbf16, #tpu.memory_space<vmem>>, vector<4x128xbf16>
    %6 = arith.extf %5 : vector<4x128xbf16> to vector<4x128xf32>
    %7 = vector.extract_strided_slice %4 {offsets = [0, 0], sizes = [392, 1], strides = [1, 1]} : vector<392x4xf32> to vector<392x1xf32>
    %8 = vector.extract_strided_slice %6 {offsets = [0, 0], sizes = [1, 128], strides = [1, 1]} : vector<4x128xf32> to vector<1x128xf32>
    %9 = vector.broadcast %7 : vector<392x1xf32> to vector<392x128xf32>
    %10 = vector.broadcast %8 : vector<1x128xf32> to vector<392x128xf32>
    %11 = arith.mulf %9, %10 : vector<392x128xf32>
    %12 = vector.extract_strided_slice %4 {offsets = [0, 1], sizes = [392, 1], strides = [1, 1]} : vector<392x4xf32> to vector<392x1xf32>
    %13 = vector.extract_strided_slice %6 {offsets = [1, 0], sizes = [1, 128], strides = [1, 1]} : vector<4x128xf32> to vector<1x128xf32>
    %14 = vector.broadcast %12 : vector<392x1xf32> to vector<392x128xf32>
    %15 = vector.broadcast %13 : vector<1x128xf32> to vector<392x128xf32>
    %16 = arith.mulf %14, %15 : vector<392x128xf32>
    %17 = arith.addf %11, %16 : vector<392x128xf32>
    %18 = vector.extract_strided_slice %4 {offsets = [0, 2], sizes = [392, 1], strides = [1, 1]} : vector<392x4xf32> to vector<392x1xf32>
    %19 = vector.extract_strided_slice %6 {offsets = [2, 0], sizes = [1, 128], strides = [1, 1]} : vector<4x128xf32> to vector<1x128xf32>
    %20 = vector.broadcast %18 : vector<392x1xf32> to vector<392x128xf32>
    %21 = vector.broadcast %19 : vector<1x128xf32> to vector<392x128xf32>
    %22 = arith.mulf %20, %21 : vector<392x128xf32>
    %23 = arith.addf %17, %22 : vector<392x128xf32>
    %24 = vector.extract_strided_slice %4 {offsets = [0, 3], sizes = [392, 1], strides = [1, 1]} : vector<392x4xf32> to vector<392x1xf32>
    %25 = vector.extract_strided_slice %6 {offsets = [3, 0], sizes = [1, 128], strides = [1, 1]} : vector<4x128xf32> to vector<1x128xf32>
    %26 = vector.broadcast %24 : vector<392x1xf32> to vector<392x128xf32>
    %27 = vector.broadcast %25 : vector<1x128xf32> to vector<392x128xf32>
    %28 = arith.mulf %26, %27 : vector<392x128xf32>
    %29 = arith.addf %23, %28 : vector<392x128xf32>
    %30 = vector.extract_strided_slice %29 {offsets = [0, 0], sizes = [8, 128], strides = [1, 1]} : vector<392x128xf32> to vector<8x128xf32>
    %31 = vector.extract_strided_slice %29 {offsets = [8, 0], sizes = [8, 128], strides = [1, 1]} : vector<392x128xf32> to vector<8x128xf32>
    %32 = arith.addf %30, %31 : vector<8x128xf32>
    %33 = vector.extract_strided_slice %29 {offsets = [16, 0], sizes = [8, 128], strides = [1, 1]} : vector<392x128xf32> to vector<8x128xf32>
    %34 = arith.addf %32, %33 : vector<8x128xf32>
    %35 = vector.extract_strided_slice %29 {offsets = [24, 0], sizes = [8, 128], strides = [1, 1]} : vector<392x128xf32> to vector<8x128xf32>
    %36 = arith.addf %34, %35 : vector<8x128xf32>
    %37 = vector.extract_strided_slice %29 {offsets = [32, 0], sizes = [8, 128], strides = [1, 1]} : vector<392x128xf32> to vector<8x128xf32>
    %38 = arith.addf %36, %37 : vector<8x128xf32>
    %39 = vector.extract_strided_slice %29 {offsets = [56, 0], sizes = [8, 128], strides = [1, 1]} : vector<392x128xf32> to vector<8x128xf32>
    %40 = arith.addf %38, %39 : vector<8x128xf32>
    %41 = vector.extract_strided_slice %29 {offsets = [64, 0], sizes = [8, 128], strides = [1, 1]} : vector<392x128xf32> to vector<8x128xf32>
    %42 = arith.addf %40, %41 : vector<8x128xf32>
    %43 = vector.extract_strided_slice %29 {offsets = [72, 0], sizes = [8, 128], strides = [1, 1]} : vector<392x128xf32> to vector<8x128xf32>
    %44 = arith.addf %42, %43 : vector<8x128xf32>
    %45 = vector.extract_strided_slice %29 {offsets = [80, 0], sizes = [8, 128], strides = [1, 1]} : vector<392x128xf32> to vector<8x128xf32>
    %46 = arith.addf %44, %45 : vector<8x128xf32>
    %47 = vector.extract_strided_slice %29 {offsets = [88, 0], sizes = [8, 128], strides = [1, 1]} : vector<392x128xf32> to vector<8x128xf32>
    %48 = arith.addf %46, %47 : vector<8x128xf32>
    %49 = vector.extract_strided_slice %29 {offsets = [112, 0], sizes = [8, 128], strides = [1, 1]} : vector<392x128xf32> to vector<8x128xf32>
    %50 = arith.addf %48, %49 : vector<8x128xf32>
    %51 = vector.extract_strided_slice %29 {offsets = [120, 0], sizes = [8, 128], strides = [1, 1]} : vector<392x128xf32> to vector<8x128xf32>
    %52 = arith.addf %50, %51 : vector<8x128xf32>
    %53 = vector.extract_strided_slice %29 {offsets = [128, 0], sizes = [8, 128], strides = [1, 1]} : vector<392x128xf32> to vector<8x128xf32>
    %54 = arith.addf %52, %53 : vector<8x128xf32>
    %55 = vector.extract_strided_slice %29 {offsets = [136, 0], sizes = [8, 128], strides = [1, 1]} : vector<392x128xf32> to vector<8x128xf32>
    %56 = arith.addf %54, %55 : vector<8x128xf32>
    %57 = vector.extract_strided_slice %29 {offsets = [144, 0], sizes = [8, 128], strides = [1, 1]} : vector<392x128xf32> to vector<8x128xf32>
    %58 = arith.addf %56, %57 : vector<8x128xf32>
    %59 = vector.extract_strided_slice %29 {offsets = [168, 0], sizes = [8, 128], strides = [1, 1]} : vector<392x128xf32> to vector<8x128xf32>
    %60 = arith.addf %58, %59 : vector<8x128xf32>
    %61 = vector.extract_strided_slice %29 {offsets = [176, 0], sizes = [8, 128], strides = [1, 1]} : vector<392x128xf32> to vector<8x128xf32>
    %62 = arith.addf %60, %61 : vector<8x128xf32>
    %63 = vector.extract_strided_slice %29 {offsets = [184, 0], sizes = [8, 128], strides = [1, 1]} : vector<392x128xf32> to vector<8x128xf32>
    %64 = arith.addf %62, %63 : vector<8x128xf32>
    %65 = vector.extract_strided_slice %29 {offsets = [192, 0], sizes = [8, 128], strides = [1, 1]} : vector<392x128xf32> to vector<8x128xf32>
    %66 = arith.addf %64, %65 : vector<8x128xf32>
    %67 = vector.extract_strided_slice %29 {offsets = [200, 0], sizes = [8, 128], strides = [1, 1]} : vector<392x128xf32> to vector<8x128xf32>
    %68 = arith.addf %66, %67 : vector<8x128xf32>
    %69 = vector.extract_strided_slice %29 {offsets = [224, 0], sizes = [8, 128], strides = [1, 1]} : vector<392x128xf32> to vector<8x128xf32>
    %70 = arith.addf %68, %69 : vector<8x128xf32>
    %71 = vector.extract_strided_slice %29 {offsets = [232, 0], sizes = [8, 128], strides = [1, 1]} : vector<392x128xf32> to vector<8x128xf32>
    %72 = arith.addf %70, %71 : vector<8x128xf32>
    %73 = vector.extract_strided_slice %29 {offsets = [240, 0], sizes = [8, 128], strides = [1, 1]} : vector<392x128xf32> to vector<8x128xf32>
    %74 = arith.addf %72, %73 : vector<8x128xf32>
    %75 = vector.extract_strided_slice %29 {offsets = [248, 0], sizes = [8, 128], strides = [1, 1]} : vector<392x128xf32> to vector<8x128xf32>
    %76 = arith.addf %74, %75 : vector<8x128xf32>
    %77 = vector.extract_strided_slice %29 {offsets = [256, 0], sizes = [8, 128], strides = [1, 1]} : vector<392x128xf32> to vector<8x128xf32>
    %78 = arith.addf %76, %77 : vector<8x128xf32>
    %c0_4 = arith.constant 0 : index
    %c0_5 = arith.constant 0 : index
    %79 = vector.load %arg3[%c0_4, %c0_5] : memref<1x128xf32, #tpu.memory_space<vmem>>, vector<1x128xf32>
    %80 = vector.broadcast %79 : vector<1x128xf32> to vector<8x128xf32>
    %81 = arith.addf %78, %80 : vector<8x128xf32>
    %cst_6 = arith.constant 0.000000e+00 : f32
    %82 = vector.broadcast %cst_6 : f32 to vector<8x128xf32>
    %83 = arith.maximumf %81, %82 : vector<8x128xf32>
    %c0_7 = arith.constant 0 : index
    %c0_8 = arith.constant 0 : index
    %84 = vector.load %arg8[%c0_7, %c0_8] : memref<8x512xf32, #tpu.memory_space<vmem>>, vector<8x128xf32>
    tpu.vector_store %arg8[%c0_7, %c0_8], %83 {strides = array<i32>} : memref<8x512xf32, #tpu.memory_space<vmem>>, vector<8x128xf32>,
    %85 = vector.extract_strided_slice %29 {offsets = [16, 0], sizes = [8, 128], strides = [1, 1]} : vector<392x128xf32> to vector<8x128xf32>
    %86 = vector.extract_strided_slice %29 {offsets = [24, 0], sizes = [8, 128], strides = [1, 1]} : vector<392x128xf32> to vector<8x128xf32>
    %87 = arith.addf %85, %86 : vector<8x128xf32>
    %88 = vector.extract_strided_slice %29 {offsets = [32, 0], sizes = [8, 128], strides = [1, 1]} : vector<392x128xf32> to vector<8x128xf32>
    %89 = arith.addf %87, %88 : vector<8x128xf32>
    %90 = vector.extract_strided_slice %29 {offsets = [40, 0], sizes = [8, 128], strides = [1, 1]} : vector<392x128xf32> to vector<8x128xf32>
    %91 = arith.addf %89, %90 : vector<8x128xf32>
    %92 = vector.extract_strided_slice %29 {offsets = [48, 0], sizes = [8, 128], strides = [1, 1]} : vector<392x128xf32> to vector<8x128xf32>
    %93 = arith.addf %91, %92 : vector<8x128xf32>
    %94 = vector.extract_strided_slice %29 {offsets = [72, 0], sizes = [8, 128], strides = [1, 1]} : vector<392x128xf32> to vector<8x128xf32>
    %95 = arith.addf %93, %94 : vector<8x128xf32>
    %96 = vector.extract_strided_slice %29 {offsets = [80, 0], sizes = [8, 128], strides = [1, 1]} : vector<392x128xf32> to vector<8x128xf32>
    %97 = arith.addf %95, %96 : vector<8x128xf32>
    %98 = vector.extract_strided_slice %29 {offsets = [88, 0], sizes = [8, 128], strides = [1, 1]} : vector<392x128xf32> to vector<8x128xf32>
    %99 = arith.addf %97, %98 : vector<8x128xf32>
    %100 = vector.extract_strided_slice %29 {offsets = [96, 0], sizes = [8, 128], strides = [1, 1]} : vector<392x128xf32> to vector<8x128xf32>
    %101 = arith.addf %99, %100 : vector<8x128xf32>
    %102 = vector.extract_strided_slice %29 {offsets = [104, 0], sizes = [8, 128], strides = [1, 1]} : vector<392x128xf32> to vector<8x128xf32>
    %103 = arith.addf %101, %102 : vector<8x128xf32>
    %104 = vector.extract_strided_slice %29 {offsets = [128, 0], sizes = [8, 128], strides = [1, 1]} : vector<392x128xf32> to vector<8x128xf32>
    %105 = arith.addf %103, %104 : vector<8x128xf32>
    %106 = vector.extract_strided_slice %29 {offsets = [136, 0], sizes = [8, 128], strides = [1, 1]} : vector<392x128xf32> to vector<8x128xf32>
    %107 = arith.addf %105, %106 : vector<8x128xf32>
    %108 = vector.extract_strided_slice %29 {offsets = [144, 0], sizes = [8, 128], strides = [1, 1]} : vector<392x128xf32> to vector<8x128xf32>
    %109 = arith.addf %107, %108 : vector<8x128xf32>
    %110 = vector.extract_strided_slice %29 {offsets = [152, 0], sizes = [8, 128], strides = [1, 1]} : vector<392x128xf32> to vector<8x128xf32>
    %111 = arith.addf %109, %110 : vector<8x128xf32>
    %112 = vector.extract_strided_slice %29 {offsets = [160, 0], sizes = [8, 128], strides = [1, 1]} : vector<392x128xf32> to vector<8x128xf32>
    %113 = arith.addf %111, %112 : vector<8x128xf32>
    %114 = vector.extract_strided_slice %29 {offsets = [184, 0], sizes = [8, 128], strides = [1, 1]} : vector<392x128xf32> to vector<8x128xf32>
    %115 = arith.addf %113, %114 : vector<8x128xf32>
    %116 = vector.extract_strided_slice %29 {offsets = [192, 0], sizes = [8, 128], strides = [1, 1]} : vector<392x128xf32> to vector<8x128xf32>
    %117 = arith.addf %115, %116 : vector<8x128xf32>
    %118 = vector.extract_strided_slice %29 {offsets = [200, 0], sizes = [8, 128], strides = [1, 1]} : vector<392x128xf32> to vector<8x128xf32>
    %119 = arith.addf %117, %118 : vector<8x128xf32>
    %120 = vector.extract_strided_slice %29 {offsets = [208, 0], sizes = [8, 128], strides = [1, 1]} : vector<392x128xf32> to vector<8x128xf32>
    %121 = arith.addf %119, %120 : vector<8x128xf32>
    %122 = vector.extract_strided_slice %29 {offsets = [216, 0], sizes = [8, 128], strides = [1, 1]} : vector<392x128xf32> to vector<8x128xf32>
    %123 = arith.addf %121, %122 : vector<8x128xf32>
    %124 = vector.extract_strided_slice %29 {offsets = [240, 0], sizes = [8, 128], strides = [1, 1]} : vector<392x128xf32> to vector<8x128xf32>
    %125 = arith.addf %123, %124 : vector<8x128xf32>
    %126 = vector.extract_strided_slice %29 {offsets = [248, 0], sizes = [8, 128], strides = [1, 1]} : vector<392x128xf32> to vector<8x128xf32>
    %127 = arith.addf %125, %126 : vector<8x128xf32>
    %128 = vector.extract_strided_slice %29 {offsets = [256, 0], sizes = [8, 128], strides = [1, 1]} : vector<392x128xf32> to vector<8x128xf32>
    %129 = arith.addf %127, %128 : vector<8x128xf32>
    %130 = vector.extract_strided_slice %29 {offsets = [264, 0], sizes = [8, 128], strides = [1, 1]} : vector<392x128xf32> to vector<8x128xf32>
    %131 = arith.addf %129, %130 : vector<8x128xf32>
    %132 = vector.extract_strided_slice %29 {offsets = [272, 0], sizes = [8, 128], strides = [1, 1]} : vector<392x128xf32> to vector<8x128xf32>
    %133 = arith.addf %131, %132 : vector<8x128xf32>
    %c0_9 = arith.constant 0 : index
    %c0_10 = arith.constant 0 : index
    %134 = vector.load %arg3[%c0_9, %c0_10] : memref<1x128xf32, #tpu.memory_space<vmem>>, vector<1x128xf32>
    %135 = vector.broadcast %134 : vector<1x128xf32> to vector<8x128xf32>
    %136 = arith.addf %133, %135 : vector<8x128xf32>
    %cst_11 = arith.constant 0.000000e+00 : f32
    %137 = vector.broadcast %cst_11 : f32 to vector<8x128xf32>
    %138 = arith.maximumf %136, %137 : vector<8x128xf32>
    %c0_12 = arith.constant 0 : index
    %c128 = arith.constant 128 : index
    %139 = vector.load %arg8[%c0_12, %c128] : memref<8x512xf32, #tpu.memory_space<vmem>>, vector<8x128xf32>
    tpu.vector_store %arg8[%c0_12, %c128], %138 {strides = array<i32>} : memref<8x512xf32, #tpu.memory_space<vmem>>, vector<8x128xf32>,
    %140 = vector.extract_strided_slice %29 {offsets = [112, 0], sizes = [8, 128], strides = [1, 1]} : vector<392x128xf32> to vector<8x128xf32>
    %141 = vector.extract_strided_slice %29 {offsets = [120, 0], sizes = [8, 128], strides = [1, 1]} : vector<392x128xf32> to vector<8x128xf32>
    %142 = arith.addf %140, %141 : vector<8x128xf32>
    %143 = vector.extract_strided_slice %29 {offsets = [128, 0], sizes = [8, 128], strides = [1, 1]} : vector<392x128xf32> to vector<8x128xf32>
    %144 = arith.addf %142, %143 : vector<8x128xf32>
    %145 = vector.extract_strided_slice %29 {offsets = [136, 0], sizes = [8, 128], strides = [1, 1]} : vector<392x128xf32> to vector<8x128xf32>
    %146 = arith.addf %144, %145 : vector<8x128xf32>
    %147 = vector.extract_strided_slice %29 {offsets = [144, 0], sizes = [8, 128], strides = [1, 1]} : vector<392x128xf32> to vector<8x128xf32>
    %148 = arith.addf %146, %147 : vector<8x128xf32>
    %149 = vector.extract_strided_slice %29 {offsets = [168, 0], sizes = [8, 128], strides = [1, 1]} : vector<392x128xf32> to vector<8x128xf32>
    %150 = arith.addf %148, %149 : vector<8x128xf32>
    %151 = vector.extract_strided_slice %29 {offsets = [176, 0], sizes = [8, 128], strides = [1, 1]} : vector<392x128xf32> to vector<8x128xf32>
    %152 = arith.addf %150, %151 : vector<8x128xf32>
    %153 = vector.extract_strided_slice %29 {offsets = [184, 0], sizes = [8, 128], strides = [1, 1]} : vector<392x128xf32> to vector<8x128xf32>
    %154 = arith.addf %152, %153 : vector<8x128xf32>
    %155 = vector.extract_strided_slice %29 {offsets = [192, 0], sizes = [8, 128], strides = [1, 1]} : vector<392x128xf32> to vector<8x128xf32>
    %156 = arith.addf %154, %155 : vector<8x128xf32>
    %157 = vector.extract_strided_slice %29 {offsets = [200, 0], sizes = [8, 128], strides = [1, 1]} : vector<392x128xf32> to vector<8x128xf32>
    %158 = arith.addf %156, %157 : vector<8x128xf32>
    %159 = vector.extract_strided_slice %29 {offsets = [224, 0], sizes = [8, 128], strides = [1, 1]} : vector<392x128xf32> to vector<8x128xf32>
    %160 = arith.addf %158, %159 : vector<8x128xf32>
    %161 = vector.extract_strided_slice %29 {offsets = [232, 0], sizes = [8, 128], strides = [1, 1]} : vector<392x128xf32> to vector<8x128xf32>
    %162 = arith.addf %160, %161 : vector<8x128xf32>
    %163 = vector.extract_strided_slice %29 {offsets = [240, 0], sizes = [8, 128], strides = [1, 1]} : vector<392x128xf32> to vector<8x128xf32>
    %164 = arith.addf %162, %163 : vector<8x128xf32>
    %165 = vector.extract_strided_slice %29 {offsets = [248, 0], sizes = [8, 128], strides = [1, 1]} : vector<392x128xf32> to vector<8x128xf32>
    %166 = arith.addf %164, %165 : vector<8x128xf32>
    %167 = vector.extract_strided_slice %29 {offsets = [256, 0], sizes = [8, 128], strides = [1, 1]} : vector<392x128xf32> to vector<8x128xf32>
    %168 = arith.addf %166, %167 : vector<8x128xf32>
    %169 = vector.extract_strided_slice %29 {offsets = [280, 0], sizes = [8, 128], strides = [1, 1]} : vector<392x128xf32> to vector<8x128xf32>
    %170 = arith.addf %168, %169 : vector<8x128xf32>
    %171 = vector.extract_strided_slice %29 {offsets = [288, 0], sizes = [8, 128], strides = [1, 1]} : vector<392x128xf32> to vector<8x128xf32>
    %172 = arith.addf %170, %171 : vector<8x128xf32>
    %173 = vector.extract_strided_slice %29 {offsets = [296, 0], sizes = [8, 128], strides = [1, 1]} : vector<392x128xf32> to vector<8x128xf32>
    %174 = arith.addf %172, %173 : vector<8x128xf32>
    %175 = vector.extract_strided_slice %29 {offsets = [304, 0], sizes = [8, 128], strides = [1, 1]} : vector<392x128xf32> to vector<8x128xf32>
    %176 = arith.addf %174, %175 : vector<8x128xf32>
    %177 = vector.extract_strided_slice %29 {offsets = [312, 0], sizes = [8, 128], strides = [1, 1]} : vector<392x128xf32> to vector<8x128xf32>
    %178 = arith.addf %176, %177 : vector<8x128xf32>
    %179 = vector.extract_strided_slice %29 {offsets = [336, 0], sizes = [8, 128], strides = [1, 1]} : vector<392x128xf32> to vector<8x128xf32>
    %180 = arith.addf %178, %179 : vector<8x128xf32>
    %181 = vector.extract_strided_slice %29 {offsets = [344, 0], sizes = [8, 128], strides = [1, 1]} : vector<392x128xf32> to vector<8x128xf32>
    %182 = arith.addf %180, %181 : vector<8x128xf32>
    %183 = vector.extract_strided_slice %29 {offsets = [352, 0], sizes = [8, 128], strides = [1, 1]} : vector<392x128xf32> to vector<8x128xf32>
    %184 = arith.addf %182, %183 : vector<8x128xf32>
    %185 = vector.extract_strided_slice %29 {offsets = [360, 0], sizes = [8, 128], strides = [1, 1]} : vector<392x128xf32> to vector<8x128xf32>
    %186 = arith.addf %184, %185 : vector<8x128xf32>
    %187 = vector.extract_strided_slice %29 {offsets = [368, 0], sizes = [8, 128], strides = [1, 1]} : vector<392x128xf32> to vector<8x128xf32>
    %188 = arith.addf %186, %187 : vector<8x128xf32>
    %c0_13 = arith.constant 0 : index
    %c0_14 = arith.constant 0 : index
    %189 = vector.load %arg3[%c0_13, %c0_14] : memref<1x128xf32, #tpu.memory_space<vmem>>, vector<1x128xf32>
    %190 = vector.broadcast %189 : vector<1x128xf32> to vector<8x128xf32>
    %191 = arith.addf %188, %190 : vector<8x128xf32>
    %cst_15 = arith.constant 0.000000e+00 : f32
    %192 = vector.broadcast %cst_15 : f32 to vector<8x128xf32>
    %193 = arith.maximumf %191, %192 : vector<8x128xf32>
    %c0_16 = arith.constant 0 : index
    %c256 = arith.constant 256 : index
    %194 = vector.load %arg8[%c0_16, %c256] : memref<8x512xf32, #tpu.memory_space<vmem>>, vector<8x128xf32>
    tpu.vector_store %arg8[%c0_16, %c256], %193 {strides = array<i32>} : memref<8x512xf32, #tpu.memory_space<vmem>>, vector<8x128xf32>,
    %195 = vector.extract_strided_slice %29 {offsets = [128, 0], sizes = [8, 128], strides = [1, 1]} : vector<392x128xf32> to vector<8x128xf32>
    %196 = vector.extract_strided_slice %29 {offsets = [136, 0], sizes = [8, 128], strides = [1, 1]} : vector<392x128xf32> to vector<8x128xf32>
    %197 = arith.addf %195, %196 : vector<8x128xf32>
    %198 = vector.extract_strided_slice %29 {offsets = [144, 0], sizes = [8, 128], strides = [1, 1]} : vector<392x128xf32> to vector<8x128xf32>
    %199 = arith.addf %197, %198 : vector<8x128xf32>
    %200 = vector.extract_strided_slice %29 {offsets = [152, 0], sizes = [8, 128], strides = [1, 1]} : vector<392x128xf32> to vector<8x128xf32>
    %201 = arith.addf %199, %200 : vector<8x128xf32>
    %202 = vector.extract_strided_slice %29 {offsets = [160, 0], sizes = [8, 128], strides = [1, 1]} : vector<392x128xf32> to vector<8x128xf32>
    %203 = arith.addf %201, %202 : vector<8x128xf32>
    %204 = vector.extract_strided_slice %29 {offsets = [184, 0], sizes = [8, 128], strides = [1, 1]} : vector<392x128xf32> to vector<8x128xf32>
    %205 = arith.addf %203, %204 : vector<8x128xf32>
    %206 = vector.extract_strided_slice %29 {offsets = [192, 0], sizes = [8, 128], strides = [1, 1]} : vector<392x128xf32> to vector<8x128xf32>
    %207 = arith.addf %205, %206 : vector<8x128xf32>
    %208 = vector.extract_strided_slice %29 {offsets = [200, 0], sizes = [8, 128], strides = [1, 1]} : vector<392x128xf32> to vector<8x128xf32>
    %209 = arith.addf %207, %208 : vector<8x128xf32>
    %210 = vector.extract_strided_slice %29 {offsets = [208, 0], sizes = [8, 128], strides = [1, 1]} : vector<392x128xf32> to vector<8x128xf32>
    %211 = arith.addf %209, %210 : vector<8x128xf32>
    %212 = vector.extract_strided_slice %29 {offsets = [216, 0], sizes = [8, 128], strides = [1, 1]} : vector<392x128xf32> to vector<8x128xf32>
    %213 = arith.addf %211, %212 : vector<8x128xf32>
    %214 = vector.extract_strided_slice %29 {offsets = [240, 0], sizes = [8, 128], strides = [1, 1]} : vector<392x128xf32> to vector<8x128xf32>
    %215 = arith.addf %213, %214 : vector<8x128xf32>
    %216 = vector.extract_strided_slice %29 {offsets = [248, 0], sizes = [8, 128], strides = [1, 1]} : vector<392x128xf32> to vector<8x128xf32>
    %217 = arith.addf %215, %216 : vector<8x128xf32>
    %218 = vector.extract_strided_slice %29 {offsets = [256, 0], sizes = [8, 128], strides = [1, 1]} : vector<392x128xf32> to vector<8x128xf32>
    %219 = arith.addf %217, %218 : vector<8x128xf32>
    %220 = vector.extract_strided_slice %29 {offsets = [264, 0], sizes = [8, 128], strides = [1, 1]} : vector<392x128xf32> to vector<8x128xf32>
    %221 = arith.addf %219, %220 : vector<8x128xf32>
    %222 = vector.extract_strided_slice %29 {offsets = [272, 0], sizes = [8, 128], strides = [1, 1]} : vector<392x128xf32> to vector<8x128xf32>
    %223 = arith.addf %221, %222 : vector<8x128xf32>
    %224 = vector.extract_strided_slice %29 {offsets = [296, 0], sizes = [8, 128], strides = [1, 1]} : vector<392x128xf32> to vector<8x128xf32>
    %225 = arith.addf %223, %224 : vector<8x128xf32>
    %226 = vector.extract_strided_slice %29 {offsets = [304, 0], sizes = [8, 128], strides = [1, 1]} : vector<392x128xf32> to vector<8x128xf32>
    %227 = arith.addf %225, %226 : vector<8x128xf32>
    %228 = vector.extract_strided_slice %29 {offsets = [312, 0], sizes = [8, 128], strides = [1, 1]} : vector<392x128xf32> to vector<8x128xf32>
    %229 = arith.addf %227, %228 : vector<8x128xf32>
    %230 = vector.extract_strided_slice %29 {offsets = [320, 0], sizes = [8, 128], strides = [1, 1]} : vector<392x128xf32> to vector<8x128xf32>
    %231 = arith.addf %229, %230 : vector<8x128xf32>
    %232 = vector.extract_strided_slice %29 {offsets = [328, 0], sizes = [8, 128], strides = [1, 1]} : vector<392x128xf32> to vector<8x128xf32>
    %233 = arith.addf %231, %232 : vector<8x128xf32>
    %234 = vector.extract_strided_slice %29 {offsets = [352, 0], sizes = [8, 128], strides = [1, 1]} : vector<392x128xf32> to vector<8x128xf32>
    %235 = arith.addf %233, %234 : vector<8x128xf32>
    %236 = vector.extract_strided_slice %29 {offsets = [360, 0], sizes = [8, 128], strides = [1, 1]} : vector<392x128xf32> to vector<8x128xf32>
    %237 = arith.addf %235, %236 : vector<8x128xf32>
    %238 = vector.extract_strided_slice %29 {offsets = [368, 0], sizes = [8, 128], strides = [1, 1]} : vector<392x128xf32> to vector<8x128xf32>
    %239 = arith.addf %237, %238 : vector<8x128xf32>
    %240 = vector.extract_strided_slice %29 {offsets = [376, 0], sizes = [8, 128], strides = [1, 1]} : vector<392x128xf32> to vector<8x128xf32>
    %241 = arith.addf %239, %240 : vector<8x128xf32>
    %242 = vector.extract_strided_slice %29 {offsets = [384, 0], sizes = [8, 128], strides = [1, 1]} : vector<392x128xf32> to vector<8x128xf32>
    %243 = arith.addf %241, %242 : vector<8x128xf32>
    %c0_17 = arith.constant 0 : index
    %c0_18 = arith.constant 0 : index
    %244 = vector.load %arg3[%c0_17, %c0_18] : memref<1x128xf32, #tpu.memory_space<vmem>>, vector<1x128xf32>
    %245 = vector.broadcast %244 : vector<1x128xf32> to vector<8x128xf32>
    %246 = arith.addf %243, %245 : vector<8x128xf32>
    %cst_19 = arith.constant 0.000000e+00 : f32
    %247 = vector.broadcast %cst_19 : f32 to vector<8x128xf32>
    %248 = arith.maximumf %246, %247 : vector<8x128xf32>
    %c0_20 = arith.constant 0 : index
    %c384 = arith.constant 384 : index
    %249 = vector.load %arg8[%c0_20, %c384] : memref<8x512xf32, #tpu.memory_space<vmem>>, vector<8x128xf32>
    tpu.vector_store %arg8[%c0_20, %c384], %248 {strides = array<i32>} : memref<8x512xf32, #tpu.memory_space<vmem>>, vector<8x128xf32>,
    %c0_21 = arith.constant 0 : index
    %c0_22 = arith.constant 0 : index
    %250 = vector.load %arg8[%c0_21, %c0_22] : memref<8x512xf32, #tpu.memory_space<vmem>>, vector<8x512xf32>
    %251 = arith.truncf %250 : vector<8x512xf32> to vector<8x512xbf16>
    %c0_23 = arith.constant 0 : index
    %c0_24 = arith.constant 0 : index
    %252 = vector.load %arg4[%c0_23, %c0_24] : memref<512x768xbf16, #tpu.memory_space<vmem>>, vector<512x768xbf16>
    %cst_25 = arith.constant dense<0.000000e+00> : vector<8x768xf32>
    %253 = tpu.matmul %251, %252, %cst_25 {dimension_numbers = #tpu.dot_dimension_numbers<[1], [0], [0], [1], [0, 0, 1, 1], [], []>} : vector<8x512xbf16>, vector<512x768xbf16>, vector<8x768xf32> -> vector<8x768xf32>
    %cst_26 = arith.constant 0.000000e+00 : f32
    %254 = vector.broadcast %cst_26 : f32 to vector<8x768xf32>
    %255 = arith.maximumf %253, %254 : vector<8x768xf32>
    %256 = arith.truncf %255 : vector<8x768xf32> to vector<8x768xbf16>
    %c0_27 = arith.constant 0 : index
    %c0_28 = arith.constant 0 : index
    %257 = vector.load %arg5[%c0_27, %c0_28] : memref<768x128xbf16, #tpu.memory_space<vmem>>, vector<768x128xbf16>
    %cst_29 = arith.constant dense<0.000000e+00> : vector<8x128xf32>
    %258 = tpu.matmul %256, %257, %cst_29 {dimension_numbers = #tpu.dot_dimension_numbers<[1], [0], [0], [1], [0, 0, 1, 1], [], []>} : vector<8x768xbf16>, vector<768x128xbf16>, vector<8x128xf32> -> vector<8x128xf32>
    %c0_30 = arith.constant 0 : index
    %c0_31 = arith.constant 0 : index
    %259 = vector.load %arg6[%c0_30, %c0_31] : memref<1x128xf32, #tpu.memory_space<vmem>>, vector<1x128xf32>
    %260 = vector.broadcast %259 : vector<1x128xf32> to vector<8x128xf32>
    %261 = arith.addf %258, %260 : vector<8x128xf32>
    %c0_32 = arith.constant 0 : index
    %c0_33 = arith.constant 0 : index
    %262 = vector.load %arg7[%c0_32, %c0_33] : memref<8x128xf32, #tpu.memory_space<vmem>>, vector<8x128xf32>
    tpu.vector_store %arg7[%c0_32, %c0_33], %261 {strides = array<i32>} : memref<8x128xf32, #tpu.memory_space<vmem>>, vector<8x128xf32>,
    return
  }
  func.func @transform_0(%arg0: i32) -> (i32, i32, i32) {
    %c0_i32 = arith.constant 0 : i32
    %c0_i32_0 = arith.constant 0 : i32
    %c0_i32_1 = arith.constant 0 : i32
    return %c0_i32, %arg0, %c0_i32_0 : i32, i32, i32
  }
  func.func @transform_1(%arg0: i32) -> (i32, i32) {
    %c0_i32 = arith.constant 0 : i32
    %c0_i32_0 = arith.constant 0 : i32
    %c0_i32_1 = arith.constant 0 : i32
    return %c0_i32, %c0_i32_0 : i32, i32
  }
  func.func @transform_2(%arg0: i32) -> (i32, i32) {
    %c0_i32 = arith.constant 0 : i32
    %c0_i32_0 = arith.constant 0 : i32
    %c0_i32_1 = arith.constant 0 : i32
    return %c0_i32, %c0_i32_0 : i32, i32
  }
  func.func @transform_3(%arg0: i32) -> (i32, i32) {
    %c0_i32 = arith.constant 0 : i32
    %c0_i32_0 = arith.constant 0 : i32
    %c0_i32_1 = arith.constant 0 : i32
    return %c0_i32, %c0_i32_0 : i32, i32
  }
  func.func @transform_4(%arg0: i32) -> (i32, i32) {
    %c0_i32 = arith.constant 0 : i32
    %c0_i32_0 = arith.constant 0 : i32
    %c0_i32_1 = arith.constant 0 : i32
    return %c0_i32, %c0_i32_0 : i32, i32
  }
  func.func @transform_5(%arg0: i32) -> (i32, i32) {
    %c0_i32 = arith.constant 0 : i32
    %c0_i32_0 = arith.constant 0 : i32
    %c0_i32_1 = arith.constant 0 : i32
    return %c0_i32, %c0_i32_0 : i32, i32
  }
  func.func @transform_6(%arg0: i32) -> (i32, i32) {
    %c0_i32 = arith.constant 0 : i32
    %c0_i32_0 = arith.constant 0 : i32
    return %arg0, %c0_i32 : i32, i32
  }
}

</mosaic_0001>

<bundles_post_ra>
// kernel: tpu_custom_call.1
= control target key start
LH: loop header
LB: loop body
LE: loop exit
PB: predicated region body
PF: predicated region fallthrough
CT: control target
= control target key end

     0   :  { %11 = vsyncpa [#allocation4], 0  ;;  %s5821_s0 = inlined_call_operand.vmem [shape: bf16[49,8,4], index: 0, kind: input, shape index: {}]   ;;  %s5822_s1 = inlined_call_operand.vmem [shape: bf16[4,128], index: 1, kind: input, shape index: {}]   ;;  %s5823_s2 = inlined_call_operand.vmem [shape: f32[1,128], index: 2, kind: input, shape index: {}]   ;;  %s5824_s3 = inlined_call_operand.hbm [shape: bf16[512,768], index: 3, kind: input, shape index: {}]   ;;  %s5825_s4 = inlined_call_operand.hbm [shape: bf16[768,128], index: 4, kind: input, shape index: {}]   ;;  %s5826_s5 = inlined_call_operand.vmem [shape: f32[1,128], index: 5, kind: input, shape index: {}]   ;;  %s5827_s6 = inlined_call_operand.hbm [shape: f32[8,128], index: 6, kind: output, shape index: {}]  }
   0x1   :  { %12 = vsyncpa [#allocation7], 0 }
   0x2   :  { %13 = vsyncpa [#allocation5], 0  ;;  %s4881_s21 = smov [#allocation3]   ;;  %s4809_s25 = scalar_lea.hbm %s5824_s3, 24576 }
   0x3   :  { %s25_s22 = sshll.u32 %s4881_s21, 4  ;;  %p4810_p0 = scmp.ne.s32.totalorder %s5824_s3, %s4809_s25  ;;  %s26_s22 = int_to_ptr.vmem [resolvable:$true] %s25_s22 }
   0x4   :  { %p4813_p1 = scmp.lt.u32.totalorder %s4809_s25, %s5824_s3 }
   0x6   :  { %p4815_p2 = pnand %p4813_p1, %p4810_p0 }
   0x8   :  { %4818 = shalt.err (!%p4815_p2)
}
   0x9   :  { %s4819_s30 = scalar_lea.vmem %s26_s22, 24576  ;;  %p4824_p4 = scmp.lt.s32.totalorder %s26_s22, %s26_s22 }
   0xa   :  { %p4820_p3 = scmp.ne.s32.totalorder %s26_s22, %s4819_s30  ;;  %p4825_p5 = scmp.lt.s32.totalorder %s4819_s30, %s4819_s30 }
   0xc   :  { %p4826_p6 = por %p4825_p5, %p4824_p4 }
   0xe   :  { %p4827_p7 = pnand %p4826_p6, %p4820_p3 }
  0x10   :  { %4830 = shalt.err (!%p4827_p7)
}
  0x11   :  { %s4882_s7 = smov 384   ;;  %s4883_s8 = smov 24  }
  0x12   :  { %31 = dma.hbm_to_vmem [thread:$0]  %s5824_s3, 24576, %s26_s22, [#allocation4], %s4882_s7, %s4882_s7, %s4883_s8  }
  0x13   :  { %s4884_s11 = smov [#allocation6]   ;;  %s4831_s15 = scalar_lea.hbm %s5825_s4, 6144 }
  0x14   :  { %s37_s12 = sshll.u32 %s4884_s11, 4  ;;  %p4832_p8 = scmp.ne.s32.totalorder %s5825_s4, %s4831_s15  ;;  %s38_s12 = int_to_ptr.vmem [resolvable:$true] %s37_s12 }
  0x15   :  { %p4835_p9 = scmp.lt.u32.totalorder %s4831_s15, %s5825_s4 }
  0x17   :  { %p4837_p10 = pnand %p4835_p9, %p4832_p8 }
  0x19   :  { %4840 = shalt.err (!%p4837_p10)
}
  0x1a   :  { %s4841_s20 = scalar_lea.vmem %s38_s12, 6144  ;;  %p4846_p12 = scmp.lt.s32.totalorder %s38_s12, %s38_s12 }
  0x1b   :  { %p4842_p11 = scmp.ne.s32.totalorder %s38_s12, %s4841_s20  ;;  %p4847_p13 = scmp.lt.s32.totalorder %s4841_s20, %s4841_s20 }
  0x1d   :  { %p4848_p0 = por %p4847_p13, %p4846_p12 }
  0x1f   :  { %p4849_p1 = pnand %p4848_p0, %p4842_p11 }
  0x21   :  { %4852 = shalt.err (!%p4849_p1)
}
  0x22   :  { %s4885_s3 = smov 64   ;;  %s4886_s21 = smov 4  }
  0x23   :  { %43 = dma.hbm_to_vmem [thread:$0]  %s5825_s4, 6144, %s38_s12, [#allocation7], %s4885_s3, %s4885_s3, %s4886_s21  }
  0x24   :  { %4875 = dma.done.wait [#allocation4], 24576  }
  0x25   :  { %4876 = vsyncadd [#allocation4], 4294942720 }
  0x26   :  { %4877 = dma.done.wait [#allocation7], 6144  }
  0x27   :  { %4878 = vsyncadd [#allocation7], 4294961152  ;;  %v5831_v0 = vmov 1   ;;  %v5838_v1 = vmov 0   ;;  %v3818_v2 = vld [vmem:[%s5821_s0 + $0x10] sm:$0xff]   ;;  %v3817_v3 = vld [vmem:[%s5821_s0 + $0x8] sm:$0xff]  }
  0x28   :  { %3940 = vset.pattern.permute.xlu0 %v5831_v0  ;;  %3929 = vset.pattern.permute.xlu1 %v5838_v1  ;;  %v3819_v4 = vld [vmem:[%s5821_s0 + $0x18] sm:$0xff]   ;;  %v3731_v5 = vunpack.c.l.bf16 %v3818_v2  ;;  %v3732_v6 = vunpack.c.h.bf16 %v3818_v2  ;;  %v3727_v7 = vunpack.c.l.bf16 %v3817_v3  ;;  %v3728_v8 = vunpack.c.h.bf16 %v3817_v3  ;;  %v3822_v9 = vld [vmem:[%s5821_s0 + $0x30] sm:$0xff]   ;;  %v3722_v14 = vld [vmem:[%s5821_s0] sm:$0xff]   ;;  %s4891_s27 = smov [#allocation8]  }
  0x29   :  { %v3735_v10 = vunpack.c.l.bf16 %v3819_v4  ;;  %v3736_v11 = vunpack.c.h.bf16 %v3819_v4  ;;  %v3747_v12 = vunpack.c.l.bf16 %v3822_v9  ;;  %v3748_v13 = vunpack.c.h.bf16 %v3822_v9  ;;  %v3826_v29 = vld [vmem:[%s5821_s0 + $0x50] sm:$0xff]   ;;  %v3827_v30 = vld [vmem:[%s5821_s0 + $0x58] sm:$0xff]   ;;  %v3829_v33 = vld [vmem:[%s5821_s0 + $0x68] sm:$0xff]   ;;  %s3466_s28 = sshll.u32 %s4891_s27, 4  ;;  %s3467_s28 = int_to_ptr.vmem [resolvable:$true] %s3466_s28 }
  0x2a   :  { %v155_v15 = vmax.f32 %v3731_v5, 0.0  ;;  %v156_v16 = vmax.f32 %v3732_v6, 0.0  ;;  %v153_v17 = vmax.f32 %v3727_v7, 0.0  ;;  %v154_v18 = vmax.f32 %v3728_v8, 0.0  ;;  %v3823_v34 = vld [vmem:[%s5821_s0 + $0x38] sm:$0xff]   ;;  %v3824_v35 = vld [vmem:[%s5821_s0 + $0x40] sm:$0xff]   ;;  %p4858_p3 = scmp.lt.s32.totalorder %s3467_s28, %s3467_s28 }
  0x2b   :  { %v4968_v19 = vmax.f32 %v3735_v10, 0.0  ;;  %v4970_v20 = vmax.f32 %v3736_v11, 0.0  ;;  %v163_v21 = vmax.f32 %v3747_v12, 0.0  ;;  %v164_v22 = vmax.f32 %v3748_v13, 0.0  ;;  %v5001_v50 = vld [vmem:[%s5821_s0 + $0x60] sm:$0xff]   ;;  %v3821_v61 = vld [vmem:[%s5821_s0 + $0x28] sm:$0xff]  }
  0x2c   :  { %v3930_v23 = vpack.i.bf16 %v156_v16, %v155_v15  ;;  %v4972_v24 = vpack.i.bf16 %v154_v18, %v153_v17  ;;  %v3723_v25 = vunpack.c.l.bf16 %v3722_v14  ;;  %v3724_v26 = vunpack.c.h.bf16 %v3722_v14  ;;  %v3820_v56 = vld [vmem:[%s5821_s0 + $0x20] sm:$0xff]   ;;  %v3830_v15 = vld [vmem:[%s5821_s0 + $0x70] sm:$0xff]   ;;  %v3831_v16 = vld [vmem:[%s5821_s0 + $0x78] sm:$0xff]   ;;  %s4853_s4 = scalar_lea.vmem %s3467_s28, 128 }
  0x2d   :  { %v3935_v27 = vpack.i.bf16 %v4970_v20, %v4968_v19  ;;  %v4977_v28 = vpack.i.bf16 %v164_v22, %v163_v21  ;;  %v3763_v37 = vunpack.c.l.bf16 %v3826_v29  ;;  %v3768_v38 = vunpack.c.h.bf16 %v3827_v30  ;;  %p4854_p2 = scmp.ne.s32.totalorder %s3467_s28, %s4853_s4  ;;  %p4859_p4 = scmp.lt.s32.totalorder %s4853_s4, %s4853_s4 }
  0x2e   :  { %3931 = vperm.xlu1 %3929, %v3930_v23   ;;  %3942 = vperm.xlu0 %3940, %v4972_v24   ;;  %v151_v31 = vmax.f32 %v3723_v25, 0.0  ;;  %v152_v32 = vmax.f32 %v3724_v26, 0.0  ;;  %v5829_v39 = vmov 3   ;;  %v3775_v40 = vunpack.c.l.bf16 %v3829_v33  ;;  %v5043_v25 = vld [vmem:[%s5821_s0 + $0x90] sm:$0xff]  }
  0x2f   :  { %v3776_v41 = vunpack.c.h.bf16 %v3829_v33  ;;  %v171_v42 = vmax.f32 %v3763_v37, 0.0  ;;  %v174_v43 = vmax.f32 %v3768_v38, 0.0  ;;  %v3751_v44 = vunpack.c.l.bf16 %v3823_v34  ;;  %v3832_v37 = vld [vmem:[%s5821_s0 + $0x80] sm:$0xff]   ;;  %p4860_p5 = por %p4859_p4, %p4858_p3 }
  0x30   :  { %v3947_v36 = vpack.i.bf16 %v152_v32, %v151_v31  ;;  %v3755_v45 = vunpack.c.l.bf16 %v3824_v35  ;;  %v3752_v46 = vunpack.c.h.bf16 %v3823_v34  ;;  %v3756_v47 = vunpack.c.h.bf16 %v3824_v35 }
  0x31   :  { %v177_v48 = vmax.f32 %v3775_v40, 0.0  ;;  %v178_v49 = vmax.f32 %v3776_v41, 0.0  ;;  %v5003_v51 = vpack.i.bf16 %v174_v43, %v171_v42  ;;  %v165_v52 = vmax.f32 %v3751_v44, 0.0  ;;  %p4861_p6 = pnand %p4860_p5, %p4854_p2 }
  0x32   :  { %3936 = vperm.xlu1 %3929, %v3935_v27   ;;  %4023 = vperm.xlu0 %3940, %v4977_v28   ;;  %v167_v53 = vmax.f32 %v3755_v45, 0.0  ;;  %v166_v54 = vmax.f32 %v3752_v46, 0.0  ;;  %v168_v55 = vmax.f32 %v3756_v47, 0.0  ;;  %v5828_v59 = vmov 2   ;;  %v3825_v45 = vld [vmem:[%s5821_s0 + $0x48] sm:$0xff]  }
  0x33   :  { %v5014_v60 = vpack.i.bf16 %v178_v49, %v177_v48  ;;  %v3764_v62 = vunpack.c.h.bf16 %v3826_v29  ;;  %v3771_v63 = vunpack.c.l.bf16 %v5001_v50  ;;  %v3740_v2 = vunpack.c.h.bf16 %v3820_v56 }
  0x34   :  { %v5008_v57 = vpack.i.bf16 %v165_v52, %v167_v53  ;;  %v5010_v58 = vpack.i.bf16 %v166_v54, %v168_v55  ;;  %v3739_v5 = vunpack.c.l.bf16 %v3820_v56  ;;  %v3744_v6 = vunpack.c.h.bf16 %v3821_v61  ;;  %v5084_v52 = vld [vmem:[%s5821_s0 + $0x98] sm:$0xff]  }
  0x35   :  { %v172_v3 = vmax.f32 %v3764_v62, 0.0  ;;  %v175_v4 = vmax.f32 %v3771_v63, 0.0  ;;  %v160_v8 = vmax.f32 %v3740_v2, 0.0  ;;  %v3743_v9 = vunpack.c.l.bf16 %v3821_v61 }
  0x36   :  { %3946 = vset.pattern.permute.xlu1 %v5831_v0  ;;  %4027 = vset.pattern.permute.xlu0 %v5829_v39  ;;  %v159_v10 = vmax.f32 %v3739_v5, 0.0  ;;  %v162_v11 = vmax.f32 %v3744_v6, 0.0  ;;  %v3779_v18 = vunpack.c.l.bf16 %v3830_v15  ;;  %v3783_v21 = vunpack.c.l.bf16 %v3831_v16  ;;  %v101_v5 = vld [vmem:[%s5821_s0 + $0xc0] sm:$0xf]  ;;  %v3838_v6 = vld [vmem:[%s5821_s0 + $0xb0] sm:$0xff]  }
  0x37   :  { %4029 = vperm.xlu0 %4027, %v4972_v24   ;;  %3948 = vperm.xlu1 %3946, %v3947_v36   ;;  %v5021_v7 = vpack.i.bf16 %v175_v4, %v172_v3  ;;  %v3975_v12 = vpack.i.bf16 %v160_v8, %v4968_v19  ;;  %v161_v13 = vmax.f32 %v3743_v9, 0.0  ;;  %v3796_v30 = vunpack.c.h.bf16 %v5043_v25 }
  0x38   :  { %v4184_v14 = vpack.i.bf16 %v162_v11, %v159_v10  ;;  %v179_v19 = vmax.f32 %v3779_v18, 0.0  ;;  %v181_v22 = vmax.f32 %v3783_v21, 0.0  ;;  %v3780_v31 = vunpack.c.h.bf16 %v3830_v15 }
  0x39   :  { %v3981_v17 = vpack.i.bf16 %v161_v13, %v160_v8  ;;  %v3987_v27 = vpack.i.bf16 %v161_v13, %v4970_v20  ;;  %v3784_v32 = vunpack.c.h.bf16 %v3831_v16  ;;  %v3787_v40 = vunpack.c.l.bf16 %v3832_v37 }
  0x3a   :  { %v5045_v26 = vpack.i.bf16 %v179_v19, %v181_v22  ;;  %v180_v33 = vmax.f32 %v3780_v31, 0.0  ;;  %v3788_v41 = vunpack.c.h.bf16 %v3832_v37  ;;  %v3759_v46 = vunpack.c.l.bf16 %v3825_v45 }
  0x3b   :  { %4034 = vperm.xlu0 %4027, %v3930_v23   ;;  %3953 = vperm.xlu1 %3946, %v3930_v23   ;;  %v182_v34 = vmax.f32 %v3784_v32, 0.0  ;;  %v183_v42 = vmax.f32 %v3787_v40, 0.0  ;;  %v3760_v47 = vunpack.c.h.bf16 %v3825_v45  ;;  %v3799_v54 = vunpack.c.l.bf16 %v5084_v52 }
  0x3c   :  { %v184_v43 = vmax.f32 %v3788_v41, 0.0  ;;  %v3811_v9 = vunpack.c.l.bf16 %v3838_v6 }
  0x3d   :  { %v5055_v20 = vpack.i.bf16 %v180_v33, %v182_v34  ;;  %v170_v48 = vmax.f32 %v3760_v47, 0.0  ;;  %v189_v56 = vmax.f32 %v3799_v54, 0.0  ;;  %v3839_v34 = vld [vmem:[%s5821_s0 + $0xb8] sm:$0xff]  }
  0x3e   :  { %v5066_v44 = vpack.i.bf16 %v184_v43, %v183_v42  ;;  %v195_v11 = vmax.f32 %v3811_v9, 0.0  ;;  %v3815_v37 = vunpack.c.l.bf16 %v3839_v34  ;;  %v3816_v40 = vunpack.c.h.bf16 %v3839_v34  ;;  %v4482_v9 = vld [vmem:[#allocation3 + $0x30] ss:$24 sps:$4 sm:$0xff]  }
  0x3f   :  { %4116 = vperm.xlu0 %4027, %v5003_v51   ;;  %3957 = vset.pattern.permute.xlu1 %v5828_v59 }
  0x40   :  { %3959 = vperm.xlu1 %3957, %v3947_v36   ;;  %v197_v41 = vmax.f32 %v3815_v37, 0.0  ;;  %v198_v42 = vmax.f32 %v3816_v40, 0.0  ;;  %v4490_v40 = vld [vmem:[#allocation3 + $0x94] ss:$24 sps:$4 sm:$0xff]  }
  0x42   :  { %v5174_v45 = vpack.i.bf16 %v198_v42, %v197_v41  ;;  %v4492_v41 = vld [vmem:[#allocation3 + $0x9c] ss:$24 sps:$4 sm:$0xff]  }
  0x43   :  { %4169 = vperm.xlu0 %4027, %v5014_v60  }
  0x44   :  { %3964 = vperm.xlu1 %3957, %v3930_v23   ;;  %v5038_v23 = vld [vmem:[%s5821_s0 + $0x88] sm:$0xff]   ;;  %5849 = vst [vmem:[#allocation15_spill] sm:$0xff] %v5174_v45 }
  0x45   :  { %v3791_v29 = vunpack.c.l.bf16 %v5038_v23  ;;  %v3792_v53 = vunpack.c.h.bf16 %v5038_v23  ;;  %v3812_v23 = vunpack.c.h.bf16 %v3838_v6 }
  0x47   :  { %4173 = vset.pattern.permute.xlu0 %v5838_v1  ;;  %v185_v35 = vmax.f32 %v3791_v29, 0.0  ;;  %v186_v55 = vmax.f32 %v3792_v53, 0.0 }
  0x48   :  { %4175 = vperm.xlu0 %4173, %v3947_v36   ;;  %3968 = vset.pattern.permute.xlu1 %v5829_v39 }
  0x49   :  { %3970 = vperm.xlu1 %3968, %v3947_v36   ;;  %v188_v36 = vmax.f32 %v3796_v30, 0.0  ;;  %v5094_v61 = vpack.i.bf16 %v189_v56, %v186_v55  ;;  %v196_v30 = vmax.f32 %v3812_v23, 0.0  ;;  %v447_v55 = vlaneseq }
  0x4b   :  { %v5061_v38 = vpack.i.bf16 %v188_v36, %v185_v35 }
  0x4c   :  { %4180 = vperm.xlu0 %4173, %v4972_v24  }
  0x4d   :  { %3974 = vset.pattern.permute.xlu1 %v5831_v0 }
  0x4e   :  { %3976 = vperm.xlu1 %3974, %v3975_v12  }
  0x50   :  { %4185 = vperm.xlu0 %4173, %v4184_v14  }
  0x52   :  { %3980 = vset.pattern.permute.xlu1 %v5838_v1 }
  0x53   :  { %3982 = vperm.xlu1 %3980, %v3981_v17  }
  0x54   :  { %4190 = vperm.xlu0 %4173, %v5008_v57  }
  0x57   :  { %3986 = vset.pattern.permute.xlu1 %v5831_v0 }
  0x58   :  { %4195 = vperm.xlu0 %4173, %v5010_v58   ;;  %3988 = vperm.xlu1 %3986, %v3987_v27  }
  0x5c   :  { %4200 = vperm.xlu0 %4173, %v5003_v51   ;;  %3992 = vset.pattern.permute.xlu1 %v5829_v39 }
  0x5d   :  { %3994 = vperm.xlu1 %3992, %v3975_v12  }
  0x60   :  { %4205 = vperm.xlu0 %4173, %v5014_v60  }
  0x61   :  { %3998 = vset.pattern.permute.xlu1 %v5831_v0 }
  0x62   :  { %4000 = vperm.xlu1 %3998, %v4184_v14  }
  0x64   :  { %4245 = vperm.xlu0 %4173, %v5061_v38  }
  0x66   :  { %4004 = vset.pattern.permute.xlu1 %v5828_v59 }
  0x67   :  { %4006 = vperm.xlu1 %4004, %v3987_v27  }
  0x68   :  { %4249 = vset.pattern.permute.xlu0 %v5828_v59 }
  0x69   :  { %4251 = vperm.xlu0 %4249, %v4972_v24   ;;  %v169_v24 = vmax.f32 %v3759_v46, 0.0 }
  0x6b   :  { %4010 = vset.pattern.permute.xlu1 %v5829_v39  ;;  %v4275_v49 = vpack.i.bf16 %v170_v48, %v169_v24 }
  0x6c   :  { %4012 = vperm.xlu1 %4010, %v3987_v27  }
  0x6d   :  { %4256 = vperm.xlu0 %4249, %v3975_v12   ;;  %v4808_v12 = vld [vmem:[%s5821_s0 + $0x58] sm:$0xff]  }
  0x6e   :  { %v3767_v13 = vunpack.c.l.bf16 %v4808_v12 }
  0x70   :  { %4016 = vset.pattern.permute.xlu1 %v5838_v1  ;;  %v173_v18 = vmax.f32 %v3767_v13, 0.0 }
  0x71   :  { %4261 = vperm.xlu0 %4249, %v4184_v14   ;;  %4018 = vperm.xlu1 %4016, %v4977_v28  }
  0x75   :  { %4038 = vset.pattern.permute.xlu1 %v5829_v39  ;;  %4266 = vperm.xlu0 %4249, %v5008_v57  }
  0x76   :  { %4040 = vperm.xlu1 %4038, %v4184_v14   ;;  %v3772_v14 = vunpack.c.h.bf16 %v5001_v50 }
  0x78   :  { %v176_v21 = vmax.f32 %v3772_v14, 0.0  ;;  %v4484_v14 = vld [vmem:[#allocation3 + $0x64] ss:$24 sps:$4 sm:$0xff]  }
  0x79   :  { %4271 = vperm.xlu0 %4249, %v5010_v58  }
  0x7a   :  { %4044 = vset.pattern.permute.xlu1 %v5828_v59  ;;  %v4121_v27 = vpack.i.bf16 %v176_v21, %v173_v18  ;;  %v4486_v18 = vld [vmem:[#allocation3 + $0x6c] ss:$24 sps:$4 sm:$0xff]  }
  0x7b   :  { %4046 = vperm.xlu1 %4044, %v4977_v28  }
  0x7d   :  { %4276 = vperm.xlu0 %4249, %v4275_v49  }
  0x7f   :  { %4050 = vset.pattern.permute.xlu1 %v5831_v0 }
  0x80   :  { %4052 = vperm.xlu1 %4050, %v5008_v57  }
  0x81   :  { %4281 = vperm.xlu0 %4249, %v5003_v51  }
  0x84   :  { %4056 = vset.pattern.permute.xlu1 %v5829_v39 }
  0x85   :  { %4058 = vperm.xlu1 %4056, %v4977_v28   ;;  %4286 = vperm.xlu0 %4249, %v5021_v7   ;;  %v3836_v28 = vld [vmem:[%s5821_s0 + $0xa0] sm:$0xff]  }
  0x86   :  { %v3803_v62 = vunpack.c.l.bf16 %v3836_v28  ;;  %v3804_v63 = vunpack.c.h.bf16 %v3836_v28  ;;  %v4472_v28 = vld [vmem:[#allocation3 + $0x4] ss:$24 sps:$4 sm:$0xff]  }
  0x87   :  { %2690 = vmatprep.subr.bf16.mxu0 %v4472_v28 }
  0x88   :  { %v191_v2 = vmax.f32 %v3803_v62, 0.0  ;;  %v192_v3 = vmax.f32 %v3804_v63, 0.0  ;;  %v4474_v62 = vld [vmem:[#allocation3 + $0xc] ss:$24 sps:$4 sm:$0xff]  }
  0x89   :  { %4062 = vset.pattern.permute.xlu1 %v5831_v0  ;;  %4291 = vperm.xlu0 %4249, %v5014_v60  }
  0x8a   :  { %4064 = vperm.xlu1 %4062, %v5010_v58   ;;  %v5113_v4 = vpack.i.bf16 %v192_v3, %v191_v2  ;;  %v4477_v2 = vld [vmem:[#allocation3 + $0x8] ss:$24 sps:$4 sm:$0xff]   ;;  %2772 = vmatprep.subr.bf16.mxu1 %v4474_v62  ;;  %v448_v3 = vshrl.u32 %v447_v55, 7 }
  0x8b   :  { %2773 = vmatpush1.bf16.msra.mxu1 %v4477_v2  ;;  %v4494_v2 = vld [vmem:[#allocation3 + $0x90] ss:$24 sps:$4 sm:$0xff]  }
  0x8c   :  { %v449_v12 = vsub.s32 0, %v448_v3  ;;  %v698_v13 = vsub.s32 1, %v448_v3  ;;  %v1294_v21 = vsub.s32 3, %v448_v3 }
  0x8d   :  { %4296 = vperm.xlu0 %4249, %v5045_v26  }
  0x8e   :  { %4068 = vset.pattern.permute.xlu1 %v5838_v1 }
  0x8f   :  { %4070 = vperm.xlu1 %4068, %v4275_v49  }
  0x91   :  { %4301 = vperm.xlu0 %4249, %v5055_v20  }
  0x93   :  { %4074 = vset.pattern.permute.xlu1 %v5831_v0 }
  0x94   :  { %4076 = vperm.xlu1 %4074, %v4275_v49  }
  0x95   :  { %4306 = vperm.xlu0 %4249, %v5066_v44  }
  0x98   :  { %4080 = vset.pattern.permute.xlu1 %v5829_v39 }
  0x99   :  { %4082 = vperm.xlu1 %4080, %v5008_v57   ;;  %4323 = vperm.xlu0 %4249, %v5061_v38   ;;  %v150_v57 = vunpack.c.l.bf16 %v101_v5  ;;  %v4478_v5 = vld [vmem:[#allocation3 + $0x34] ss:$24 sps:$4 sm:$0xff]  }
  0x9d   :  { %4087 = vperm.xlu1 %4080, %v5010_v58   ;;  %4338 = vset.pattern.permute.xlu0 %v5831_v0  ;;  %v3837_v58 = vld [vmem:[%s5821_s0 + $0xa8] sm:$0xff]  }
  0x9e   :  { %4340 = vperm.xlu0 %4338, %v5094_v61   ;;  %v3807_v8 = vunpack.c.l.bf16 %v3837_v58  ;;  %v3808_v22 = vunpack.c.h.bf16 %v3837_v58  ;;  %v200_v58 = vld [vmem:[%s5822_s1] sm:$0x3] }
  0xa0   :  { %v193_v10 = vmax.f32 %v3807_v8, 0.0  ;;  %v194_v29 = vmax.f32 %v3808_v22, 0.0  ;;  %v996_v22 = vsub.s32 2, %v448_v3  ;;  %v4495_v3 = vld [vmem:[#allocation3 + $0x98] ss:$24 sps:$4 sm:$0xff]  }
  0xa1   :  { %4091 = vset.pattern.permute.xlu1 %v5831_v0 }
  0xa2   :  { %4093 = vperm.xlu1 %4091, %v5003_v51   ;;  %4391 = vset.pattern.permute.xlu0 %v5829_v39  ;;  %v5131_v51 = vmax.f32 %v150_v57, 0.0  ;;  %v5137_v15 = vpack.i.bf16 %v193_v10, %v195_v11  ;;  %v5155_v31 = vpack.i.bf16 %v194_v29, %v196_v30  ;;  %v4480_v57 = vld [vmem:[#allocation3 + $0x3c] ss:$24 sps:$4 sm:$0xff]   ;;  %v4483_v10 = vld [vmem:[#allocation3 + $0x38] ss:$24 sps:$4 sm:$0xff]   ;;  %v201_v11 = vunpack.c.l.bf16 %v200_v58 }
  0xa3   :  { %4393 = vperm.xlu0 %4391, %v5113_v4   ;;  %2774 = vmatprep.subr.bf16.mxu1 %v4480_v57  ;;  %v4489_v29 = vld [vmem:[#allocation3 + $0x68] ss:$24 sps:$4 sm:$0xff]  }
  0xa4   :  { %5846 = vst [vmem:[#allocation12_spill] sm:$0xff] %v5131_v51  ;;  %5847 = vst [vmem:[#allocation13_spill] sm:$0xff] %v5137_v15  ;;  %2775 = vmatpush1.bf16.msra.mxu1 %v4483_v10  ;;  %v5221_v34 = vrot.slane %v201_v11, %v449_v12  ;;  %v5226_v55 = vrot.slane %v201_v11, %v698_v13  ;;  %v5228_v28 = vrot.slane %v201_v11, %v1294_v21  ;;  %v4498_v21 = vld [vmem:[#allocation3 + $0xcc] ss:$24 sps:$4 sm:$0xff]  }
  0xa5   :  { %5848 = vst [vmem:[#allocation14_spill] sm:$0xff] %v5155_v31  ;;  %2776 = vmatprep.subr.bf16.mxu1 %v4486_v18  ;;  %v5230_v62 = vrot.slane %v201_v11, %v996_v22  ;;  %v4496_v18 = vld [vmem:[#allocation3 + $0xc4] ss:$24 sps:$4 sm:$0xff]  }
  0xa6   :  { %4097 = vset.pattern.permute.xlu1 %v5829_v39 }
  0xa7   :  { %4099 = vperm.xlu1 %4097, %v4275_v49   ;;  %4397 = vset.pattern.permute.xlu0 %v5838_v1 }
  0xa8   :  { %4399 = vperm.xlu0 %4397, %v5113_v4   ;;  %2777 = vmatpush1.bf16.msra.mxu1 %v4489_v29 }
  0xa9   :  { %2778 = vmatprep.subr.bf16.mxu1 %v4492_v41 }
  0xab   :  { %4103 = vset.pattern.permute.xlu1 %v5838_v1 }
  0xac   :  { %4105 = vperm.xlu1 %4103, %v5021_v7   ;;  %444 = vperm.xlu0 %4397, %v5131_v51  }
  0xad   :  { %v5142_v16 = vpop.permute.xlu1 %3931  ;;  %v5144_v17 = vpop.permute.xlu0 %3942  ;;  %2779 = vmatpush1.bf16.msra.mxu1 %v4495_v3 }
  0xae   :  { %v3934_v37 = vunpack.i.h.bf16 %v5142_v16  ;;  %v3933_v42 = vunpack.i.l.bf16 %v5142_v16  ;;  %v3944_v57 = vunpack.i.l.bf16 %v5144_v17  ;;  %2780 = vmatprep.subr.bf16.mxu1 %v4498_v21 }
  0xb0   :  { %4109 = vset.pattern.permute.xlu1 %v5831_v0  ;;  %4438 = vset.pattern.permute.xlu0 %v5828_v59  ;;  %v5243_v12 = vmul.f32 %v3934_v37, %v5221_v34  ;;  %v455_v22 = vmul.f32 %v3933_v42, %v5221_v34  ;;  %v4500_v37 = vld [vmem:[#allocation3 + $0xc0] ss:$24 sps:$4 sm:$0xff]  }
  0xb1   :  { %v5147_v19 = vpop.permute.xlu1 %3936  ;;  %4111 = vperm.xlu1 %4109, %v5021_v7   ;;  %v5150_v50 = vpop.permute.xlu0 %4023  ;;  %4440 = vperm.xlu0 %4438, %v5094_v61  }
  0xb2   :  { %v3938_v58 = vunpack.i.l.bf16 %v5147_v19  ;;  %v4026_v16 = vunpack.i.h.bf16 %v5150_v50  ;;  %v4025_v13 = vunpack.i.l.bf16 %v5150_v50 }
  0xb5   :  { %4120 = vset.pattern.permute.xlu1 %v5838_v1  ;;  %4445 = vperm.xlu0 %4438, %v5113_v4  }
  0xb6   :  { %4122 = vperm.xlu1 %4120, %v4121_v27   ;;  %v5157_v32 = vpop.permute.xlu1 %3948  ;;  %v5159_v33 = vpop.permute.xlu0 %4029 }
  0xb9   :  { %4450 = vperm.xlu0 %4438, %v5137_v15  }
  0xba   :  { %4126 = vset.pattern.permute.xlu1 %v5831_v0  ;;  %v5166_v35 = vpop.permute.xlu1 %3953  ;;  %v5168_v36 = vpop.permute.xlu0 %4034 }
  0xbb   :  { %4128 = vperm.xlu1 %4126, %v4121_v27   ;;  %v3955_v29 = vunpack.i.l.bf16 %v5166_v35 }
  0xbd   :  { %4455 = vperm.xlu0 %4438, %v5155_v31   ;;  %v4512_v31 = vld [vmem:[#allocation3 + $0x120] ss:$24 sps:$4 sm:$0xff]  }
  0xbe   :  { %v5171_v43 = vpop.permute.xlu0 %4116 }
  0xbf   :  { %4132 = vset.pattern.permute.xlu1 %v5828_v59  ;;  %v5177_v46 = vpop.permute.xlu1 %3959  ;;  %v3956_v59 = vunpack.i.h.bf16 %v5166_v35  ;;  %v4031_v35 = vunpack.i.l.bf16 %v5159_v33 }
  0xc0   :  { %4134 = vperm.xlu1 %4132, %v4121_v27  }
  0xc1   :  { %4460 = vperm.xlu0 %4438, %v5174_v45   ;;  %v4508_v45 = vld [vmem:[#allocation3 + $0x124] ss:$24 sps:$4 sm:$0xff]  }
  0xc2   :  { %v5179_v47 = vpop.permute.xlu0 %4169 }
  0xc3   :  { %5850 = vst [vmem:[#allocation16_spill] sm:$0xff] %v5179_v47  ;;  %v5182_v24 = vpop.permute.xlu1 %3964 }
  0xc4   :  { %4138 = vset.pattern.permute.xlu1 %v5829_v39  ;;  %v3966_v42 = vunpack.i.l.bf16 %v5182_v24 }
  0xc5   :  { %4140 = vperm.xlu1 %4138, %v5021_v7   ;;  %991 = vperm.xlu0 %4438, %v5131_v51  }
  0xc7   :  { %v5187_v48 = vpop.permute.xlu0 %4175 }
  0xc8   :  { %v5189_v49 = vpop.permute.xlu1 %3970 }
  0xc9   :  { %4144 = vset.pattern.permute.xlu1 %v5831_v0  ;;  %4471 = vset.pattern.permute.xlu0 %v5829_v39 }
  0xca   :  { %4146 = vperm.xlu1 %4144, %v5014_v60   ;;  %v4476_v60 = vld [vmem:[#allocation3] ss:$24 sps:$4 sm:$0xff]  }
  0xcb   :  { %v5193_v53 = vpop.permute.xlu0 %4180  ;;  %2691 = vmatpush1.bf16.msra.mxu0 %v4476_v60 }
  0xcc   :  { %2692 = vmatprep.subr.bf16.mxu0 %v4478_v5  ;;  %v3945_v5 = vunpack.i.h.bf16 %v5144_v17  ;;  %v4182_v10 = vunpack.i.l.bf16 %v5193_v53  ;;  %v5264_v17 = vmul.f32 %v4026_v16, %v5226_v55  ;;  %v4504_v16 = vld [vmem:[#allocation3 + $0xfc] ss:$24 sps:$4 sm:$0xff]  }
  0xcd   :  { %v5196_v54 = vpop.permute.xlu1 %3976 }
  0xce   :  { %4150 = vset.pattern.permute.xlu1 %v5829_v39  ;;  %v703_v41 = vmul.f32 %v3945_v5, %v5226_v55  ;;  %v453_v39 = vmul.f32 %v4182_v10, %v5221_v34  ;;  %v5269_v5 = vmul.f32 %v4025_v13, %v5226_v55  ;;  %v704_v10 = vmul.f32 %v3955_v29, %v5226_v55 }
  0xcf   :  { %4152 = vperm.xlu1 %4150, %v4121_v27   ;;  %v5199_v7 = vpop.permute.xlu0 %4185  ;;  %2693 = vmatpush1.bf16.msra.mxu0 %v4482_v9  ;;  %v4488_v27 = vld [vmem:[#allocation3 + $0x60] ss:$24 sps:$4 sm:$0xff]   ;;  %v4183_v9 = vunpack.i.h.bf16 %v5193_v53  ;;  %v3950_v53 = vunpack.i.l.bf16 %v5157_v32  ;;  %v4036_v13 = vunpack.i.l.bf16 %v5168_v36 }
  0xd0   :  { %2694 = vmatprep.subr.bf16.mxu0 %v4484_v14  ;;  %v3951_v14 = vunpack.i.h.bf16 %v5157_v32  ;;  %v5261_v32 = vmul.f32 %v3938_v58, %v5221_v34  ;;  %v4502_v58 = vld [vmem:[#allocation3 + $0xf4] ss:$24 sps:$4 sm:$0xff]   ;;  %v753_v15 = vadd.f32 %v704_v10, %v455_v22  ;;  %v5853_v22 = vmov 1  }
  0xd1   :  { %v454_v3 = vmul.f32 %v4183_v9, %v5221_v34 }
  0xd2   :  { %v5201_v56 = vpop.permute.xlu1 %3982 }
  0xd3   :  { %4156 = vset.pattern.permute.xlu1 %v5838_v1  ;;  %v5204_v63 = vpop.permute.xlu0 %4190  ;;  %2695 = vmatpush1.bf16.msra.mxu0 %v4488_v27  ;;  %v4032_v27 = vunpack.i.h.bf16 %v5159_v33  ;;  %v4506_v33 = vld [vmem:[#allocation3 + $0xf0] ss:$24 sps:$4 sm:$0xff]  }
  0xd4   :  { %4158 = vperm.xlu1 %4156, %v5045_v26   ;;  %2696 = vmatprep.subr.bf16.mxu0 %v4490_v40  ;;  %v4501_v40 = vld [vmem:[#allocation3 + $0xc8] ss:$24 sps:$4 sm:$0xff]  }
  0xd5   :  { %v1299_v9 = vmul.f32 %v4032_v27, %v5228_v28  ;;  %2781 = vmatpush1.bf16.msra.mxu1 %v4501_v40  ;;  %v752_v27 = vadd.f32 %v703_v41, %v454_v3  ;;  %v1298_v40 = vmul.f32 %v4031_v35, %v5228_v28  ;;  %v3961_v3 = vunpack.i.l.bf16 %v5177_v46 }
  0xd6   :  { %2782 = vmatprep.subr.bf16.mxu1 %v4504_v16 }
  0xd7   :  { %v5210_v6 = vpop.permute.xlu1 %3988  ;;  %v5212_v8 = vpop.permute.xlu0 %4195  ;;  %2697 = vmatpush1.bf16.msra.mxu0 %v4494_v2  ;;  %v702_v2 = vmul.f32 %v3944_v57, %v5226_v55  ;;  %v5272_v57 = vmul.f32 %v3951_v14, %v5226_v55  ;;  %v4507_v14 = vld [vmem:[#allocation3 + $0xf8] ss:$24 sps:$4 sm:$0xff]  }
  0xd8   :  { %4162 = vset.pattern.permute.xlu1 %v5831_v0  ;;  %2698 = vmatprep.subr.bf16.mxu0 %v4496_v18  ;;  %v3967_v18 = vunpack.i.h.bf16 %v5182_v24  ;;  %v705_v24 = vmul.f32 %v3956_v59, %v5226_v55  ;;  %v3962_v59 = vunpack.i.h.bf16 %v5177_v46 }
  0xd9   :  { %4164 = vperm.xlu1 %4162, %v5045_v26   ;;  %v751_v29 = vadd.f32 %v702_v2, %v453_v39  ;;  %2783 = vmatpush1.bf16.msra.mxu1 %v4507_v14  ;;  %v4513_v2 = vld [vmem:[#allocation3 + $0x128] ss:$24 sps:$4 sm:$0xff]   ;;  %v4514_v14 = vld [vmem:[#allocation3 + $0x154] ss:$24 sps:$4 sm:$0xff]  }
  0xda   :  { %v999_v46 = vmul.f32 %v3962_v59, %v5230_v62 }
  0xdb   :  { %v5216_v23 = vpop.permute.xlu0 %4200  ;;  %2699 = vmatpush1.bf16.msra.mxu0 %v4500_v37  ;;  %v1002_v37 = vmul.f32 %v3966_v42, %v5230_v62  ;;  %v1003_v42 = vmul.f32 %v3967_v18, %v5230_v62 }
  0xdc   :  { %v5218_v30 = vpop.permute.xlu1 %3994  ;;  %2700 = vmatprep.subr.bf16.mxu0 %v4502_v58  ;;  %v1300_v58 = vmul.f32 %v4036_v13, %v5228_v28 }
  0xdd   :  { %4209 = vset.pattern.permute.xlu1 %v5838_v1 }
  0xde   :  { %4211 = vperm.xlu1 %4209, %v5055_v20  }
  0xdf   :  { %v5232_v60 = vpop.permute.xlu0 %4205  ;;  %2701 = vmatpush1.bf16.msra.mxu0 %v4506_v33  ;;  %v3973_v33 = vunpack.i.h.bf16 %v5189_v49 }
  0xe0   :  { %5851 = vst [vmem:[#allocation17_spill] sm:$0xff] %v5232_v60  ;;  %2702 = vmatprep.subr.bf16.mxu0 %v4508_v45  ;;  %v3972_v45 = vunpack.i.l.bf16 %v5189_v49 }
  0xe1   :  { %v5240_v11 = vpop.permute.xlu1 %4000 }
  0xe2   :  { %4215 = vset.pattern.permute.xlu1 %v5831_v0  ;;  %v5279_v0 = vmul.f32 %v3950_v53, %v5226_v55  ;;  %v4177_v53 = vunpack.i.l.bf16 %v5187_v48 }
  0xe3   :  { %4217 = vperm.xlu1 %4215, %v5055_v20   ;;  %v5254_v50 = vpop.permute.xlu0 %4245  ;;  %2703 = vmatpush1.bf16.msra.mxu0 %v4512_v31 }
  0xe4   :  { %5852 = vst [vmem:[#allocation18_spill] sm:$0xff] %v5254_v50  ;;  %v4178_v50 = vunpack.i.h.bf16 %v5187_v48  ;;  %v4510_v48 = vld [vmem:[#allocation3 + $0x12c] ss:$24 sps:$4 sm:$0xff]   ;;  %v451_v18 = vmul.f32 %v4177_v53, %v5221_v34  ;;  %2704 = vmatprep.subr.bf16.mxu0 %v4514_v14 }
  0xe5   :  { %2784 = vmatprep.subr.bf16.mxu1 %v4510_v48  ;;  %v3800_v48 = vunpack.c.h.bf16 %v5084_v52 }
  0xe6   :  { %v5276_v21 = vpop.permute.xlu1 %4006  ;;  %v452_v35 = vmul.f32 %v4178_v50, %v5221_v34  ;;  %2785 = vmatpush1.bf16.msra.mxu1 %v4513_v2  ;;  %v749_v59 = vadd.f32 %v5279_v0, %v451_v18  ;;  %v1297_v0 = vmul.f32 %v3973_v33, %v5228_v28  ;;  %v3979_v18 = vunpack.i.h.bf16 %v5196_v54 }
  0xe7   :  { %4221 = vset.pattern.permute.xlu1 %v5838_v1  ;;  %v4037_v1 = vunpack.i.h.bf16 %v5168_v36  ;;  %v754_v36 = vadd.f32 %v705_v24, %v5243_v12  ;;  %v4516_v24 = vld [vmem:[#allocation3 + $0x15c] ss:$24 sps:$4 sm:$0xff]  }
  0xe8   :  { %v4252_v51 = vpop.permute.xlu0 %4251  ;;  %4223 = vperm.xlu1 %4221, %v5066_v44   ;;  %2786 = vmatprep.subr.bf16.mxu1 %v4516_v24 }
  0xe9   :  { %v4254_v47 = vunpack.i.h.bf16 %v4252_v51  ;;  %v4253_v60 = vunpack.i.l.bf16 %v4252_v51  ;;  %v1301_v12 = vmul.f32 %v4037_v1, %v5228_v28  ;;  %v1052_v50 = vadd.f32 %v1003_v42, %v754_v36 }
  0xea   :  { %v998_v1 = vmul.f32 %v3961_v3, %v5230_v62  ;;  %v750_v42 = vadd.f32 %v5272_v57, %v452_v35  ;;  %v4520_v3 = vld [vmem:[#allocation3 + $0x184] ss:$24 sps:$4 sm:$0xff]   ;;  %v1296_v35 = vmul.f32 %v3972_v45, %v5228_v28 }
  0xeb   :  { %v1001_v39 = vmul.f32 %v4254_v47, %v5230_v62  ;;  %v1000_v51 = vmul.f32 %v4253_v60, %v5230_v62  ;;  %v5297_v41 = vpop.permute.xlu1 %4012  ;;  %v1051_v47 = vadd.f32 %v1002_v37, %v753_v15  ;;  %v3978_v60 = vunpack.i.l.bf16 %v5196_v54 }
  0xec   :  { %v5303_v16 = vpop.permute.xlu0 %4256  ;;  %4227 = vset.pattern.permute.xlu1 %v5853_v22  ;;  %v1350_v2 = vadd.f32 %v1301_v12, %v1052_v50  ;;  %v1047_v12 = vadd.f32 %v998_v1, %v749_v59  ;;  %v1048_v50 = vadd.f32 %v999_v46, %v750_v42  ;;  %v3996_v54 = vunpack.i.l.bf16 %v5218_v30  ;;  %v4528_v1 = vld [vmem:[#allocation3 + $0x1bc] ss:$24 sps:$4 sm:$0xff]  }
  0xed   :  { %v1049_v10 = vadd.f32 %v1000_v51, %v751_v29  ;;  %v1050_v13 = vadd.f32 %v1001_v39, %v752_v27  ;;  %4229 = vperm.xlu1 %4227, %v5066_v44   ;;  %v4258_v53 = vunpack.i.l.bf16 %v5303_v16  ;;  %v4518_v27 = vld [vmem:[#allocation3 + $0x150] ss:$24 sps:$4 sm:$0xff]   ;;  %v5321_v49 = vadd.f32 %v1300_v58, %v1051_v47  ;;  %v4522_v58 = vld [vmem:[#allocation3 + $0x18c] ss:$24 sps:$4 sm:$0xff]  }
  0xee   :  { %v4519_v29 = vld [vmem:[#allocation3 + $0x158] ss:$24 sps:$4 sm:$0xff]   ;;  %v5854_v51 = vmov 3   ;;  %2705 = vmatpush1.bf16.msra.mxu0 %v4518_v27  ;;  %v4259_v47 = vunpack.i.h.bf16 %v5303_v16  ;;  %v3991_v46 = vunpack.i.h.bf16 %v5210_v6  ;;  %v3939_v59 = vunpack.i.h.bf16 %v5147_v19  ;;  %v4549_v19 = vld [vmem:[#allocation3 + $0x248] ss:$24 sps:$4 sm:$0xff]  }
  0xef   :  { %v5312_v15 = vadd.f32 %v1298_v40, %v1049_v10  ;;  %v5314_v37 = vadd.f32 %v1299_v9, %v1050_v13  ;;  %v706_v9 = vmul.f32 %v3978_v60, %v5226_v55  ;;  %v3984_v40 = vunpack.i.l.bf16 %v5201_v56  ;;  %2787 = vmatpush1.bf16.msra.mxu1 %v4519_v29  ;;  %v4524_v10 = vld [vmem:[#allocation3 + $0x180] ss:$24 sps:$4 sm:$0xff]   ;;  %2706 = vmatprep.subr.bf16.mxu0 %v4520_v3 }
  0xf0   :  { %v4019_v31 = vpop.permute.xlu1 %4018  ;;  %v1004_v60 = vmul.f32 %v4258_v53, %v5230_v62  ;;  %v4525_v13 = vld [vmem:[#allocation3 + $0x188] ss:$24 sps:$4 sm:$0xff]   ;;  %2788 = vmatprep.subr.bf16.mxu1 %v4522_v58  ;;  %v4188_v53 = vunpack.i.h.bf16 %v5199_v7  ;;  %v709_v42 = vmul.f32 %v3979_v18, %v5226_v55  ;;  %v1302_v58 = vmul.f32 %v3996_v54, %v5228_v28 }
  0xf1   :  { %v1428_v39 = vadd.f32 %v5314_v37, %v5312_v15  ;;  %4233 = vset.pattern.permute.xlu1 %v5854_v51  ;;  %v4021_v57 = vunpack.i.h.bf16 %v4019_v31  ;;  %v4020_v36 = vunpack.i.l.bf16 %v4019_v31  ;;  %v755_v14 = vadd.f32 %v706_v9, %v5261_v32  ;;  %v4526_v32 = vld [vmem:[#allocation3 + $0x1b4] ss:$24 sps:$4 sm:$0xff]  }
  0xf2   :  { %4235 = vperm.xlu1 %4233, %v5045_v26   ;;  %v460_v24 = vmul.f32 %v3984_v40, %v5221_v34  ;;  %v1007_v31 = vmul.f32 %v4259_v47, %v5230_v62  ;;  %2707 = vmatpush1.bf16.msra.mxu0 %v4524_v10  ;;  %v4530_v40 = vld [vmem:[#allocation3 + $0x1b0] ss:$24 sps:$4 sm:$0xff]   ;;  %v4009_v18 = vunpack.i.h.bf16 %v5276_v21  ;;  %v4014_v52 = vunpack.i.l.bf16 %v5297_v41 }
  0xf3   :  { %v464_v33 = vmul.f32 %v4021_v57, %v5221_v34  ;;  %v463_v26 = vmul.f32 %v4020_v36, %v5221_v34  ;;  %v1429_v16 = vadd.f32 %v1428_v39, %v5321_v49  ;;  %v1053_v9 = vadd.f32 %v1004_v60, %v755_v14  ;;  %2789 = vmatpush1.bf16.msra.mxu1 %v4525_v13  ;;  %v4531_v36 = vld [vmem:[#allocation3 + $0x1b8] ss:$24 sps:$4 sm:$0xff]   ;;  %v4532_v13 = vld [vmem:[#allocation3 + $0x1e4] ss:$24 sps:$4 sm:$0xff]  }
  0xf4   :  { %v1345_v39 = vadd.f32 %v1296_v35, %v1047_v12  ;;  %v4003_v57 = vunpack.i.h.bf16 %v5240_v11  ;;  %2708 = vmatprep.subr.bf16.mxu0 %v4526_v32  ;;  %2790 = vmatprep.subr.bf16.mxu1 %v4528_v1  ;;  %v758_v3 = vadd.f32 %v709_v42, %v460_v24  ;;  %v1346_v60 = vadd.f32 %v1297_v0, %v1048_v50  ;;  %v4534_v12 = vld [vmem:[#allocation3 + $0x1ec] ss:$24 sps:$4 sm:$0xff]  }
  0xf5   :  { %v5340_v45 = vpop.permute.xlu1 %4040  ;;  %v762_v27 = vadd.f32 %v5264_v17, %v464_v33  ;;  %v5346_v29 = vadd.f32 %v5269_v5, %v463_v26  ;;  %v3985_v17 = vunpack.i.h.bf16 %v5201_v56  ;;  %v3997_v5 = vunpack.i.h.bf16 %v5218_v30 }
  0xf6   :  { %4240 = vperm.xlu1 %4233, %v5055_v20   ;;  %v5355_v20 = vpop.permute.xlu0 %4261  ;;  %v1430_v47 = vadd.f32 %v1429_v16, %v1350_v2  ;;  %v462_v35 = vmul.f32 %v4188_v53, %v5221_v34  ;;  %v710_v56 = vmul.f32 %v3991_v46, %v5226_v55  ;;  %v4015_v30 = vunpack.i.h.bf16 %v5297_v41  ;;  %2709 = vmatpush1.bf16.msra.mxu0 %v4530_v40  ;;  %v4536_v2 = vld [vmem:[#allocation3 + $0x1e0] ss:$24 sps:$4 sm:$0xff]  }
  0xf7   :  { %v1056_v33 = vadd.f32 %v1007_v31, %v758_v3  ;;  %v1351_v26 = vadd.f32 %v1302_v58, %v1053_v9  ;;  %v4264_v14 = vunpack.i.h.bf16 %v5355_v20  ;;  %v461_v0 = vmul.f32 %v3985_v17, %v5221_v34  ;;  %2791 = vmatpush1.bf16.msra.mxu1 %v4531_v36  ;;  %2710 = vmatprep.subr.bf16.mxu0 %v4532_v13  ;;  %v4537_v53 = vld [vmem:[#allocation3 + $0x1e8] ss:$24 sps:$4 sm:$0xff]  }
  0xf8   :  { %v1305_v50 = vmul.f32 %v3997_v5, %v5228_v28  ;;  %v711_v54 = vmul.f32 %v4003_v57, %v5226_v55  ;;  %v1008_v46 = vmul.f32 %v4009_v18, %v5230_v62  ;;  %v4043_v1 = vunpack.i.h.bf16 %v5340_v45  ;;  %2792 = vmatprep.subr.bf16.mxu1 %v4534_v12  ;;  %v4538_v5 = vld [vmem:[#allocation3 + $0x214] ss:$24 sps:$4 sm:$0xff]  }
  0xf9   :  { %v1431_v32 = vadd.f32 %v1430_v47, %v1351_v26  ;;  %v4187_v31 = vunpack.i.l.bf16 %v5199_v7  ;;  %v759_v9 = vadd.f32 %v710_v56, %v461_v0  ;;  %v1306_v40 = vmul.f32 %v4015_v30, %v5228_v28  ;;  %v4540_v57 = vld [vmem:[#allocation3 + $0x21c] ss:$24 sps:$4 sm:$0xff]   ;;  %v4542_v7 = vld [vmem:[#allocation3 + $0x210] ss:$24 sps:$4 sm:$0xff]  }
  0xfa   :  { %4310 = vset.pattern.permute.xlu1 %v5853_v22  ;;  %v4047_v10 = vpop.permute.xlu1 %4046  ;;  %v3990_v36 = vunpack.i.l.bf16 %v5210_v6  ;;  %v5375_v3 = vadd.f32 %v1305_v50, %v1056_v33  ;;  %v1009_v58 = vmul.f32 %v4264_v14, %v5230_v62  ;;  %2711 = vmatpush1.bf16.msra.mxu0 %v4536_v2  ;;  %v1394_v56 = vadd.f32 %v1346_v60, %v1345_v39  ;;  %v4543_v6 = vld [vmem:[#allocation3 + $0x218] ss:$24 sps:$4 sm:$0xff]   ;;  %v4544_v60 = vld [vmem:[#allocation3 + $0x244] ss:$24 sps:$4 sm:$0xff]  }
  0xfb   :  { %v4049_v24 = vunpack.i.h.bf16 %v4047_v10  ;;  %4312 = vperm.xlu1 %4310, %v5061_v38   ;;  %v4048_v16 = vunpack.i.l.bf16 %v4047_v10  ;;  %v760_v30 = vadd.f32 %v711_v54, %v462_v35  ;;  %v4002_v10 = vunpack.i.l.bf16 %v5240_v11  ;;  %2793 = vmatpush1.bf16.msra.mxu1 %v4537_v53  ;;  %v4546_v35 = vld [vmem:[#allocation3 + $0x24c] ss:$24 sps:$4 sm:$0xff]  }
  0xfc   :  { %v1057_v12 = vadd.f32 %v1008_v46, %v759_v9  ;;  %v1307_v33 = vmul.f32 %v4043_v1, %v5228_v28  ;;  %v5855_v26 = vunpack.c.l.bf16 %v5043_v25  ;;  %2712 = vmatprep.subr.bf16.mxu0 %v4538_v5  ;;  %2794 = vmatprep.subr.bf16.mxu1 %v4540_v57  ;;  %v4008_v39 = vunpack.i.l.bf16 %v5276_v21  ;;  %v4548_v21 = vld [vmem:[#allocation3 + $0x240] ss:$24 sps:$4 sm:$0xff]   ;;  %v4552_v1 = vld [vmem:[#allocation3 + $0x27c] ss:$24 sps:$4 sm:$0xff]  }
  0xfd   :  { %v1011_v42 = vmul.f32 %v4049_v24, %v5230_v62  ;;  %v1010_v17 = vmul.f32 %v4048_v16, %v5230_v62  ;;  %v1395_v11 = vadd.f32 %v1394_v56, %v5312_v15  ;;  %v458_v24 = vmul.f32 %v3939_v59, %v5221_v34 }
  0xfe   :  { %v187_v14 = vmax.f32 %v5855_v26, 0.0  ;;  %v707_v25 = vmul.f32 %v3990_v36, %v5226_v55  ;;  %v5399_v2 = vadd.f32 %v1306_v40, %v1057_v12  ;;  %v1058_v0 = vadd.f32 %v1009_v58, %v760_v30  ;;  %2713 = vmatpush1.bf16.msra.mxu0 %v4542_v7  ;;  %v4554_v40 = vld [vmem:[#allocation3 + $0x270] ss:$24 sps:$4 sm:$0xff]  }
  0xff   :  { %v5378_v18 = vadd.f32 %v1011_v42, %v762_v27  ;;  %4316 = vset.pattern.permute.xlu1 %v5854_v51  ;;  %v5381_v47 = vpop.permute.xlu1 %4052  ;;  %v1059_v13 = vadd.f32 %v1010_v17, %v5346_v29  ;;  %v1432_v27 = vadd.f32 %v1431_v32, %v5375_v3  ;;  %v4263_v29 = vunpack.i.l.bf16 %v5355_v20  ;;  %2795 = vmatpush1.bf16.msra.mxu1 %v4543_v6 }
 0x100   :  { %4318 = vperm.xlu1 %4316, %v5066_v44   ;;  %v190_v44 = vmax.f32 %v3800_v48, 0.0  ;;  %v459_v15 = vmul.f32 %v4187_v31, %v5221_v34  ;;  %v708_v20 = vmul.f32 %v4002_v10, %v5226_v55  ;;  %v4042_v48 = vunpack.i.l.bf16 %v5340_v45  ;;  %2714 = vmatprep.subr.bf16.mxu0 %v4544_v60  ;;  %v4550_v45 = vld [vmem:[#allocation3 + $0x274] ss:$24 sps:$4 sm:$0xff]  }
 0x101   :  { %v5406_v59 = vadd.f32 %v1307_v33, %v1058_v0  ;;  %v1433_v54 = vadd.f32 %v1432_v27, %v5399_v2  ;;  %2796 = vmatprep.subr.bf16.mxu1 %v4546_v35  ;;  %v1005_v46 = vmul.f32 %v4008_v39, %v5230_v62  ;;  %v1396_v32 = vadd.f32 %v1395_v11, %v5314_v37  ;;  %v4555_v37 = vld [vmem:[#allocation3 + $0x278] ss:$24 sps:$4 sm:$0xff]   ;;  %v4556_v27 = vld [vmem:[#allocation3 + $0x2a4] ss:$24 sps:$4 sm:$0xff]   ;;  %v4267_v35 = vpop.permute.xlu0 %4266 }
 0x102   :  { %v1006_v41 = vmul.f32 %v4263_v29, %v5230_v62  ;;  %v5414_v9 = vpack.i.bf16 %v190_v44, %v187_v14  ;;  %2715 = vmatpush1.bf16.msra.mxu0 %v4548_v21  ;;  %v757_v17 = vadd.f32 %v708_v20, %v459_v15  ;;  %v1303_v5 = vmul.f32 %v4014_v52, %v5228_v28  ;;  %v4558_v33 = vld [vmem:[#allocation3 + $0x2ac] ss:$24 sps:$4 sm:$0xff]   ;;  %v4560_v14 = vld [vmem:[#allocation3 + $0x2a0] ss:$24 sps:$4 sm:$0xff]   ;;  %v4564_v0 = vld [vmem:[#allocation3 + $0x2dc] ss:$24 sps:$4 sm:$0xff]  }
 0x103   :  { %v1304_v57 = vmul.f32 %v4042_v48, %v5228_v28  ;;  %v5856_v36 = vmov 0   ;;  %2797 = vmatpush1.bf16.msra.mxu1 %v4549_v19  ;;  %v1434_v58 = vadd.f32 %v1433_v54, %v5406_v59  ;;  %2716 = vmatprep.subr.bf16.mxu0 %v4550_v45  ;;  %v1397_v6 = vadd.f32 %v1396_v32, %v5321_v49  ;;  %v4566_v20 = vld [vmem:[#allocation3 + $0x2d0] ss:$24 sps:$4 sm:$0xff]  }
 0x104   :  { %4328 = vperm.xlu1 %4316, %v5061_v38   ;;  %v4059_v50 = vpop.permute.xlu1 %4058  ;;  %v756_v38 = vadd.f32 %v707_v25, %v458_v24  ;;  %v1055_v12 = vadd.f32 %v1006_v41, %v757_v17  ;;  %2798 = vmatprep.subr.bf16.mxu1 %v4552_v1  ;;  %v4192_v49 = vunpack.i.l.bf16 %v5204_v63  ;;  %v4198_v44 = vunpack.i.h.bf16 %v5212_v8  ;;  %v4562_v25 = vld [vmem:[#allocation3 + $0x2d4] ss:$24 sps:$4 sm:$0xff]  }
 0x105   :  { %v4061_v16 = vunpack.i.h.bf16 %v4059_v50  ;;  %v4060_v53 = vunpack.i.l.bf16 %v4059_v50  ;;  %v4055_v21 = vunpack.i.h.bf16 %v5381_v47  ;;  %v4054_v15 = vunpack.i.l.bf16 %v5381_v47  ;;  %v4567_v50 = vld [vmem:[#allocation3 + $0x2d8] ss:$24 sps:$4 sm:$0xff]   ;;  %v4272_v47 = vpop.permute.xlu0 %4271 }
 0x106   :  { %v1054_v10 = vadd.f32 %v1005_v46, %v756_v38  ;;  %2717 = vmatpush1.bf16.msra.mxu0 %v4554_v40  ;;  %v1353_v11 = vadd.f32 %v1304_v57, %v1055_v12  ;;  %v4197_v52 = vunpack.i.l.bf16 %v5212_v8  ;;  %v4269_v45 = vunpack.i.h.bf16 %v4267_v35 }
 0x107   :  { %v1309_v42 = vmul.f32 %v4061_v16, %v5228_v28  ;;  %v1308_v31 = vmul.f32 %v4060_v53, %v5228_v28  ;;  %2799 = vmatpush1.bf16.msra.mxu1 %v4555_v37  ;;  %2718 = vmatprep.subr.bf16.mxu0 %v4556_v27  ;;  %v467_v16 = vmul.f32 %v4192_v49, %v5221_v34  ;;  %v4268_v1 = vunpack.i.l.bf16 %v4267_v35 }
 0x108   :  { %4332 = vset.pattern.permute.xlu1 %v5856_v36  ;;  %v1352_v39 = vadd.f32 %v1303_v5, %v1054_v10  ;;  %2800 = vmatprep.subr.bf16.mxu1 %v4558_v33  ;;  %v466_v53 = vmul.f32 %v4198_v44, %v5221_v34  ;;  %v714_v8 = vmul.f32 %v4055_v21, %v5226_v55  ;;  %v4274_v37 = vunpack.i.h.bf16 %v4272_v47 }
 0x109   :  { %v1357_v7 = vadd.f32 %v1308_v31, %v1059_v13  ;;  %v1358_v56 = vadd.f32 %v1309_v42, %v5378_v18  ;;  %4334 = vperm.xlu1 %4332, %v5094_v61   ;;  %v4065_v30 = vpop.permute.xlu1 %4064  ;;  %v4561_v13 = vld [vmem:[#allocation3 + $0x2a8] ss:$24 sps:$4 sm:$0xff]   ;;  %v4193_v18 = vunpack.i.h.bf16 %v5204_v63  ;;  %v716_v41 = vmul.f32 %v4054_v15, %v5226_v55 }
 0x10a   :  { %v1398_v60 = vadd.f32 %v1397_v6, %v1352_v39  ;;  %2719 = vmatpush1.bf16.msra.mxu0 %v4560_v14  ;;  %v4067_v19 = vunpack.i.h.bf16 %v4065_v30  ;;  %v4066_v54 = vunpack.i.l.bf16 %v4065_v30  ;;  %v468_v42 = vmul.f32 %v4197_v52, %v5221_v34 }
 0x10b   :  { %v1435_v26 = vadd.f32 %v1434_v58, %v1357_v7  ;;  %2801 = vmatpush1.bf16.msra.mxu1 %v4561_v13  ;;  %2720 = vmatprep.subr.bf16.mxu0 %v4562_v25  ;;  %v465_v63 = vmul.f32 %v4193_v18, %v5221_v34  ;;  %v4273_v58 = vunpack.i.l.bf16 %v4272_v47  ;;  %v5857_v6 = vmov 2  }
 0x10c   :  { %v1399_v48 = vadd.f32 %v1398_v60, %v1353_v11  ;;  %2802 = vmatprep.subr.bf16.mxu1 %v4564_v0  ;;  %v715_v5 = vmul.f32 %v4067_v19, %v5226_v55  ;;  %v717_v57 = vmul.f32 %v4066_v54, %v5226_v55  ;;  %v765_v12 = vadd.f32 %v716_v41, %v467_v16  ;;  %v4277_v0 = vpop.permute.xlu0 %4276 }
 0x10d   :  { %v5424_v29 = vadd.f32 %v1435_v26, %v1358_v56  ;;  %4345 = vperm.xlu1 %4332, %v5414_v9   ;;  %v1012_v27 = vmul.f32 %v4269_v45, %v5230_v62  ;;  %v1014_v33 = vmul.f32 %v4268_v1, %v5230_v62  ;;  %v1013_v60 = vmul.f32 %v4274_v37, %v5230_v62 }
 0x10e   :  { %v4071_v24 = vpop.permute.xlu1 %4070  ;;  %2721 = vmatpush1.bf16.msra.mxu0 %v4566_v20  ;;  %v1400_v31 = vadd.f32 %v1399_v48, %v5375_v3  ;;  %v763_v3 = vadd.f32 %v714_v8, %v465_v63  ;;  %v764_v49 = vadd.f32 %v715_v5, %v466_v53  ;;  %v766_v44 = vadd.f32 %v717_v57, %v468_v42 }
 0x10f   :  { %v4073_v46 = vunpack.i.h.bf16 %v4071_v24  ;;  %v4072_v32 = vunpack.i.l.bf16 %v4071_v24  ;;  %2803 = vmatpush1.bf16.msra.mxu1 %v4567_v50  ;;  %v1015_v35 = vmul.f32 %v4273_v58, %v5230_v62  ;;  %v1063_v25 = vadd.f32 %v1014_v33, %v765_v12 }
 0x110   :  { %v1401_v26 = vadd.f32 %v1400_v31, %v5399_v2  ;;  %v1061_v24 = vadd.f32 %v1012_v27, %v763_v3  ;;  %v4202_v15 = vunpack.i.l.bf16 %v5216_v23  ;;  %v1062_v54 = vadd.f32 %v1013_v60, %v764_v49 }
 0x111   :  { %4349 = vset.pattern.permute.xlu1 %v5853_v22  ;;  %v470_v7 = vmul.f32 %v4073_v46, %v5221_v34  ;;  %v469_v56 = vmul.f32 %v4072_v32, %v5221_v34  ;;  %v1064_v16 = vadd.f32 %v1015_v35, %v766_v44  ;;  %v4282_v32 = vpop.permute.xlu0 %4281  ;;  %v4203_v41 = vunpack.i.h.bf16 %v5216_v23 }
 0x112   :  { %4351 = vperm.xlu1 %4349, %v5414_v9   ;;  %v1402_v20 = vadd.f32 %v1401_v26, %v5406_v59  ;;  %v4278_v59 = vunpack.i.l.bf16 %v4277_v0  ;;  %v4279_v42 = vunpack.i.h.bf16 %v4277_v0  ;;  %v4119_v49 = vunpack.i.h.bf16 %v5171_v43  ;;  %v4570_v0 = vld [vmem:[#allocation3 + $0x304] ss:$24 sps:$4 sm:$0xff]  }
 0x113   :  { %v4077_v38 = vpop.permute.xlu1 %4076  ;;  %v474_v23 = vmul.f32 %v4203_v41, %v5221_v34  ;;  %2731 = vmatprep.subr.bf16.mxu0 %v4570_v0 }
 0x114   :  { %v4079_v40 = vunpack.i.h.bf16 %v4077_v38  ;;  %v4078_v17 = vunpack.i.l.bf16 %v4077_v38  ;;  %v1017_v3 = vmul.f32 %v4279_v42, %v5230_v62 }
 0x116   :  { %v719_v30 = vmul.f32 %v4079_v40, %v5226_v55  ;;  %v718_v10 = vmul.f32 %v4078_v17, %v5226_v55  ;;  %4355 = vset.pattern.permute.xlu1 %v5857_v6  ;;  %v4283_v17 = vunpack.i.l.bf16 %v4282_v32  ;;  %v4118_v6 = vunpack.i.l.bf16 %v5171_v43  ;;  %v5858_v43 = vld [vmem:[#allocation13_spill] sm:$0xff] }
 0x117   :  { %4357 = vperm.xlu1 %4355, %v5414_v9  }
 0x118   :  { %v5452_v14 = vadd.f32 %v718_v10, %v469_v56  ;;  %v5454_v39 = vadd.f32 %v719_v30, %v470_v7  ;;  %v4083_v11 = vpop.permute.xlu1 %4082  ;;  %v4284_v56 = vunpack.i.h.bf16 %v4282_v32  ;;  %v1016_v30 = vmul.f32 %v4278_v59, %v5230_v62 }
 0x119   :  { %v4085_v13 = vunpack.i.h.bf16 %v4083_v11  ;;  %v4084_v18 = vunpack.i.l.bf16 %v4083_v11  ;;  %v1018_v27 = vmul.f32 %v4283_v17, %v5230_v62 }
 0x11a   :  { %v1021_v60 = vmul.f32 %v4284_v56, %v5230_v62  ;;  %v1065_v35 = vadd.f32 %v1016_v30, %v5452_v14  ;;  %v1319_v14 = vmul.f32 %v4119_v49, %v5228_v28 }
 0x11b   :  { %v1310_v21 = vmul.f32 %v4085_v13, %v5228_v28  ;;  %v1312_v2 = vmul.f32 %v4084_v18, %v5228_v28  ;;  %4361 = vset.pattern.permute.xlu1 %v5854_v51 }
 0x11c   :  { %4363 = vperm.xlu1 %4361, %v5094_v61   ;;  %v4088_v52 = vpop.permute.xlu1 %4087  ;;  %v471_v61 = vmul.f32 %v4202_v15, %v5221_v34 }
 0x11d   :  { %v1359_v48 = vadd.f32 %v1310_v21, %v1061_v24  ;;  %v1361_v50 = vadd.f32 %v1312_v2, %v1063_v25  ;;  %v4090_v63 = vunpack.i.h.bf16 %v4088_v52  ;;  %v4089_v19 = vunpack.i.l.bf16 %v4088_v52 }
 0x11e   :  { %v1066_v21 = vadd.f32 %v1017_v3, %v5454_v39  ;;  %v1316_v2 = vmul.f32 %v4118_v6, %v5228_v28 }
 0x11f   :  { %v1403_v53 = vadd.f32 %v1402_v20, %v1359_v48  ;;  %v1311_v47 = vmul.f32 %v4090_v63, %v5228_v28  ;;  %v1313_v46 = vmul.f32 %v4089_v19, %v5228_v28  ;;  %v1437_v8 = vadd.f32 %v5424_v29, %v1361_v50 }
 0x120   :  { %4367 = vset.pattern.permute.xlu1 %v5853_v22 }
 0x121   :  { %v1360_v45 = vadd.f32 %v1311_v47, %v1062_v54  ;;  %v1362_v1 = vadd.f32 %v1313_v46, %v1064_v16  ;;  %4369 = vperm.xlu1 %4367, %v5113_v4   ;;  %v4094_v38 = vpop.permute.xlu1 %4093 }
 0x122   :  { %v4096_v31 = vunpack.i.h.bf16 %v4094_v38  ;;  %v4095_v40 = vunpack.i.l.bf16 %v4094_v38 }
 0x123   :  { %v1404_v5 = vadd.f32 %v1403_v53, %v1360_v45  ;;  %v1462_v57 = vadd.f32 %v1360_v45, %v1359_v48  ;;  %v1438_v37 = vadd.f32 %v1437_v8, %v1362_v1  ;;  %v1496_v29 = vadd.f32 %v1362_v1, %v1361_v50  ;;  %v5859_v45 = vld [vmem:[#allocation14_spill] sm:$0xff] }
 0x124   :  { %v723_v58 = vmul.f32 %v4096_v31, %v5226_v55  ;;  %v720_v7 = vmul.f32 %v4095_v40, %v5226_v55  ;;  %v4287_v40 = vpop.permute.xlu0 %4286 }
 0x125   :  { %v1405_v10 = vadd.f32 %v1404_v5, %v1361_v50  ;;  %v1463_v4 = vadd.f32 %v1462_v57, %v1361_v50  ;;  %4373 = vset.pattern.permute.xlu1 %v5854_v51 }
 0x126   :  { %v769_v12 = vadd.f32 %v720_v7, %v471_v61  ;;  %4375 = vperm.xlu1 %4373, %v5414_v9   ;;  %v4100_v33 = vpop.permute.xlu1 %4099  ;;  %v772_v44 = vadd.f32 %v723_v58, %v474_v23  ;;  %v4573_v9 = vld [vmem:[#allocation3 + $0x30c] ss:$24 sps:$4 sm:$0xff]   ;;  %v4288_v23 = vunpack.i.l.bf16 %v4287_v40 }
 0x127   :  { %v4102_v26 = vunpack.i.h.bf16 %v4100_v33  ;;  %v4101_v11 = vunpack.i.l.bf16 %v4100_v33  ;;  %v1406_v13 = vadd.f32 %v1405_v10, %v1362_v1  ;;  %v1464_v18 = vadd.f32 %v1463_v4, %v1362_v1  ;;  %2813 = vmatprep.subr.bf16.mxu1 %v4573_v9  ;;  %v5860_v58 = vld [vmem:[#allocation15_spill] sm:$0xff] }
 0x128   :  { %v1067_v15 = vadd.f32 %v1018_v27, %v769_v12  ;;  %v1070_v48 = vadd.f32 %v1021_v60, %v772_v44  ;;  %v1019_v3 = vmul.f32 %v4288_v23, %v5230_v62  ;;  %v4292_v33 = vpop.permute.xlu0 %4291 }
 0x129   :  { %v1315_v24 = vmul.f32 %v4102_v26, %v5228_v28  ;;  %v1314_v25 = vmul.f32 %v4101_v11, %v5228_v28  ;;  %v5861_v26 = vld [vmem:[#allocation17_spill] sm:$0xff]  ;;  %v4293_v0 = vunpack.i.l.bf16 %v4292_v33 }
 0x12a   :  { %4379 = vset.pattern.permute.xlu1 %v5856_v36  ;;  %v1365_v16 = vadd.f32 %v1316_v2, %v1067_v15  ;;  %v5496_v32 = vadd.f32 %v1319_v14, %v1070_v48  ;;  %v4207_v11 = vunpack.i.l.bf16 %v5861_v26 }
 0x12b   :  { %v1363_v20 = vadd.f32 %v1314_v25, %v1065_v35  ;;  %4381 = vperm.xlu1 %4379, %v5858_v43   ;;  %v4106_v52 = vpop.permute.xlu1 %4105  ;;  %v1364_v50 = vadd.f32 %v1315_v24, %v1066_v21 }
 0x12c   :  { %v4108_v17 = vunpack.i.h.bf16 %v4106_v52  ;;  %v4107_v5 = vunpack.i.l.bf16 %v4106_v52  ;;  %v4208_v52 = vunpack.i.h.bf16 %v5861_v26  ;;  %v477_v14 = vmul.f32 %v4207_v11, %v5221_v34 }
 0x12d   :  { %v1439_v63 = vadd.f32 %v1438_v37, %v1363_v20  ;;  %v1497_v19 = vadd.f32 %v1496_v29, %v1363_v20  ;;  %v5490_v54 = vadd.f32 %v1406_v13, %v1363_v20  ;;  %v5492_v39 = vadd.f32 %v1464_v18, %v1363_v20 }
 0x12e   :  { %v4289_v29 = vunpack.i.h.bf16 %v4287_v40  ;;  %v475_v56 = vmul.f32 %v4108_v17, %v5221_v34  ;;  %v472_v30 = vmul.f32 %v4107_v5, %v5221_v34 }
 0x12f   :  { %v1440_v53 = vadd.f32 %v1439_v63, %v1364_v50  ;;  %v1498_v47 = vadd.f32 %v1497_v19, %v1364_v50  ;;  %4385 = vset.pattern.permute.xlu1 %v5853_v22 }
 0x130   :  { %4387 = vperm.xlu1 %4385, %v5858_v43   ;;  %v4112_v46 = vpop.permute.xlu1 %4111  ;;  %v1022_v6 = vmul.f32 %v4289_v29, %v5230_v62 }
 0x131   :  { %v1441_v8 = vadd.f32 %v1440_v53, %v1365_v16  ;;  %v1499_v41 = vadd.f32 %v1498_v47, %v1365_v16  ;;  %v4114_v38 = vunpack.i.h.bf16 %v4112_v46  ;;  %v4113_v42 = vunpack.i.l.bf16 %v4112_v46 }
 0x133   :  { %v5499_v61 = vadd.f32 %v1441_v8, %v5496_v32  ;;  %v1500_v59 = vadd.f32 %v1499_v41, %v5496_v32  ;;  %v724_v57 = vmul.f32 %v4114_v38, %v5226_v55  ;;  %v721_v37 = vmul.f32 %v4113_v42, %v5226_v55 }
 0x134   :  { %4403 = vset.pattern.permute.xlu1 %v5856_v36  ;;  %v1024_v8 = vmul.f32 %v4293_v0, %v5230_v62 }
 0x135   :  { %4405 = vperm.xlu1 %4403, %v5859_v45   ;;  %v4123_v1 = vpop.permute.xlu1 %4122  ;;  %v770_v10 = vadd.f32 %v721_v37, %v472_v30  ;;  %v773_v4 = vadd.f32 %v724_v57, %v475_v56 }
 0x136   :  { %v4125_v24 = vunpack.i.h.bf16 %v4123_v1  ;;  %v4124_v25 = vunpack.i.l.bf16 %v4123_v1 }
 0x137   :  { %v1068_v13 = vadd.f32 %v1019_v3, %v770_v10  ;;  %v1071_v18 = vadd.f32 %v1022_v6, %v773_v4 }
 0x138   :  { %v476_v41 = vmul.f32 %v4125_v24, %v5221_v34  ;;  %v473_v1 = vmul.f32 %v4124_v25, %v5221_v34 }
 0x139   :  { %4409 = vset.pattern.permute.xlu1 %v5853_v22 }
 0x13a   :  { %4411 = vperm.xlu1 %4409, %v5859_v45   ;;  %v4129_v31 = vpop.permute.xlu1 %4128 }
 0x13b   :  { %v4131_v49 = vunpack.i.h.bf16 %v4129_v31  ;;  %v4130_v44 = vunpack.i.l.bf16 %v4129_v31 }
 0x13d   :  { %v725_v63 = vmul.f32 %v4131_v49, %v5226_v55  ;;  %v722_v19 = vmul.f32 %v4130_v44, %v5226_v55 }
 0x13e   :  { %4415 = vset.pattern.permute.xlu1 %v5856_v36 }
 0x13f   :  { %4417 = vperm.xlu1 %4415, %v5860_v58   ;;  %v4135_v7 = vpop.permute.xlu1 %4134  ;;  %v771_v5 = vadd.f32 %v722_v19, %v473_v1  ;;  %v774_v57 = vadd.f32 %v725_v63, %v476_v41 }
 0x140   :  { %v4137_v21 = vunpack.i.h.bf16 %v4135_v7  ;;  %v4136_v9 = vunpack.i.l.bf16 %v4135_v7 }
 0x142   :  { %v1023_v38 = vmul.f32 %v4137_v21, %v5230_v62  ;;  %v1020_v42 = vmul.f32 %v4136_v9, %v5230_v62 }
 0x143   :  { %4421 = vset.pattern.permute.xlu1 %v5853_v22 }
 0x144   :  { %4423 = vperm.xlu1 %4421, %v5860_v58   ;;  %v4141_v12 = vpop.permute.xlu1 %4140  ;;  %v1069_v30 = vadd.f32 %v1020_v42, %v771_v5  ;;  %v1072_v10 = vadd.f32 %v1023_v38, %v774_v57 }
 0x145   :  { %v4143_v27 = vunpack.i.h.bf16 %v4141_v12  ;;  %v4142_v36 = vunpack.i.l.bf16 %v4141_v12  ;;  %v5863_v12 = vld [vmem:[#allocation12_spill] sm:$0xff] }
 0x147   :  { %v1320_v60 = vmul.f32 %v4143_v27, %v5228_v28  ;;  %v1317_v35 = vmul.f32 %v4142_v36, %v5228_v28 }
 0x148   :  { %4427 = vset.pattern.permute.xlu1 %v5854_v51 }
 0x149   :  { %v1366_v2 = vadd.f32 %v1317_v35, %v1068_v13  ;;  %v5520_v15 = vadd.f32 %v1320_v60, %v1071_v18  ;;  %4429 = vperm.xlu1 %4427, %v5858_v43   ;;  %v4147_v20 = vpop.permute.xlu1 %4146  ;;  %v4294_v43 = vunpack.i.h.bf16 %v4292_v33 }
 0x14a   :  { %v4149_v48 = vunpack.i.h.bf16 %v4147_v20  ;;  %v4148_v50 = vunpack.i.l.bf16 %v4147_v20 }
 0x14b   :  { %v1466_v16 = vadd.f32 %v5492_v39, %v1366_v2  ;;  %v1501_v53 = vadd.f32 %v1500_v59, %v5520_v15  ;;  %v5862_v39 = vld [vmem:[#allocation16_spill] sm:$0xff]  ;;  %v478_v59 = vmul.f32 %v4208_v52, %v5221_v34  ;;  %v1025_v7 = vmul.f32 %v4294_v43, %v5230_v62 }
 0x14c   :  { %v727_v47 = vmul.f32 %v4149_v48, %v5226_v55  ;;  %v726_v46 = vmul.f32 %v4148_v50, %v5226_v55  ;;  %v4171_v31 = vunpack.i.l.bf16 %v5862_v39  ;;  %v4172_v6 = vunpack.i.h.bf16 %v5862_v39  ;;  %v4297_v50 = vpop.permute.xlu0 %4296 }
 0x14d   :  { %4434 = vperm.xlu1 %4427, %v5859_v45   ;;  %v1408_v27 = vadd.f32 %v5490_v54, %v1366_v2  ;;  %v1443_v36 = vadd.f32 %v5499_v61, %v5520_v15 }
 0x14e   :  { %v775_v40 = vadd.f32 %v726_v46, %v477_v14  ;;  %v4153_v17 = vpop.permute.xlu1 %4152  ;;  %v776_v23 = vadd.f32 %v727_v47, %v478_v59  ;;  %v1322_v3 = vmul.f32 %v4171_v31, %v5228_v28  ;;  %v1323_v35 = vmul.f32 %v4172_v6, %v5228_v28 }
 0x14f   :  { %v4155_v37 = vunpack.i.h.bf16 %v4153_v17  ;;  %v4154_v29 = vunpack.i.l.bf16 %v4153_v17 }
 0x150   :  { %v1073_v56 = vadd.f32 %v1024_v8, %v775_v40  ;;  %v1074_v13 = vadd.f32 %v1025_v7, %v776_v23  ;;  %v4302_v47 = vpop.permute.xlu0 %4301  ;;  %v4298_v8 = vunpack.i.l.bf16 %v4297_v50 }
 0x151   :  { %v1321_v4 = vmul.f32 %v4155_v37, %v5228_v28  ;;  %v1318_v45 = vmul.f32 %v4154_v29, %v5228_v28  ;;  %4464 = vset.pattern.permute.xlu1 %v5853_v22  ;;  %v4304_v17 = vunpack.i.h.bf16 %v4302_v47  ;;  %v4303_v5 = vunpack.i.l.bf16 %v4302_v47 }
 0x152   :  { %693 = vperm.xlu1 %4464, %v5863_v12   ;;  %v1371_v18 = vadd.f32 %v1322_v3, %v1073_v56  ;;  %v1372_v0 = vadd.f32 %v1323_v35, %v1074_v13  ;;  %v1028_v29 = vmul.f32 %v4298_v8, %v5230_v62 }
 0x153   :  { %v1367_v33 = vadd.f32 %v1318_v45, %v1069_v30  ;;  %v5549_v26 = vadd.f32 %v1321_v4, %v1072_v10  ;;  %v4159_v11 = vpop.permute.xlu1 %4158  ;;  %v5864_v10 = vld [vmem:[#allocation18_spill] sm:$0xff] }
 0x154   :  { %v4160_v19 = vunpack.i.l.bf16 %v4159_v11  ;;  %v5576_v56 = vpop.permute.xlu0 %4306  ;;  %v4248_v4 = vunpack.i.h.bf16 %v5864_v10 }
 0x155   :  { %v1409_v49 = vadd.f32 %v1408_v27, %v1367_v33  ;;  %v1444_v22 = vadd.f32 %v1443_v36, %v5549_v26  ;;  %v1467_v44 = vadd.f32 %v1466_v16, %v1367_v33  ;;  %v1502_v60 = vadd.f32 %v1501_v53, %v5549_v26 }
 0x156   :  { %4465 = vset.pattern.permute.xlu1 %v5854_v51  ;;  %v4299_v16 = vunpack.i.h.bf16 %v4297_v50  ;;  %v481_v39 = vmul.f32 %v4160_v19, %v5221_v34  ;;  %v1027_v27 = vmul.f32 %v4304_v17, %v5230_v62  ;;  %v1029_v36 = vmul.f32 %v4303_v5, %v5230_v62 }
 0x157   :  { %v1410_v54 = vadd.f32 %v1409_v49, %v5496_v32  ;;  %v1445_v24 = vadd.f32 %v1444_v22, %v1371_v18  ;;  %v1468_v61 = vadd.f32 %v1467_v44, %v5496_v32  ;;  %v1503_v25 = vadd.f32 %v1502_v60, %v1371_v18  ;;  %4467 = vperm.xlu1 %4465, %v5860_v58  }
 0x158   :  { %v4165_v21 = vpop.permute.xlu1 %4164  ;;  %v4161_v58 = vunpack.i.h.bf16 %v4159_v11  ;;  %v1026_v31 = vmul.f32 %v4299_v16, %v5230_v62  ;;  %v4247_v22 = vunpack.i.l.bf16 %v5864_v10 }
 0x159   :  { %v1469_v9 = vadd.f32 %v1468_v61, %v5520_v15  ;;  %v5559_v2 = vadd.f32 %v1445_v24, %v1372_v0  ;;  %v5561_v20 = vadd.f32 %v1503_v25, %v1372_v0  ;;  %v4167_v48 = vunpack.i.h.bf16 %v4165_v21 }
 0x15a   :  { %v4166_v63 = vunpack.i.l.bf16 %v4165_v21  ;;  %v479_v38 = vmul.f32 %v4161_v58, %v5221_v34  ;;  %v1411_v60 = vadd.f32 %v1410_v54, %v5520_v15  ;;  %v488_v21 = vmul.f32 %v4248_v4, %v5221_v34 }
 0x15b   :  { %1289 = vperm.xlu1 %4465, %v5863_v12   ;;  %v1470_v51 = vadd.f32 %v1469_v9, %v5549_v26  ;;  %v728_v53 = vmul.f32 %v4167_v48, %v5226_v55  ;;  %v4309_v15 = vunpack.i.h.bf16 %v5576_v56  ;;  %v485_v5 = vmul.f32 %v4247_v22, %v5221_v34 }
 0x15c   :  { %v730_v43 = vmul.f32 %v4166_v63, %v5226_v55  ;;  %v1412_v16 = vadd.f32 %v1411_v60, %v5549_v26 }
 0x15d   :  { %v4212_v52 = vpop.permute.xlu1 %4211  ;;  %v777_v40 = vadd.f32 %v728_v53, %v479_v38 }
 0x15e   :  { %v4214_v42 = vunpack.i.h.bf16 %v4212_v52  ;;  %v4213_v59 = vunpack.i.l.bf16 %v4212_v52  ;;  %v779_v37 = vadd.f32 %v730_v43, %v481_v39  ;;  %v4324_v52 = vpop.permute.xlu0 %4323  ;;  %v4308_v39 = vunpack.i.l.bf16 %v5576_v56 }
 0x15f   :  { %v1075_v12 = vadd.f32 %v1026_v31, %v777_v40  ;;  %v4326_v47 = vunpack.i.h.bf16 %v4324_v52 }
 0x160   :  { %v480_v7 = vmul.f32 %v4214_v42, %v5221_v34  ;;  %v482_v45 = vmul.f32 %v4213_v59, %v5221_v34  ;;  %v1077_v11 = vadd.f32 %v1028_v29, %v779_v37  ;;  %v1030_v10 = vmul.f32 %v4308_v39, %v5230_v62 }
 0x161   :  { %v1035_v29 = vmul.f32 %v4326_v47, %v5230_v62 }
 0x162   :  { %v4218_v14 = vpop.permute.xlu1 %4217 }
 0x163   :  { %v4220_v46 = vunpack.i.h.bf16 %v4218_v14  ;;  %v4219_v41 = vunpack.i.l.bf16 %v4218_v14 }
 0x165   :  { %v729_v57 = vmul.f32 %v4220_v46, %v5226_v55  ;;  %v731_v23 = vmul.f32 %v4219_v41, %v5226_v55 }
 0x167   :  { %v5565_v32 = vpop.permute.xlu1 %4223  ;;  %v778_v33 = vadd.f32 %v729_v57, %v480_v7  ;;  %v780_v13 = vadd.f32 %v731_v23, %v482_v45  ;;  %v4325_v23 = vunpack.i.l.bf16 %v4324_v52 }
 0x168   :  { %v4225_v9 = vunpack.i.l.bf16 %v5565_v32  ;;  %v4226_v54 = vunpack.i.h.bf16 %v5565_v32 }
 0x169   :  { %v1076_v48 = vadd.f32 %v1027_v27, %v778_v33  ;;  %v1078_v58 = vadd.f32 %v1029_v36, %v780_v13  ;;  %v5605_v27 = vpop.permute.xlu0 %4340  ;;  %v1032_v22 = vmul.f32 %v4325_v23, %v5230_v62  ;;  %v4585_v23 = vld [vmem:[#allocation3 + $0x36c] ss:$24 sps:$4 sm:$0xff]  }
 0x16a   :  { %v483_v31 = vmul.f32 %v4225_v9, %v5221_v34  ;;  %v484_v26 = vmul.f32 %v4226_v54, %v5221_v34 }
 0x16c   :  { %v4230_v1 = vpop.permute.xlu1 %4229 }
 0x16d   :  { %v4231_v44 = vunpack.i.l.bf16 %v4230_v1  ;;  %v4232_v14 = vunpack.i.h.bf16 %v4230_v1 }
 0x16f   :  { %v732_v46 = vmul.f32 %v4231_v44, %v5226_v55 }
 0x171   :  { %v4236_v30 = vpop.permute.xlu1 %4235  ;;  %v781_v57 = vadd.f32 %v732_v46, %v483_v31 }
 0x172   :  { %v4238_v6 = vunpack.i.h.bf16 %v4236_v30  ;;  %v4237_v3 = vunpack.i.l.bf16 %v4236_v30 }
 0x173   :  { %v1079_v13 = vadd.f32 %v1030_v10, %v781_v57  ;;  %v4574_v57 = vld [vmem:[#allocation3 + $0x330] ss:$24 sps:$4 sm:$0xff]   ;;  %v4580_v10 = vld [vmem:[#allocation3 + $0x360] ss:$24 sps:$4 sm:$0xff]  }
 0x174   :  { %v1324_v18 = vmul.f32 %v4238_v6, %v5228_v28  ;;  %v1326_v49 = vmul.f32 %v4237_v3, %v5228_v28  ;;  %v1031_v3 = vmul.f32 %v4309_v15, %v5230_v62 }
 0x175   :  { %v4241_v35 = vpop.permute.xlu1 %4240 }
 0x176   :  { %v1373_v24 = vadd.f32 %v1324_v18, %v1075_v12  ;;  %v1375_v61 = vadd.f32 %v1326_v49, %v1077_v11  ;;  %v4243_v25 = vunpack.i.h.bf16 %v4241_v35  ;;  %v4242_v0 = vunpack.i.l.bf16 %v4241_v35 }
 0x178   :  { %v1471_v50 = vadd.f32 %v1470_v51, %v1373_v24  ;;  %v1325_v63 = vmul.f32 %v4243_v25, %v5228_v28  ;;  %v1327_v19 = vmul.f32 %v4242_v0, %v5228_v28  ;;  %v1505_v53 = vadd.f32 %v5561_v20, %v1375_v61 }
 0x179   :  { %v733_v51 = vmul.f32 %v4232_v14, %v5226_v55  ;;  %v1413_v1 = vadd.f32 %v1412_v16, %v1373_v24  ;;  %v1447_v49 = vadd.f32 %v5559_v2, %v1375_v61  ;;  %v5616_v2 = vld [vmem:[%s5823_s2] ss:$0 sm:$0xff] }
 0x17a   :  { %v1374_v43 = vadd.f32 %v1325_v63, %v1076_v48  ;;  %v1376_v8 = vadd.f32 %v1327_v19, %v1078_v58  ;;  %v4313_v41 = vpop.permute.xlu1 %4312 }
 0x17b   :  { %v4315_v38 = vunpack.i.h.bf16 %v4313_v41  ;;  %v4314_v42 = vunpack.i.l.bf16 %v4313_v41  ;;  %v782_v7 = vadd.f32 %v733_v51, %v484_v26 }
 0x17c   :  { %v1472_v32 = vadd.f32 %v1471_v50, %v1374_v43  ;;  %v1506_v59 = vadd.f32 %v1505_v53, %v1376_v8  ;;  %v1414_v20 = vadd.f32 %v1413_v1, %v1374_v43  ;;  %v1448_v24 = vadd.f32 %v1447_v49, %v1376_v8  ;;  %v4594_v49 = vld [vmem:[#allocation3 + $0x3c4] ss:$24 sps:$4 sm:$0xff]  }
 0x17d   :  { %v737_v40 = vmul.f32 %v4315_v38, %v5226_v55  ;;  %v734_v17 = vmul.f32 %v4314_v42, %v5226_v55  ;;  %v1080_v44 = vadd.f32 %v1031_v3, %v782_v7  ;;  %v4591_v3 = vld [vmem:[#allocation3 + $0x39c] ss:$24 sps:$4 sm:$0xff]  }
 0x17e   :  { %v1473_v37 = vadd.f32 %v1472_v32, %v1375_v61  ;;  %v1415_v12 = vadd.f32 %v1414_v20, %v1375_v61  ;;  %v5618_v61 = vpop.permute.xlu0 %4393  ;;  %v4568_v32 = vld [vmem:[#allocation3 + $0x300] ss:$24 sps:$4 sm:$0xff]  }
 0x17f   :  { %v786_v56 = vadd.f32 %v737_v40, %v488_v21  ;;  %v4319_v30 = vpop.permute.xlu1 %4318  ;;  %v783_v36 = vadd.f32 %v734_v17, %v485_v5  ;;  %v4576_v40 = vld [vmem:[#allocation3 + $0x334] ss:$24 sps:$4 sm:$0xff]  }
 0x180   :  { %v4321_v4 = vunpack.i.h.bf16 %v4319_v30  ;;  %v4320_v45 = vunpack.i.l.bf16 %v4319_v30  ;;  %v1474_v6 = vadd.f32 %v1473_v37, %v1376_v8  ;;  %v1416_v52 = vadd.f32 %v1415_v12, %v1376_v8  ;;  %v4579_v17 = vld [vmem:[#allocation3 + $0x33c] ss:$24 sps:$4 sm:$0xff]   ;;  %v4577_v37 = vld [vmem:[#allocation3 + $0x338] ss:$24 sps:$4 sm:$0xff]  }
 0x181   :  { %v1084_v33 = vadd.f32 %v1035_v29, %v786_v56  ;;  %v1081_v9 = vadd.f32 %v1032_v22, %v783_v36  ;;  %v4582_v29 = vld [vmem:[#allocation3 + $0x364] ss:$24 sps:$4 sm:$0xff]   ;;  %v4342_v56 = vunpack.i.l.bf16 %v5605_v27 }
 0x182   :  { %v1329_v11 = vmul.f32 %v4321_v4, %v5228_v28  ;;  %v1328_v18 = vmul.f32 %v4320_v45, %v5228_v28  ;;  %v5633_v38 = vpop.permute.xlu0 %4399  ;;  %v4583_v4 = vld [vmem:[#allocation3 + $0x368] ss:$24 sps:$4 sm:$0xff]   ;;  %v4597_v22 = vld [vmem:[#allocation3 + $0x3cc] ss:$24 sps:$4 sm:$0xff]  }
 0x183   :  { %v4329_v60 = vpop.permute.xlu1 %4328  ;;  %v735_v36 = vmul.f32 %v4342_v56, %v5226_v55 }
 0x184   :  { %v1377_v35 = vadd.f32 %v1328_v18, %v1079_v13  ;;  %v4331_v25 = vunpack.i.h.bf16 %v4329_v60  ;;  %v4330_v0 = vunpack.i.l.bf16 %v4329_v60  ;;  %v1378_v21 = vadd.f32 %v1329_v11, %v1080_v44  ;;  %v4586_v13 = vld [vmem:[#allocation3 + $0x390] ss:$24 sps:$4 sm:$0xff]  }
 0x185   :  { %v4589_v18 = vld [vmem:[#allocation3 + $0x398] ss:$24 sps:$4 sm:$0xff]  }
 0x186   :  { %v1449_v14 = vadd.f32 %v1448_v24, %v1377_v35  ;;  %v1507_v48 = vadd.f32 %v1506_v59, %v1377_v35  ;;  %v1333_v50 = vmul.f32 %v4331_v25, %v5228_v28  ;;  %v1330_v63 = vmul.f32 %v4330_v0, %v5228_v28  ;;  %v4571_v59 = vld [vmem:[#allocation3 + $0x308] ss:$24 sps:$4 sm:$0xff]   ;;  %v5643_v5 = vpop.permute.xlu0 %444 }
 0x187   :  { %v1417_v58 = vadd.f32 %v1416_v52, %v1377_v35  ;;  %v5620_v19 = vadd.f32 %v1474_v6, %v1377_v35  ;;  %v4588_v6 = vld [vmem:[#allocation3 + $0x394] ss:$24 sps:$4 sm:$0xff]   ;;  %v4595_v52 = vld [vmem:[#allocation3 + $0x3c8] ss:$24 sps:$4 sm:$0xff]  }
 0x188   :  { %v1450_v15 = vadd.f32 %v1449_v14, %v1378_v21  ;;  %v1508_v54 = vadd.f32 %v1507_v48, %v1378_v21  ;;  %v1379_v16 = vadd.f32 %v1330_v63, %v1081_v9  ;;  %v5622_v53 = vadd.f32 %v1333_v50, %v1084_v33  ;;  %v5624_v47 = vpop.permute.xlu1 %4334  ;;  %v4592_v9 = vld [vmem:[#allocation3 + $0x3c0] ss:$24 sps:$4 sm:$0xff]   ;;  %v4600_v14 = vld [vmem:[#allocation3 + $0x3f4] ss:$24 sps:$4 sm:$0xff]  }
 0x189   :  { %v1425_v46 = vadd.f32 %v5616_v2, %v1417_v58  ;;  %v4336_v30 = vunpack.i.l.bf16 %v5624_v47  ;;  %v4603_v48 = vld [vmem:[#allocation3 + $0x3fc] ss:$24 sps:$4 sm:$0xff]  }
 0x18a   :  { %v1509_v43 = vadd.f32 %v1508_v54, %v1379_v16  ;;  %v1451_v8 = vadd.f32 %v1450_v15, %v1379_v16  ;;  %v5651_v45 = vpop.permute.xlu0 %4440  ;;  %v4598_v16 = vld [vmem:[#allocation3 + $0x3f0] ss:$24 sps:$4 sm:$0xff]  }
 0x18b   :  { %v1426_v42 = vmax.f32 %v1425_v46, 0.0  ;;  %v486_v33 = vmul.f32 %v4336_v30, %v5221_v34  ;;  %v4442_v11 = vunpack.i.l.bf16 %v5651_v45  ;;  %v4601_v46 = vld [vmem:[#allocation3 + $0x3f8] ss:$24 sps:$4 sm:$0xff]  }
 0x18c   :  { %v5628_v41 = vadd.f32 %v1509_v43, %v5622_v53  ;;  %v5630_v51 = vpop.permute.xlu1 %4345  ;;  %v1459_v1 = vadd.f32 %v5616_v2, %v1451_v8  ;;  %v4606_v8 = vld [vmem:[#allocation3 + $0x424] ss:$24 sps:$4 sm:$0xff]  }
 0x18d   :  { %v5639_v20 = vpack.c.bf16 %v1426_v42, %v1426_v42  ;;  %v784_v35 = vadd.f32 %v735_v36, %v486_v33  ;;  %v1033_v24 = vmul.f32 %v4442_v11, %v5230_v62  ;;  %v4347_v25 = vunpack.i.l.bf16 %v5630_v51  ;;  %v4621_v36 = vld [vmem:[#allocation3 + $0x48c] ss:$24 sps:$4 sm:$0xff]  }
 0x18e   :  { %v1460_v39 = vmax.f32 %v1459_v1, 0.0  ;;  %v4609_v1 = vld [vmem:[#allocation3 + $0x42c] ss:$24 sps:$4 sm:$0xff]  }
 0x18f   :  { %v1082_v58 = vadd.f32 %v1033_v24, %v784_v35  ;;  %v487_v15 = vmul.f32 %v4347_v25, %v5221_v34  ;;  %v4633_v35 = vld [vmem:[#allocation3 + $0x4ec] ss:$24 sps:$4 sm:$0xff]   ;;  %v4343_v24 = vunpack.i.h.bf16 %v5605_v27  ;;  %v4337_v25 = vunpack.i.h.bf16 %v5624_v47 }
 0x190   :  { %v5635_v31 = vpack.c.bf16 %v1460_v39, %v1460_v39  ;;  %v4402_v27 = vunpack.i.h.bf16 %v5633_v38 }
 0x191   :  { %v5637_v26 = vpop.permute.xlu1 %4351  ;;  %v738_v47 = vmul.f32 %v4343_v24, %v5226_v55 }
 0x192   :  { %2722 = vmatprep.mubr.bf16.mxu0 %v5635_v31  ;;  %2804 = vmatprep.mubr.bf16.mxu1 %v5635_v31  ;;  %v4353_v44 = vunpack.i.l.bf16 %v5637_v26 }
 0x193   :  { %2723 = vmatmul.mubr.bf16.vlgmr.msra.gmra.mrb[0].mxu0 %v5639_v20  ;;  %2805 = vmatmul.mubr.bf16.vlgmr.msra.gmra.mrb[0].mxu1 %v5639_v20 }
 0x194   :  { %2732 = vmatpush1.bf16.msra.mxu0 %v4568_v32  ;;  %2814 = vmatpush1.bf16.msra.mxu1 %v4571_v59  ;;  %v736_v50 = vmul.f32 %v4353_v44, %v5226_v55  ;;  %v4622_v44 = vld [vmem:[#allocation3 + $0x4b0] ss:$24 sps:$4 sm:$0xff]  }
 0x195   :  { %2733 = vmatprep.subr.bf16.mxu0 %v4576_v40  ;;  %2815 = vmatprep.subr.bf16.mxu1 %v4579_v17  ;;  %v4604_v17 = vld [vmem:[#allocation3 + $0x420] ss:$24 sps:$4 sm:$0xff]  }
 0x196   :  { %v5647_v7 = vpop.permute.xlu1 %4357  ;;  %v785_v42 = vadd.f32 %v736_v50, %v487_v15  ;;  %v4401_v15 = vunpack.i.l.bf16 %v5633_v38 }
 0x197   :  { %v4359_v0 = vunpack.i.l.bf16 %v5647_v7 }
 0x198   :  { %2734 = vmatpush1.bf16.msra.mxu0 %v4574_v57  ;;  %2816 = vmatpush1.bf16.msra.mxu1 %v4577_v37  ;;  %v4607_v57 = vld [vmem:[#allocation3 + $0x428] ss:$24 sps:$4 sm:$0xff]   ;;  %v4612_v37 = vld [vmem:[#allocation3 + $0x454] ss:$24 sps:$4 sm:$0xff]  }
 0x199   :  { %2735 = vmatprep.subr.bf16.mxu0 %v4582_v29  ;;  %2817 = vmatprep.subr.bf16.mxu1 %v4585_v23  ;;  %v1034_v54 = vmul.f32 %v4359_v0, %v5230_v62  ;;  %v4615_v29 = vld [vmem:[#allocation3 + $0x45c] ss:$24 sps:$4 sm:$0xff]   ;;  %v5685_v0 = vpop.permute.xlu0 %4445 }
 0x19a   :  { %v4448_v38 = vunpack.i.h.bf16 %v5685_v0 }
 0x19b   :  { %v5653_v12 = vpop.permute.xlu1 %4363  ;;  %v1083_v59 = vadd.f32 %v1034_v54, %v785_v42  ;;  %v489_v54 = vmul.f32 %v4337_v25, %v5221_v34 }
 0x19c   :  { %2736 = vmatpush1.bf16.msra.mxu0 %v4580_v10  ;;  %2818 = vmatpush1.bf16.msra.mxu1 %v4583_v4  ;;  %v4365_v60 = vunpack.i.l.bf16 %v5653_v12  ;;  %v4610_v4 = vld [vmem:[#allocation3 + $0x450] ss:$24 sps:$4 sm:$0xff]  }
 0x19d   :  { %2737 = vmatprep.subr.bf16.mxu0 %v4588_v6  ;;  %2819 = vmatprep.subr.bf16.mxu1 %v4591_v3  ;;  %v4613_v6 = vld [vmem:[#allocation3 + $0x458] ss:$24 sps:$4 sm:$0xff]   ;;  %v4618_v3 = vld [vmem:[#allocation3 + $0x484] ss:$24 sps:$4 sm:$0xff]  }
 0x19e   :  { %v1331_v63 = vmul.f32 %v4365_v60, %v5228_v28  ;;  %v4625_v60 = vld [vmem:[#allocation3 + $0x4b8] ss:$24 sps:$4 sm:$0xff]  }
 0x1a0   :  { %v5663_v21 = vpop.permute.xlu1 %4369  ;;  %2738 = vmatpush1.bf16.msra.mxu0 %v4586_v13  ;;  %2820 = vmatpush1.bf16.msra.mxu1 %v4589_v18  ;;  %v1380_v39 = vadd.f32 %v1331_v63, %v1082_v58  ;;  %v4619_v13 = vld [vmem:[#allocation3 + $0x488] ss:$24 sps:$4 sm:$0xff]   ;;  %v4624_v18 = vld [vmem:[#allocation3 + $0x4b4] ss:$24 sps:$4 sm:$0xff]  }
 0x1a1   :  { %2739 = vmatprep.subr.bf16.mxu0 %v4594_v49  ;;  %2821 = vmatprep.subr.bf16.mxu1 %v4597_v22  ;;  %v4627_v49 = vld [vmem:[#allocation3 + $0x4bc] ss:$24 sps:$4 sm:$0xff]  }
 0x1a2   :  { %v1476_v23 = vadd.f32 %v5620_v19, %v1380_v39  ;;  %v4616_v19 = vld [vmem:[#allocation3 + $0x480] ss:$24 sps:$4 sm:$0xff]   ;;  %v4636_v63 = vld [vmem:[#allocation3 + $0x514] ss:$24 sps:$4 sm:$0xff]  }
 0x1a3   :  { %v4639_v58 = vld [vmem:[#allocation3 + $0x51c] ss:$24 sps:$4 sm:$0xff]  }
 0x1a4   :  { %2740 = vmatpush1.bf16.msra.mxu0 %v4592_v9  ;;  %2822 = vmatpush1.bf16.msra.mxu1 %v4595_v52  ;;  %v4628_v9 = vld [vmem:[#allocation3 + $0x4e0] ss:$24 sps:$4 sm:$0xff]  }
 0x1a5   :  { %v5669_v43 = vpop.permute.xlu1 %4375  ;;  %2741 = vmatprep.subr.bf16.mxu0 %v4600_v14  ;;  %2823 = vmatprep.subr.bf16.mxu1 %v4603_v48  ;;  %v4631_v52 = vld [vmem:[#allocation3 + $0x4e8] ss:$24 sps:$4 sm:$0xff]   ;;  %v4396_v14 = vunpack.i.h.bf16 %v5618_v61  ;;  %v4395_v48 = vunpack.i.l.bf16 %v5618_v61 }
 0x1a6   :  { %v4377_v32 = vunpack.i.l.bf16 %v5669_v43  ;;  %v4634_v61 = vld [vmem:[#allocation3 + $0x510] ss:$24 sps:$4 sm:$0xff]  }
 0x1a7   :  { %v5700_v42 = vmul.f32 %v4396_v14, %v5228_v28  ;;  %v5703_v39 = vmul.f32 %v4395_v48, %v5228_v28 }
 0x1a8   :  { %v1332_v40 = vmul.f32 %v4377_v32, %v5228_v28  ;;  %2742 = vmatpush1.bf16.msra.mxu0 %v4598_v16  ;;  %2824 = vmatpush1.bf16.msra.mxu1 %v4601_v46  ;;  %v4443_v16 = vunpack.i.h.bf16 %v5651_v45  ;;  %v4354_v46 = vunpack.i.h.bf16 %v5637_v26  ;;  %v4642_v32 = vld [vmem:[#allocation3 + $0x544] ss:$24 sps:$4 sm:$0xff]   ;;  %v5707_v26 = vmul.f32 %v4402_v27, %v5221_v34  ;;  %v4646_v27 = vld [vmem:[#allocation3 + $0x570] ss:$24 sps:$4 sm:$0xff]  }
 0x1a9   :  { %2743 = vmatprep.subr.bf16.mxu0 %v4606_v8  ;;  %2825 = vmatprep.subr.bf16.mxu1 %v4609_v1  ;;  %v5697_v8 = vpop.permute.xlu0 %4450  ;;  %v4637_v1 = vld [vmem:[#allocation3 + $0x518] ss:$24 sps:$4 sm:$0xff]   ;;  %v4645_v45 = vld [vmem:[#allocation3 + $0x54c] ss:$24 sps:$4 sm:$0xff]  }
 0x1aa   :  { %v1381_v56 = vadd.f32 %v1332_v40, %v1083_v59  ;;  %v5674_v30 = vpop.permute.xlu1 %4381  ;;  %v4348_v59 = vunpack.i.h.bf16 %v5630_v51  ;;  %v4360_v40 = vunpack.i.h.bf16 %v5647_v7  ;;  %v4378_v51 = vunpack.i.h.bf16 %v5669_v43 }
 0x1ac   :  { %v1477_v10 = vadd.f32 %v1476_v23, %v1381_v56  ;;  %2744 = vmatpush1.bf16.msra.mxu0 %v4604_v17  ;;  %2826 = vmatpush1.bf16.msra.mxu1 %v4607_v57  ;;  %v4366_v17 = vunpack.i.h.bf16 %v5653_v12  ;;  %v1036_v23 = vmul.f32 %v4443_v16, %v5230_v62  ;;  %v4640_v12 = vld [vmem:[#allocation3 + $0x540] ss:$24 sps:$4 sm:$0xff]   ;;  %v490_v43 = vmul.f32 %v4348_v59, %v5221_v34 }
 0x1ad   :  { %2745 = vmatprep.subr.bf16.mxu0 %v4612_v37  ;;  %2827 = vmatprep.subr.bf16.mxu1 %v4615_v29  ;;  %v491_v37 = vmul.f32 %v4401_v15, %v5221_v34  ;;  %v787_v29 = vadd.f32 %v738_v47, %v489_v54  ;;  %v4456_v7 = vpop.permute.xlu0 %4455  ;;  %v4649_v47 = vld [vmem:[#allocation3 + $0x578] ss:$24 sps:$4 sm:$0xff]  }
 0x1ae   :  { %v5677_v33 = vadd.f32 %v1477_v10, %v5622_v53  ;;  %v4630_v53 = vld [vmem:[#allocation3 + $0x4e4] ss:$24 sps:$4 sm:$0xff]   ;;  %v739_v10 = vmul.f32 %v4354_v46, %v5226_v55 }
 0x1af   :  { %v5679_v11 = vpop.permute.xlu1 %4387  ;;  %v1085_v24 = vadd.f32 %v1036_v23, %v787_v29  ;;  %v4654_v46 = vld [vmem:[#allocation3 + $0x5a4] ss:$24 sps:$4 sm:$0xff]  }
 0x1b0   :  { %2746 = vmatpush1.bf16.msra.mxu0 %v4610_v4  ;;  %2828 = vmatpush1.bf16.msra.mxu1 %v4613_v6  ;;  %v4390_v56 = vunpack.i.h.bf16 %v5679_v11  ;;  %v4371_v4 = vunpack.i.l.bf16 %v5663_v21  ;;  %v4447_v6 = vunpack.i.l.bf16 %v5685_v0  ;;  %v788_v14 = vadd.f32 %v739_v10, %v490_v43 }
 0x1b1   :  { %2747 = vmatprep.subr.bf16.mxu0 %v4618_v3  ;;  %2829 = vmatprep.subr.bf16.mxu1 %v4621_v36  ;;  %v4643_v3 = vld [vmem:[#allocation3 + $0x548] ss:$24 sps:$4 sm:$0xff]   ;;  %v5722_v36 = vmul.f32 %v4448_v38, %v5230_v62 }
 0x1b2   :  { %v742_v25 = vmul.f32 %v4390_v56, %v5226_v55  ;;  %v740_v48 = vmul.f32 %v4371_v4, %v5226_v55  ;;  %v4383_v56 = vunpack.i.l.bf16 %v5674_v30  ;;  %v5752_v4 = vpop.permute.xlu0 %4460 }
 0x1b4   :  { %v5681_v22 = vpop.permute.xlu1 %4405  ;;  %2748 = vmatpush1.bf16.msra.mxu0 %v4616_v19  ;;  %2830 = vmatpush1.bf16.msra.mxu1 %v4619_v13  ;;  %v4384_v19 = vunpack.i.h.bf16 %v5674_v30  ;;  %v4453_v13 = vunpack.i.h.bf16 %v5697_v8  ;;  %v789_v29 = vadd.f32 %v740_v48, %v491_v37  ;;  %v4660_v30 = vld [vmem:[#allocation3 + $0x5d4] ss:$24 sps:$4 sm:$0xff]  }
 0x1b5   :  { %2749 = vmatprep.subr.bf16.mxu0 %v4624_v18  ;;  %2831 = vmatprep.subr.bf16.mxu1 %v4627_v49  ;;  %v4452_v18 = vunpack.i.l.bf16 %v5697_v8  ;;  %v4648_v49 = vld [vmem:[#allocation3 + $0x574] ss:$24 sps:$4 sm:$0xff]   ;;  %v4408_v16 = vunpack.i.h.bf16 %v5681_v22 }
 0x1b6   :  { %v493_v15 = vmul.f32 %v4384_v19, %v5221_v34  ;;  %v1040_v54 = vmul.f32 %v4453_v13, %v5230_v62  ;;  %v4657_v8 = vld [vmem:[#allocation3 + $0x5ac] ss:$24 sps:$4 sm:$0xff]   ;;  %v4663_v19 = vld [vmem:[#allocation3 + $0x5dc] ss:$24 sps:$4 sm:$0xff]  }
 0x1b7   :  { %v5744_v59 = vmul.f32 %v4452_v18, %v5230_v62 }
 0x1b8   :  { %2750 = vmatpush1.bf16.msra.mxu0 %v4622_v44  ;;  %2832 = vmatpush1.bf16.msra.mxu1 %v4625_v60  ;;  %v4651_v44 = vld [vmem:[#allocation3 + $0x57c] ss:$24 sps:$4 sm:$0xff]   ;;  %v1037_v60 = vmul.f32 %v4360_v40, %v5230_v62 }
 0x1b9   :  { %v5689_v50 = vpop.permute.xlu1 %4411  ;;  %2751 = vmatprep.subr.bf16.mxu0 %v4630_v53  ;;  %2833 = vmatprep.subr.bf16.mxu1 %v4633_v35  ;;  %v1334_v53 = vmul.f32 %v4366_v17, %v5228_v28  ;;  %v4372_v35 = vunpack.i.h.bf16 %v5663_v21  ;;  %v1038_v21 = vmul.f32 %v4447_v6, %v5230_v62 }
 0x1ba   :  { %v4414_v0 = vunpack.i.h.bf16 %v5689_v50 }
 0x1bb   :  { %v741_v38 = vmul.f32 %v4372_v35, %v5226_v55  ;;  %v1087_v35 = vadd.f32 %v1038_v21, %v789_v29 }
 0x1bc   :  { %2752 = vmatpush1.bf16.msra.mxu0 %v4628_v9  ;;  %2834 = vmatpush1.bf16.msra.mxu1 %v4631_v52  ;;  %v4458_v9 = vunpack.i.h.bf16 %v4456_v7  ;;  %v743_v40 = vmul.f32 %v4414_v0, %v5226_v55 }
 0x1bd   :  { %2753 = vmatprep.subr.bf16.mxu0 %v4636_v63  ;;  %2835 = vmatprep.subr.bf16.mxu1 %v4639_v58  ;;  %v1335_v63 = vmul.f32 %v4378_v51, %v5228_v28  ;;  %v4457_v58 = vunpack.i.l.bf16 %v4456_v7  ;;  %v4655_v51 = vld [vmem:[#allocation3 + $0x5a8] ss:$24 sps:$4 sm:$0xff]   ;;  %v494_v7 = vmul.f32 %v4408_v16, %v5221_v34  ;;  %v790_v18 = vadd.f32 %v741_v38, %v5707_v26  ;;  %v4661_v26 = vld [vmem:[#allocation3 + $0x5d8] ss:$24 sps:$4 sm:$0xff]  }
 0x1be   :  { %v5712_v57 = vpop.permute.xlu1 %4417  ;;  %v1041_v17 = vmul.f32 %v4458_v9, %v5230_v62 }
 0x1bf   :  { %v5750_v10 = vmul.f32 %v4457_v58, %v5230_v62 }
 0x1c0   :  { %2754 = vmatpush1.bf16.msra.mxu0 %v4634_v61  ;;  %2836 = vmatpush1.bf16.msra.mxu1 %v4637_v1  ;;  %v1086_v61 = vadd.f32 %v1037_v60, %v788_v14  ;;  %v1383_v1 = vadd.f32 %v1334_v53, %v1085_v24  ;;  %v4407_v60 = vunpack.i.l.bf16 %v5681_v22  ;;  %v792_v53 = vadd.f32 %v743_v40, %v494_v7  ;;  %v4666_v22 = vld [vmem:[#allocation3 + $0x14] ss:$24 sps:$4 sm:$0xff]  }
 0x1c1   :  { %2755 = vmatprep.subr.bf16.mxu0 %v4642_v32  ;;  %2837 = vmatprep.subr.bf16.mxu1 %v4645_v45  ;;  %v4389_v32 = vunpack.i.l.bf16 %v5679_v11  ;;  %v791_v45 = vadd.f32 %v742_v25, %v493_v15  ;;  %v4652_v11 = vld [vmem:[#allocation3 + $0x5a0] ss:$24 sps:$4 sm:$0xff]   ;;  %v495_v25 = vmul.f32 %v4383_v56, %v5221_v34 }
 0x1c2   :  { %v1384_v23 = vadd.f32 %v1335_v63, %v1086_v61  ;;  %v1511_v13 = vadd.f32 %v5628_v41, %v1383_v1  ;;  %v4658_v41 = vld [vmem:[#allocation3 + $0x5d0] ss:$24 sps:$4 sm:$0xff]   ;;  %v496_v15 = vmul.f32 %v4407_v60, %v5221_v34  ;;  %v1385_v61 = vadd.f32 %v5703_v39, %v1087_v35 }
 0x1c3   :  { %v5733_v52 = vpop.permute.xlu1 %4423  ;;  %v1089_v43 = vadd.f32 %v1040_v54, %v791_v45  ;;  %v1090_v54 = vadd.f32 %v1041_v17, %v792_v53 }
 0x1c4   :  { %2756 = vmatpush1.bf16.msra.mxu0 %v4640_v12  ;;  %2838 = vmatpush1.bf16.msra.mxu1 %v4643_v3  ;;  %v4413_v12 = vunpack.i.l.bf16 %v5689_v50  ;;  %v4462_v3 = vunpack.i.l.bf16 %v5752_v4  ;;  %v1512_v24 = vadd.f32 %v1511_v13, %v1384_v23  ;;  %v4425_v0 = vunpack.i.l.bf16 %v5733_v52 }
 0x1c5   :  { %2757 = vmatprep.subr.bf16.mxu0 %v4648_v49  ;;  %2839 = vmatprep.subr.bf16.mxu1 %v4651_v44  ;;  %v1479_v49 = vadd.f32 %v5677_v33, %v1383_v1  ;;  %v744_v44 = vmul.f32 %v4389_v32, %v5226_v55  ;;  %v4426_v21 = vunpack.i.h.bf16 %v5733_v52  ;;  %v4420_v1 = vunpack.i.h.bf16 %v5712_v57 }
 0x1c6   :  { %v745_v33 = vmul.f32 %v4413_v12, %v5226_v55  ;;  %v746_v38 = vmul.f32 %v4425_v0, %v5226_v55  ;;  %v1513_v17 = vadd.f32 %v1512_v24, %v1385_v61  ;;  %v1044_v7 = vmul.f32 %v4462_v3, %v5230_v62  ;;  %v4762_v61 = vld [vmem:[#allocation6 + $0x48] sm:$0xff]  }
 0x1c7   :  { %v1480_v58 = vadd.f32 %v1479_v49, %v1384_v23  ;;  %v747_v39 = vmul.f32 %v4426_v21, %v5226_v55 }
 0x1c8   :  { %v4430_v6 = vpop.permute.xlu1 %4429  ;;  %2758 = vmatpush1.bf16.msra.mxu0 %v4646_v27  ;;  %2840 = vmatpush1.bf16.msra.mxu1 %v4649_v47  ;;  %v793_v27 = vadd.f32 %v744_v44, %v495_v25  ;;  %v4419_v47 = vunpack.i.l.bf16 %v5712_v57  ;;  %v794_v32 = vadd.f32 %v745_v33, %v496_v15  ;;  %v992_v44 = vpop.permute.xlu0 %991 }
 0x1c9   :  { %v4432_v37 = vunpack.i.h.bf16 %v4430_v6  ;;  %2759 = vmatprep.subr.bf16.mxu0 %v4654_v46  ;;  %2841 = vmatprep.subr.bf16.mxu1 %v4657_v8  ;;  %v4431_v14 = vunpack.i.l.bf16 %v4430_v6  ;;  %v1088_v8 = vadd.f32 %v5722_v36, %v790_v18  ;;  %v4463_v36 = vunpack.i.h.bf16 %v5752_v4 }
 0x1ca   :  { %v497_v23 = vmul.f32 %v4419_v47, %v5221_v34  ;;  %v1091_v57 = vadd.f32 %v5744_v59, %v793_v27  ;;  %v499_v4 = vmul.f32 %v5221_v34, %v5643_v5  ;;  %v1046_v24 = vmul.f32 %v5230_v62, %v992_v44  ;;  %v4696_v44 = vld [vmem:[#allocation3 + $0x1f4] ss:$24 sps:$4 sm:$0xff]  }
 0x1cb   :  { %v1338_v50 = vmul.f32 %v4432_v37, %v5228_v28  ;;  %v1340_v45 = vmul.f32 %v4431_v14, %v5228_v28  ;;  %v1092_v37 = vadd.f32 %v5750_v10, %v794_v32  ;;  %v1045_v59 = vmul.f32 %v4463_v36, %v5230_v62  ;;  %v4764_v32 = vld [vmem:[#allocation6 + $0x50] sm:$0xff]   ;;  %v4768_v36 = vld [vmem:[#allocation6 + $0x60] sm:$0xff]  }
 0x1cc   :  { %v4435_v9 = vpop.permute.xlu1 %4434  ;;  %2760 = vmatpush1.bf16.msra.mxu0 %v4652_v11  ;;  %2842 = vmatpush1.bf16.msra.mxu1 %v4655_v51  ;;  %v1386_v11 = vadd.f32 %v5700_v42, %v1088_v8  ;;  %v498_v51 = vmul.f32 %v4420_v1, %v5221_v34  ;;  %v795_v12 = vadd.f32 %v746_v38, %v497_v23  ;;  %v4761_v8 = vld [vmem:[#allocation6] sm:$0xff]   ;;  %v4672_v1 = vld [vmem:[#allocation3 + $0x74] ss:$24 sps:$4 sm:$0xff]   ;;  %v4767_v23 = vld [vmem:[#allocation6 + $0x18] sm:$0xff]  }
 0x1cd   :  { %v1387_v48 = vadd.f32 %v1338_v50, %v1089_v43  ;;  %v4437_v63 = vunpack.i.h.bf16 %v4435_v9  ;;  %2761 = vmatprep.subr.bf16.mxu0 %v4660_v30  ;;  %2843 = vmatprep.subr.bf16.mxu1 %v4663_v19  ;;  %v4436_v46 = vunpack.i.l.bf16 %v4435_v9  ;;  %v1389_v30 = vadd.f32 %v1340_v45, %v1091_v57  ;;  %v4763_v38 = vld [vmem:[#allocation6 + $0x8] sm:$0xff]   ;;  %v4681_v57 = vld [vmem:[#allocation3 + $0x104] ss:$24 sps:$4 sm:$0xff]  }
 0x1ce   :  { %v796_v13 = vadd.f32 %v747_v39, %v498_v51  ;;  %v1514_v18 = vadd.f32 %v1513_v17, %v1386_v11  ;;  %v1093_v3 = vadd.f32 %v1044_v7, %v795_v12  ;;  %v4670_v45 = vld [vmem:[#allocation3 + $0x70] ss:$24 sps:$4 sm:$0xff]   ;;  %v4673_v17 = vld [vmem:[#allocation3 + $0xa0] ss:$24 sps:$4 sm:$0xff]   ;;  %v4684_v51 = vld [vmem:[#allocation3 + $0x134] ss:$24 sps:$4 sm:$0xff]  }
 0x1cf   :  { %v1339_v16 = vmul.f32 %v4437_v63, %v5228_v28  ;;  %v1481_v52 = vadd.f32 %v1480_v58, %v1387_v48  ;;  %v1341_v56 = vmul.f32 %v4436_v46, %v5228_v28  ;;  %v4669_v46 = vld [vmem:[#allocation3 + $0x44] ss:$24 sps:$4 sm:$0xff]   ;;  %v4676_v39 = vld [vmem:[#allocation3 + $0xd0] ss:$24 sps:$4 sm:$0xff]   ;;  %v4679_v11 = vld [vmem:[#allocation3 + $0x100] ss:$24 sps:$4 sm:$0xff]  }
 0x1d0   :  { %2762 = vmatpush1.bf16.msra.mxu0 %v4658_v41  ;;  %2844 = vmatpush1.bf16.msra.mxu1 %v4661_v26  ;;  %v1515_v50 = vadd.f32 %v1514_v18, %v1389_v30  ;;  %v1094_v34 = vadd.f32 %v1045_v59, %v796_v13  ;;  %v4771_v7 = vld [vmem:[#allocation6 + $0x28] sm:$0xff]   ;;  %v4772_v12 = vld [vmem:[#allocation6 + $0x70] sm:$0xff]   ;;  %v4693_v18 = vld [vmem:[#allocation3 + $0x1c4] ss:$24 sps:$4 sm:$0xff]  }
 0x1d1   :  { %v1388_v40 = vadd.f32 %v1339_v16, %v1090_v54  ;;  %v694_v29 = vpop.permute.xlu1 %693  ;;  %2854 = vmatprep.subr.bf16.mxu0 %v4666_v22  ;;  %v1390_v42 = vadd.f32 %v1341_v56, %v1092_v37  ;;  %v4664_v54 = vld [vmem:[#allocation3 + $0x10] ss:$24 sps:$4 sm:$0xff]   ;;  %v4769_v56 = vld [vmem:[#allocation6 + $0x20] sm:$0xff]   ;;  %v4690_v59 = vld [vmem:[#allocation3 + $0x194] ss:$24 sps:$4 sm:$0xff]  }
 0x1d2   :  { %v748_v19 = vmul.f32 %v5226_v55, %v694_v29  ;;  %v4766_v29 = vld [vmem:[#allocation6 + $0x58] sm:$0xff]   ;;  %v4682_v37 = vld [vmem:[#allocation3 + $0x130] ss:$24 sps:$4 sm:$0xff]  }
 0x1d3   :  { %v1482_v6 = vadd.f32 %v1481_v52, %v1388_v40  ;;  %v1516_v0 = vadd.f32 %v1515_v50, %v1390_v42  ;;  %v4675_v52 = vld [vmem:[#allocation3 + $0xa4] ss:$24 sps:$4 sm:$0xff]   ;;  %v4765_v40 = vld [vmem:[#allocation6 + $0x10] sm:$0xff]  }
 0x1d4   :  { %v797_v35 = vadd.f32 %v748_v19, %v499_v4  ;;  %v4773_v19 = vld [vmem:[#allocation6 + $0x30] sm:$0xff]   ;;  %v4685_v4 = vld [vmem:[#allocation3 + $0x160] ss:$24 sps:$4 sm:$0xff]   ;;  %v4705_v50 = vld [vmem:[#allocation3 + $0x284] ss:$24 sps:$4 sm:$0xff]  }
 0x1d5   :  { %v1483_v43 = vadd.f32 %v1482_v6, %v1389_v30  ;;  %v4770_v6 = vld [vmem:[#allocation6 + $0x68] sm:$0xff]   ;;  %v4687_v30 = vld [vmem:[#allocation3 + $0x164] ss:$24 sps:$4 sm:$0xff]  }
 0x1d6   :  { %v4468_v49 = vpop.permute.xlu1 %4467  ;;  %v1095_v48 = vadd.f32 %v1046_v24, %v797_v35  ;;  %v4688_v13 = vld [vmem:[#allocation3 + $0x190] ss:$24 sps:$4 sm:$0xff]   ;;  %v4703_v35 = vld [vmem:[#allocation3 + $0x280] ss:$24 sps:$4 sm:$0xff]   ;;  %v4711_v24 = vld [vmem:[#allocation3 + $0x2e4] ss:$24 sps:$4 sm:$0xff]  }
 0x1d7   :  { %v4470_v60 = vunpack.i.h.bf16 %v4468_v49  ;;  %v4469_v53 = vunpack.i.l.bf16 %v4468_v49  ;;  %v1484_v25 = vadd.f32 %v1483_v43, %v1390_v42  ;;  %v4691_v49 = vld [vmem:[#allocation3 + $0x1c0] ss:$24 sps:$4 sm:$0xff]   ;;  %v4694_v42 = vld [vmem:[#allocation3 + $0x1f0] ss:$24 sps:$4 sm:$0xff]   ;;  %v4699_v43 = vld [vmem:[#allocation3 + $0x224] ss:$24 sps:$4 sm:$0xff]  }
 0x1d9   :  { %v1343_v10 = vmul.f32 %v4470_v60, %v5228_v28  ;;  %v1342_v55 = vmul.f32 %v4469_v53, %v5228_v28  ;;  %v4697_v60 = vld [vmem:[#allocation3 + $0x220] ss:$24 sps:$4 sm:$0xff]   ;;  %v4702_v53 = vld [vmem:[#allocation3 + $0x254] ss:$24 sps:$4 sm:$0xff]  }
 0x1da   :  { %v1290_v5 = vpop.permute.xlu1 %1289 }
 0x1db   :  { %v1391_v9 = vadd.f32 %v1342_v55, %v1093_v3  ;;  %v1344_v41 = vmul.f32 %v5228_v28, %v1290_v5  ;;  %v1392_v26 = vadd.f32 %v1343_v10, %v1094_v34  ;;  %v4760_v28 = vld [vmem:[#allocation6 + $0x40] sm:$0xff]   ;;  %v4700_v3 = vld [vmem:[#allocation3 + $0x250] ss:$24 sps:$4 sm:$0xff]   ;;  %v4708_v10 = vld [vmem:[#allocation3 + $0x2b4] ss:$24 sps:$4 sm:$0xff]  }
 0x1dc   :  { %3840 = vmatprep.subr.bf16.mxu1 %v4760_v28  ;;  %v4706_v55 = vld [vmem:[#allocation3 + $0x2b0] ss:$24 sps:$4 sm:$0xff]   ;;  %v4709_v34 = vld [vmem:[#allocation3 + $0x2e0] ss:$24 sps:$4 sm:$0xff]   ;;  %v4714_v5 = vld [vmem:[#allocation3 + $0x314] ss:$24 sps:$4 sm:$0xff]  }
 0x1dd   :  { %v1485_v33 = vadd.f32 %v1484_v25, %v1391_v9  ;;  %v1517_v14 = vadd.f32 %v1516_v0, %v1391_v9  ;;  %v1393_v63 = vadd.f32 %v1344_v41, %v1095_v48  ;;  %v4712_v25 = vld [vmem:[#allocation3 + $0x310] ss:$24 sps:$4 sm:$0xff]   ;;  %v4717_v0 = vld [vmem:[#allocation3 + $0x344] ss:$24 sps:$4 sm:$0xff]   ;;  %v4715_v9 = vld [vmem:[#allocation3 + $0x340] ss:$24 sps:$4 sm:$0xff]  }
 0x1de   :  { %v4720_v41 = vld [vmem:[#allocation3 + $0x374] ss:$24 sps:$4 sm:$0xff]   ;;  %v4736_v28 = vld [vmem:[#allocation3 + $0x490] ss:$24 sps:$4 sm:$0xff]  }
 0x1df   :  { %v1518_v22 = vadd.f32 %v1517_v14, %v1392_v26  ;;  %v1493_v58 = vadd.f32 %v5616_v2, %v1485_v33  ;;  %v4718_v26 = vld [vmem:[#allocation3 + $0x370] ss:$24 sps:$4 sm:$0xff]   ;;  %v4723_v33 = vld [vmem:[#allocation3 + $0x3a4] ss:$24 sps:$4 sm:$0xff]   ;;  %v4721_v14 = vld [vmem:[#allocation3 + $0x3a0] ss:$24 sps:$4 sm:$0xff]  }
 0x1e0   :  { %v4726_v48 = vld [vmem:[#allocation3 + $0x3d4] ss:$24 sps:$4 sm:$0xff]  }
 0x1e1   :  { %v1519_v27 = vadd.f32 %v1518_v22, %v1393_v63  ;;  %v1494_v21 = vmax.f32 %v1493_v58, 0.0  ;;  %v4724_v63 = vld [vmem:[#allocation3 + $0x3d0] ss:$24 sps:$4 sm:$0xff]   ;;  %v4729_v22 = vld [vmem:[#allocation3 + $0x404] ss:$24 sps:$4 sm:$0xff]  }
 0x1e2   :  { %v4732_v58 = vld [vmem:[#allocation3 + $0x434] ss:$24 sps:$4 sm:$0xff]  }
 0x1e3   :  { %v1527_v47 = vadd.f32 %v5616_v2, %v1519_v27  ;;  %v5796_v16 = vpack.c.bf16 %v1494_v21, %v1494_v21  ;;  %v4667_v2 = vld [vmem:[#allocation3 + $0x40] ss:$24 sps:$4 sm:$0xff]   ;;  %v4730_v27 = vld [vmem:[#allocation3 + $0x430] ss:$24 sps:$4 sm:$0xff]   ;;  %v4735_v21 = vld [vmem:[#allocation3 + $0x464] ss:$24 sps:$4 sm:$0xff]  }
 0x1e5   :  { %v1528_v62 = vmax.f32 %v1527_v47, 0.0  ;;  %v4774_v47 = vld [vmem:[#allocation6 + $0x78] sm:$0xff]  }
 0x1e7   :  { %v5794_v15 = vpack.c.bf16 %v1528_v62, %v1528_v62  ;;  %v4775_v62 = vld [vmem:[#allocation6 + $0x38] sm:$0xff]  }
 0x1e9   :  { %2763 = vmatprep.mubr.bf16.mxu0 %v5794_v15  ;;  %2845 = vmatprep.mubr.bf16.mxu1 %v5794_v15 }
 0x1ea   :  { %2764 = vmatmul.mubr.bf16.vlgmr.msra.gmra.mrb[0].mxu0 %v5796_v16  ;;  %2846 = vmatmul.mubr.bf16.vlgmr.msra.gmra.mrb[0].mxu1 %v5796_v16 }
 0x1eb   :  { %2855 = vmatpush1.bf16.msra.mxu0 %v4664_v54  ;;  %2886 = vmatprep.mubr.bf16.mxu0 %v5635_v31  ;;  %v4678_v31 = vld [vmem:[#allocation3 + $0xd4] ss:$24 sps:$4 sm:$0xff]   ;;  %v4776_v54 = vld [vmem:[#allocation6 + $0xc0] sm:$0xff]  }
 0x1ec   :  { %2856 = vmatprep.subr.bf16.mxu0 %v4669_v46  ;;  %3841 = vmatpush3.bf16.msra.mxu1 %v4761_v8  ;;  %v4738_v46 = vld [vmem:[#allocation3 + $0x494] ss:$24 sps:$4 sm:$0xff]   ;;  %v4741_v8 = vld [vmem:[#allocation3 + $0x4c4] ss:$24 sps:$4 sm:$0xff]  }
 0x1ed   :  { %3842 = vmatprep.subr.bf16.mxu1 %v4762_v61  ;;  %v4739_v61 = vld [vmem:[#allocation3 + $0x4c0] ss:$24 sps:$4 sm:$0xff]  }
 0x1ef   :  { %2857 = vmatpush1.bf16.msra.mxu0 %v4667_v2  ;;  %v4744_v2 = vld [vmem:[#allocation3 + $0x4f4] ss:$24 sps:$4 sm:$0xff]  }
 0x1f0   :  { %2858 = vmatprep.subr.bf16.mxu0 %v4672_v1  ;;  %3843 = vmatpush3.bf16.msra.mxu1 %v4763_v38  ;;  %v4742_v1 = vld [vmem:[#allocation3 + $0x4f0] ss:$24 sps:$4 sm:$0xff]   ;;  %v4747_v38 = vld [vmem:[#allocation3 + $0x524] ss:$24 sps:$4 sm:$0xff]  }
 0x1f1   :  { %3844 = vmatprep.subr.bf16.mxu1 %v4764_v32  ;;  %v4745_v32 = vld [vmem:[#allocation3 + $0x520] ss:$24 sps:$4 sm:$0xff]  }
 0x1f3   :  { %2859 = vmatpush1.bf16.msra.mxu0 %v4670_v45  ;;  %v4750_v45 = vld [vmem:[#allocation3 + $0x554] ss:$24 sps:$4 sm:$0xff]  }
 0x1f4   :  { %2860 = vmatprep.subr.bf16.mxu0 %v4675_v52  ;;  %3845 = vmatpush3.bf16.msra.mxu1 %v4765_v40  ;;  %v4748_v52 = vld [vmem:[#allocation3 + $0x550] ss:$24 sps:$4 sm:$0xff]   ;;  %v4753_v40 = vld [vmem:[#allocation3 + $0x584] ss:$24 sps:$4 sm:$0xff]  }
 0x1f5   :  { %3846 = vmatprep.subr.bf16.mxu1 %v4766_v29  ;;  %v4751_v29 = vld [vmem:[#allocation3 + $0x580] ss:$24 sps:$4 sm:$0xff]  }
 0x1f7   :  { %2861 = vmatpush1.bf16.msra.mxu0 %v4673_v17  ;;  %v4756_v17 = vld [vmem:[#allocation3 + $0x5b4] ss:$24 sps:$4 sm:$0xff]  }
 0x1f8   :  { %2862 = vmatprep.subr.bf16.mxu0 %v4678_v31  ;;  %3847 = vmatpush3.bf16.msra.mxu1 %v4767_v23  ;;  %v4754_v31 = vld [vmem:[#allocation3 + $0x5b0] ss:$24 sps:$4 sm:$0xff]   ;;  %v4759_v23 = vld [vmem:[#allocation3 + $0x5e4] ss:$24 sps:$4 sm:$0xff]  }
 0x1f9   :  { %3848 = vmatprep.subr.bf16.mxu1 %v4768_v36  ;;  %v4757_v36 = vld [vmem:[#allocation3 + $0x5e0] ss:$24 sps:$4 sm:$0xff]  }
 0x1fb   :  { %2863 = vmatpush1.bf16.msra.mxu0 %v4676_v39 }
 0x1fc   :  { %2864 = vmatprep.subr.bf16.mxu0 %v4681_v57  ;;  %3849 = vmatpush3.bf16.msra.mxu1 %v4769_v56 }
 0x1fd   :  { %3850 = vmatprep.subr.bf16.mxu1 %v4770_v6 }
 0x1ff   :  { %2865 = vmatpush1.bf16.msra.mxu0 %v4679_v11 }
 0x200   :  { %2866 = vmatprep.subr.bf16.mxu0 %v4684_v51  ;;  %3851 = vmatpush3.bf16.msra.mxu1 %v4771_v7 }
 0x201   :  { %3852 = vmatprep.subr.bf16.mxu1 %v4772_v12 }
 0x203   :  { %2867 = vmatpush1.bf16.msra.mxu0 %v4682_v37 }
 0x204   :  { %2868 = vmatprep.subr.bf16.mxu0 %v4687_v30  ;;  %3853 = vmatpush3.bf16.msra.mxu1 %v4773_v19 }
 0x205   :  { %3854 = vmatprep.subr.bf16.mxu1 %v4774_v47  ;;  %v4804_v47 = vld [vmem:[#allocation6 + $0x170] sm:$0xff]  }
 0x207   :  { %2869 = vmatpush1.bf16.msra.mxu0 %v4685_v4 }
 0x208   :  { %2870 = vmatprep.subr.bf16.mxu0 %v4690_v59  ;;  %3855 = vmatpush3.bf16.msra.mxu1 %v4775_v62  ;;  %v4777_v59 = vld [vmem:[#allocation6 + $0x80] sm:$0xff]   ;;  %v4806_v62 = vld [vmem:[#allocation6 + $0x178] sm:$0xff]  }
 0x209   :  { %3862 = vmatprep.subr.bf16.mxu1 %v4776_v54 }
 0x20b   :  { %2871 = vmatpush1.bf16.msra.mxu0 %v4688_v13 }
 0x20c   :  { %2872 = vmatprep.subr.bf16.mxu0 %v4693_v18  ;;  %v4778_v18 = vld [vmem:[#allocation6 + $0xc8] sm:$0xff]  }
 0x20f   :  { %2873 = vmatpush1.bf16.msra.mxu0 %v4691_v49 }
 0x210   :  { %2874 = vmatprep.subr.bf16.mxu0 %v4696_v44  ;;  %v4780_v44 = vld [vmem:[#allocation6 + $0xd0] sm:$0xff]  }
 0x213   :  { %2875 = vmatpush1.bf16.msra.mxu0 %v4694_v42  ;;  %v4781_v42 = vld [vmem:[#allocation6 + $0x90] sm:$0xff]  }
 0x214   :  { %2876 = vmatprep.subr.bf16.mxu0 %v4699_v43  ;;  %v4782_v43 = vld [vmem:[#allocation6 + $0xd8] sm:$0xff]  }
 0x217   :  { %2877 = vmatpush1.bf16.msra.mxu0 %v4697_v60  ;;  %v4783_v60 = vld [vmem:[#allocation6 + $0x98] sm:$0xff]  }
 0x218   :  { %2878 = vmatprep.subr.bf16.mxu0 %v4702_v53  ;;  %v4784_v53 = vld [vmem:[#allocation6 + $0xe0] sm:$0xff]  }
 0x21b   :  { %2879 = vmatpush1.bf16.msra.mxu0 %v4700_v3  ;;  %v4785_v3 = vld [vmem:[#allocation6 + $0xa0] sm:$0xff]  }
 0x21c   :  { %2880 = vmatprep.subr.bf16.mxu0 %v4705_v50  ;;  %v4786_v50 = vld [vmem:[#allocation6 + $0xe8] sm:$0xff]  }
 0x21f   :  { %2881 = vmatpush1.bf16.msra.mxu0 %v4703_v35  ;;  %v4787_v35 = vld [vmem:[#allocation6 + $0xa8] sm:$0xff]  }
 0x220   :  { %2882 = vmatprep.subr.bf16.mxu0 %v4708_v10  ;;  %v4788_v10 = vld [vmem:[#allocation6 + $0xf0] sm:$0xff]  }
 0x223   :  { %2883 = vmatpush1.bf16.msra.mxu0 %v4706_v55  ;;  %v4789_v55 = vld [vmem:[#allocation6 + $0xb0] sm:$0xff]  }
 0x224   :  { %2884 = vmatprep.subr.bf16.mxu0 %v4711_v24  ;;  %v4790_v24 = vld [vmem:[#allocation6 + $0xf8] sm:$0xff]  }
 0x227   :  { %2885 = vmatpush1.bf16.msra.mxu0 %v4709_v34  ;;  %v4791_v34 = vld [vmem:[#allocation6 + $0xb8] sm:$0xff]  }
 0x228   :  { %2895 = vmatprep.subr.bf16.mxu0 %v4714_v5 }
 0x22a   :  { %2887 = vmatmul.mubr.bf16.vlgmr.msra.gmra.mrb[4].mxu0 %v5639_v20  ;;  %v4727_v20 = vld [vmem:[#allocation3 + $0x400] ss:$24 sps:$4 sm:$0xff]  }
 0x22b   :  { %2896 = vmatpush1.bf16.msra.mxu0 %v4712_v25  ;;  %2927 = vmatprep.mubr.bf16.mxu0 %v5794_v15  ;;  %v4733_v15 = vld [vmem:[#allocation3 + $0x460] ss:$24 sps:$4 sm:$0xff]  }
 0x22c   :  { %2897 = vmatprep.subr.bf16.mxu0 %v4717_v0  ;;  %v4792_v25 = vld [vmem:[#allocation6 + $0x140] sm:$0xff]  }
 0x22d   :  { %v4793_v0 = vld [vmem:[#allocation6 + $0x100] sm:$0xff]  }
 0x22f   :  { %2898 = vmatpush1.bf16.msra.mxu0 %v4715_v9 }
 0x230   :  { %2899 = vmatprep.subr.bf16.mxu0 %v4720_v41  ;;  %v4794_v41 = vld [vmem:[#allocation6 + $0x148] sm:$0xff]  }
 0x233   :  { %2900 = vmatpush1.bf16.msra.mxu0 %v4718_v26  ;;  %v4795_v26 = vld [vmem:[#allocation6 + $0x108] sm:$0xff]  }
 0x234   :  { %2901 = vmatprep.subr.bf16.mxu0 %v4723_v33  ;;  %v4796_v33 = vld [vmem:[#allocation6 + $0x150] sm:$0xff]  }
 0x237   :  { %2902 = vmatpush1.bf16.msra.mxu0 %v4721_v14  ;;  %v4797_v14 = vld [vmem:[#allocation6 + $0x110] sm:$0xff]  }
 0x238   :  { %2903 = vmatprep.subr.bf16.mxu0 %v4726_v48  ;;  %v4798_v48 = vld [vmem:[#allocation6 + $0x158] sm:$0xff]  }
 0x23b   :  { %2904 = vmatpush1.bf16.msra.mxu0 %v4724_v63  ;;  %v4799_v63 = vld [vmem:[#allocation6 + $0x118] sm:$0xff]  }
 0x23c   :  { %2905 = vmatprep.subr.bf16.mxu0 %v4729_v22  ;;  %v4800_v22 = vld [vmem:[#allocation6 + $0x160] sm:$0xff]  }
 0x23f   :  { %2906 = vmatpush1.bf16.msra.mxu0 %v4727_v20  ;;  %v4801_v20 = vld [vmem:[#allocation6 + $0x120] sm:$0xff]  }
 0x240   :  { %2907 = vmatprep.subr.bf16.mxu0 %v4732_v58  ;;  %v4802_v58 = vld [vmem:[#allocation6 + $0x168] sm:$0xff]  }
 0x243   :  { %2908 = vmatpush1.bf16.msra.mxu0 %v4730_v27  ;;  %v4803_v27 = vld [vmem:[#allocation6 + $0x128] sm:$0xff]  }
 0x244   :  { %2909 = vmatprep.subr.bf16.mxu0 %v4735_v21  ;;  %v4805_v21 = vld [vmem:[#allocation6 + $0x130] sm:$0xff]  }
 0x247   :  { %2910 = vmatpush1.bf16.msra.mxu0 %v4733_v15  ;;  %v4807_v15 = vld [vmem:[#allocation6 + $0x138] sm:$0xff]  }
 0x248   :  { %2911 = vmatprep.subr.bf16.mxu0 %v4738_v46 }
 0x24b   :  { %2912 = vmatpush1.bf16.msra.mxu0 %v4736_v28 }
 0x24c   :  { %2913 = vmatprep.subr.bf16.mxu0 %v4741_v8 }
 0x24f   :  { %2914 = vmatpush1.bf16.msra.mxu0 %v4739_v61 }
 0x250   :  { %2915 = vmatprep.subr.bf16.mxu0 %v4744_v2 }
 0x253   :  { %2916 = vmatpush1.bf16.msra.mxu0 %v4742_v1 }
 0x254   :  { %2917 = vmatprep.subr.bf16.mxu0 %v4747_v38 }
 0x257   :  { %2918 = vmatpush1.bf16.msra.mxu0 %v4745_v32 }
 0x258   :  { %2919 = vmatprep.subr.bf16.mxu0 %v4750_v45 }
 0x25b   :  { %2920 = vmatpush1.bf16.msra.mxu0 %v4748_v52 }
 0x25c   :  { %2921 = vmatprep.subr.bf16.mxu0 %v4753_v40 }
 0x25f   :  { %2922 = vmatpush1.bf16.msra.mxu0 %v4751_v29 }
 0x260   :  { %2923 = vmatprep.subr.bf16.mxu0 %v4756_v17  ;;  %v3672_v17 = vld [vmem:[%s5826_s5] ss:$0 sm:$0xff] }
 0x263   :  { %2924 = vmatpush1.bf16.msra.mxu0 %v4754_v31 }
 0x264   :  { %2925 = vmatprep.subr.bf16.mxu0 %v4759_v23 }
 0x267   :  { %2926 = vmatpush1.bf16.msra.mxu0 %v4757_v36 }
 0x26a   :  { %2928 = vmatmul.mubr.bf16.vlgmr.msra.gmra.mrb[4].mxu0 %v5796_v16  ;;  %v4779_v16 = vld [vmem:[#allocation6 + $0x88] sm:$0xff]  }
 0x2bd   :  { %v2765_v39 = vpop.f32.mrb[0].mxu0  ;;  %v2847_v57 = vpop.f32.mrb[0].mxu1 }
 0x2be   :  { %v2936_v56 = vmax.f32 %v2765_v39, 0.0  ;;  %v2767_v6 = vpop.f32.mrb[1].mxu0  ;;  %v2849_v11 = vpop.f32.mrb[1].mxu1  ;;  %v2938_v5 = vmax.f32 %v2847_v57, 0.0 }
 0x2bf   :  { %v2937_v51 = vmax.f32 %v2767_v6, 0.0  ;;  %v2939_v7 = vmax.f32 %v2849_v11, 0.0  ;;  %v2769_v12 = vpop.f32.mrb[2].mxu0  ;;  %v2851_v37 = vpop.f32.mrb[2].mxu1 }
 0x2c0   :  { %v2770_v30 = vpop.f32.mrb[3].mxu0  ;;  %v2852_v19 = vpop.f32.mrb[3].mxu1  ;;  %v2942_v13 = vpack.c.bf16 %v2936_v56, %v2936_v56  ;;  %v2944_v9 = vpack.c.bf16 %v2938_v5, %v2938_v5 }
 0x2c1   :  { %v2943_v4 = vpack.c.bf16 %v2937_v51, %v2937_v51  ;;  %v2945_v49 = vpack.c.bf16 %v2939_v7, %v2939_v7 }
 0x2c3   :  { %3371 = vmatprep.mubr.bf16.mxu1 %v2943_v4 }
 0x2c4   :  { %3372 = vmatmul.mubr.bf16.vlgmr.msra.gmra.mrb[4].mxu1 %v2942_v13 }
 0x2c5   :  { %3863 = vmatpush3.bf16.msra.mxu1 %v4777_v59  ;;  %3411 = vmatprep.mubr.bf16.mxu1 %v2945_v49 }
 0x2c6   :  { %3864 = vmatprep.subr.bf16.mxu1 %v4778_v18 }
 0x2c9   :  { %3865 = vmatpush3.bf16.msra.mxu1 %v4779_v16 }
 0x2ca   :  { %3866 = vmatprep.subr.bf16.mxu1 %v4780_v44 }
 0x2cd   :  { %3867 = vmatpush3.bf16.msra.mxu1 %v4781_v42 }
 0x2ce   :  { %3868 = vmatprep.subr.bf16.mxu1 %v4782_v43 }
 0x2d1   :  { %3869 = vmatpush3.bf16.msra.mxu1 %v4783_v60 }
 0x2d2   :  { %3870 = vmatprep.subr.bf16.mxu1 %v4784_v53 }
 0x2d5   :  { %3871 = vmatpush3.bf16.msra.mxu1 %v4785_v3 }
 0x2d6   :  { %3872 = vmatprep.subr.bf16.mxu1 %v4786_v50 }
 0x2d9   :  { %3873 = vmatpush3.bf16.msra.mxu1 %v4787_v35 }
 0x2da   :  { %3874 = vmatprep.subr.bf16.mxu1 %v4788_v10 }
 0x2dd   :  { %3875 = vmatpush3.bf16.msra.mxu1 %v4789_v55 }
 0x2de   :  { %3876 = vmatprep.subr.bf16.mxu1 %v4790_v24 }
 0x2e1   :  { %3877 = vmatpush3.bf16.msra.mxu1 %v4791_v34 }
 0x2e2   :  { %3884 = vmatprep.subr.bf16.mxu1 %v4792_v25 }
 0x2e4   :  { %3412 = vmatmul.mubr.bf16.vlgmr.msra.gmra.mrb[8].mxu1 %v2944_v9 }
 0x2e5   :  { %3885 = vmatpush3.bf16.msra.mxu1 %v4793_v0 }
 0x2e6   :  { %3886 = vmatprep.subr.bf16.mxu1 %v4794_v41 }
 0x2e9   :  { %3887 = vmatpush3.bf16.msra.mxu1 %v4795_v26 }
 0x2ea   :  { %3888 = vmatprep.subr.bf16.mxu1 %v4796_v33 }
 0x2ed   :  { %3889 = vmatpush3.bf16.msra.mxu1 %v4797_v14 }
 0x2ee   :  { %3890 = vmatprep.subr.bf16.mxu1 %v4798_v48 }
 0x2f1   :  { %3891 = vmatpush3.bf16.msra.mxu1 %v4799_v63 }
 0x2f2   :  { %3892 = vmatprep.subr.bf16.mxu1 %v4800_v22 }
 0x2f5   :  { %3893 = vmatpush3.bf16.msra.mxu1 %v4801_v20 }
 0x2f6   :  { %3894 = vmatprep.subr.bf16.mxu1 %v4802_v58 }
 0x2f9   :  { %3895 = vmatpush3.bf16.msra.mxu1 %v4803_v27 }
 0x2fa   :  { %3896 = vmatprep.subr.bf16.mxu1 %v4804_v47 }
 0x2fd   :  { %3897 = vmatpush3.bf16.msra.mxu1 %v4805_v21 }
 0x2fe   :  { %3898 = vmatprep.subr.bf16.mxu1 %v4806_v62 }
 0x301   :  { %3899 = vmatpush3.bf16.msra.mxu1 %v4807_v15 }
 0x33d   :  { %v2929_v54 = vpop.f32.mrb[4].mxu0 }
 0x33e   :  { %v2940_v46 = vmax.f32 %v2929_v54, 0.0  ;;  %v2931_v28 = vpop.f32.mrb[5].mxu0 }
 0x33f   :  { %v2941_v8 = vmax.f32 %v2931_v28, 0.0  ;;  %v2933_v61 = vpop.f32.mrb[6].mxu0 }
 0x340   :  { %v2934_v2 = vpop.f32.mrb[7].mxu0  ;;  %v2946_v38 = vpack.c.bf16 %v2940_v46, %v2940_v46 }
 0x341   :  { %v2947_v1 = vpack.c.bf16 %v2941_v8, %v2941_v8 }
 0x343   :  { %3451 = vmatprep.mubr.bf16.mxu1 %v2947_v1 }
 0x344   :  { %3452 = vmatmul.mubr.bf16.vlgmr.msra.gmra.mrb[12].mxu1 %v2946_v38 }
 0x397   :  { %v3856_v32 = vpop.f32.mrb[4].mxu1 }
 0x398   :  { %v3857_v45 = vpop.f32.mrb[5].mxu1 }
 0x399   :  { %v3858_v52 = vadd.f32 %v3857_v45, %v3856_v32  ;;  %v3859_v40 = vpop.f32.mrb[6].mxu1 }
 0x39a   :  { %v3860_v29 = vpop.f32.mrb[7].mxu1 }
 0x39b   :  { %v3374_v36 = vadd.f32 %v3858_v52, %v3672_v17 }
 0x3b7   :  { %v3878_v31 = vpop.f32.mrb[8].mxu1 }
 0x3b8   :  { %v3879_v23 = vpop.f32.mrb[9].mxu1 }
 0x3b9   :  { %v3880_v39 = vadd.f32 %v3879_v23, %v3878_v31  ;;  %v3881_v57 = vpop.f32.mrb[10].mxu1 }
 0x3ba   :  { %v3882_v56 = vpop.f32.mrb[11].mxu1 }
 0x3bb   :  { %v3414_v6 = vadd.f32 %v3880_v39, %v3374_v36 }
 0x417   :  { %v3900_v11 = vpop.f32.mrb[12].mxu1 }
 0x418   :  { %v3901_v51 = vpop.f32.mrb[13].mxu1 }
 0x419   :  { %v3902_v7 = vadd.f32 %v3901_v51, %v3900_v11  ;;  %v3903_v12 = vpop.f32.mrb[14].mxu1 }
 0x41a   :  { %v3904_v37 = vpop.f32.mrb[15].mxu1 }
 0x41b   :  { %v3454_v30 = vadd.f32 %v3902_v7, %v3414_v6 }
 0x41d   :  { %3459 = vst [vmem:[#allocation8] sm:$0xff] %v3454_v30 }
 0x41e   :  { %4864 = shalt.err (!%p4861_p6)
}
 0x41f   :  { %s4865_s30 = scalar_lea.hbm %s5827_s6, 128 }
 0x420   :  { %p4866_p7 = scmp.ne.s32.totalorder %s5827_s6, %s4865_s30  ;;  %p4869_p8 = scmp.lt.u32.totalorder %s4865_s30, %s5827_s6 }
 0x422   :  { %p4871_p9 = pnand %p4869_p8, %p4866_p7 }
 0x424   :  { %4874 = shalt.err (!%p4871_p9)
}
 0x425   :  { %3469 = dma.vmem_to_hbm [thread:$0]  %s3467_s28, 128, %s5827_s6, [#allocation5]  }
 0x426   :  { %4879 = dma.done.wait [#allocation5], 128  }
 0x427   :  { %4880 = vsyncadd [#allocation5], 4294967168 }
 0x428   :  { %3473 = vsyncpa [#allocation4], 1 }
 0x429   :  { %3474 = vsyncpa [#allocation7], 1 }
 0x42a   :  { %3475 = vsyncpa [#allocation5], 1 }

</bundles_post_ra>
